<compile_context>
chip_gen: v7x
topology: tpu7x:2x2x1
jax: 0.10.0
libtpu: 0.0.40
codegen_flags: <defaults>
</compile_context>

<pallas_src>
import math
import functools

import jax
import jax.numpy as jnp
from jax.experimental import pallas as pl
from jax.experimental.pallas import tpu as pltpu


LN_EPS = 1e-5
NEG_INF = -1e30


# ----------------------------- in-kernel helpers -----------------------------

def _layer_norm_f32(y, g, b):
    """y: (N, E) f32; g/b: (1, E) f32."""
    mean = jnp.mean(y, axis=-1, keepdims=True)
    var = jnp.mean((y - mean) ** 2, axis=-1, keepdims=True)
    return (y - mean) * jax.lax.rsqrt(var + LN_EPS) * g + b


def _mha(q, k, v, bias, nhead, scale):
    """Multi-head attention for one batch element.

    q: (L, E) bf16, k/v: (S, E) bf16, bias: additive f32 mask broadcastable to (L, S) or None.
    Heads ride a batched einsum (head axis = dot_general batch axis) instead of per-head
    8-lane slices + concatenate.
    """
    L, E = q.shape
    S = k.shape[0]
    hd = E // nhead
    qh = q.reshape(L, nhead, hd)
    kh = k.reshape(S, nhead, hd)
    vh = v.reshape(S, nhead, hd)
    s = jnp.einsum("lhd,shd->hls", qh, kh, preferred_element_type=jnp.float32)
    s = s * scale
    if bias is not None:
        s = s + bias[None]                                   # broadcast over heads
    s = s - jnp.max(s, axis=-1, keepdims=True)
    p = jnp.exp(s)
    p = p * pl.reciprocal(jnp.sum(p, axis=-1, keepdims=True), approx=True)
    o = jnp.einsum("hls,shd->lhd", p.astype(jnp.bfloat16), vh,
                   preferred_element_type=jnp.float32)
    return o.reshape(L, E)                                    # (L, E) f32


# ----------------------------- fused layer kernels -----------------------------

def _enc_layer_kernel(x_ref, mask_ref, kpm_ref,
                      wqkv_ref, bqkv_ref, wo_ref, bo_ref,
                      ln1g_ref, ln1b_ref,
                      w1_ref, bf1_ref, w2_ref, bf2_ref,
                      ln2g_ref, ln2b_ref,
                      o_ref, *, nhead, scale):
    x = x_ref[0]                                              # (S, E) bf16
    E = x.shape[1]
    bias = mask_ref[...] + kpm_ref[0]                         # (S, S) f32

    # --- fused QKV projection + self-attention ---
    qkv = (jnp.dot(x, wqkv_ref[...], preferred_element_type=jnp.float32)
           + bqkv_ref[...]).astype(jnp.bfloat16)              # (S, 3E)
    q, k, v = qkv[:, :E], qkv[:, E:2 * E], qkv[:, 2 * E:]
    attn = _mha(q, k, v, bias, nhead, scale)                  # (S, E) f32

    # --- out-proj + residual + LayerNorm1 ---
    y = (jnp.dot(attn.astype(jnp.bfloat16), wo_ref[...], preferred_element_type=jnp.float32)
         + bo_ref[...] + x.astype(jnp.float32))
    y = _layer_norm_f32(y, ln1g_ref[...], ln1b_ref[...])

    # --- FFN (lin1 -> ReLU -> lin2) + residual + LayerNorm2; intermediate stays in vregs ---
    h = (jnp.dot(y.astype(jnp.bfloat16), w1_ref[...], preferred_element_type=jnp.float32)
         + bf1_ref[...])
    h = jnp.maximum(h, 0.0).astype(jnp.bfloat16)
    z = (jnp.dot(h, w2_ref[...], preferred_element_type=jnp.float32)
         + bf2_ref[...] + y)
    z = _layer_norm_f32(z, ln2g_ref[...], ln2b_ref[...])
    o_ref[0] = z.astype(jnp.bfloat16)


def _dec_layer_kernel(y_ref, mem_ref, tmask_ref, tkpm_ref, mkpm_ref,
                      sa_wqkv_ref, sa_bqkv_ref, sa_wo_ref, sa_bo_ref,
                      ln1g_ref, ln1b_ref,
                      ca_wq_ref, ca_bq_ref, ca_wkv_ref, ca_bkv_ref,
                      ca_wo_ref, ca_bo_ref,
                      ln2g_ref, ln2b_ref,
                      w1_ref, bf1_ref, w2_ref, bf2_ref,
                      ln3g_ref, ln3b_ref,
                      o_ref, *, nhead, scale):
    y = y_ref[0]                                              # (T, E) bf16
    mem = mem_ref[0]                                          # (S, E) bf16
    E = y.shape[1]
    sa_bias = tmask_ref[...] + tkpm_ref[0]                    # (T, T) f32
    ca_bias = mkpm_ref[0]                                     # (1, S) f32, broadcasts over queries

    # --- masked self-attention + out-proj + residual + LN1 ---
    qkv = (jnp.dot(y, sa_wqkv_ref[...], preferred_element_type=jnp.float32)
           + sa_bqkv_ref[...]).astype(jnp.bfloat16)
    q, k, v = qkv[:, :E], qkv[:, E:2 * E], qkv[:, 2 * E:]
    attn = _mha(q, k, v, sa_bias, nhead, scale)
    y1 = (jnp.dot(attn.astype(jnp.bfloat16), sa_wo_ref[...], preferred_element_type=jnp.float32)
          + sa_bo_ref[...] + y.astype(jnp.float32))
    y1 = _layer_norm_f32(y1, ln1g_ref[...], ln1b_ref[...])

    # --- cross-attention (memory_mask=None in nn.Transformer -> no attn_mask operand) ---
    cq = (jnp.dot(y1.astype(jnp.bfloat16), ca_wq_ref[...], preferred_element_type=jnp.float32)
          + ca_bq_ref[...]).astype(jnp.bfloat16)
    kv = (jnp.dot(mem, ca_wkv_ref[...], preferred_element_type=jnp.float32)
          + ca_bkv_ref[...]).astype(jnp.bfloat16)
    ck, cv = kv[:, :E], kv[:, E:]
    cattn = _mha(cq, ck, cv, ca_bias, nhead, scale)
    y2 = (jnp.dot(cattn.astype(jnp.bfloat16), ca_wo_ref[...], preferred_element_type=jnp.float32)
          + ca_bo_ref[...] + y1)
    y2 = _layer_norm_f32(y2, ln2g_ref[...], ln2b_ref[...])

    # --- FFN + residual + LN3 ---
    h = (jnp.dot(y2.astype(jnp.bfloat16), w1_ref[...], preferred_element_type=jnp.float32)
         + bf1_ref[...])
    h = jnp.maximum(h, 0.0).astype(jnp.bfloat16)
    z = (jnp.dot(h, w2_ref[...], preferred_element_type=jnp.float32)
         + bf2_ref[...] + y2)
    z = _layer_norm_f32(z, ln3g_ref[...], ln3b_ref[...])
    o_ref[0] = z.astype(jnp.bfloat16)


def _ln_kernel(x_ref, g_ref, b_ref, o_ref):
    y = _layer_norm_f32(x_ref[...].astype(jnp.float32), g_ref[...], b_ref[...])
    o_ref[...] = y.astype(o_ref.dtype)


def _ln_gen_kernel(y_ref, g_ref, b_ref, w_ref, wb_ref, o_ref):
    # decoder final LayerNorm fused with the generator projection; output lanes padded to 128k.
    y = _layer_norm_f32(y_ref[...].astype(jnp.float32), g_ref[...], b_ref[...])
    o_ref[...] = (jnp.dot(y.astype(jnp.bfloat16), w_ref[...],
                          preferred_element_type=jnp.float32) + wb_ref[...])


# ----------------------------- pallas_call wrappers -----------------------------

def encoder_layer(x, src_mask, src_kpm, p, nhead):
    """x: (B, S, E) bf16; src_mask: (S, S) f32; src_kpm: (B, 1, S) f32 additive."""
    B, S, E = x.shape
    hd = E // nhead
    weights = [p["wqkv_t"], p["bqkv"], p["wo_t"], p["bo"],
               p["norm1_w"], p["norm1_b"],
               p["w1_t"], p["b1"], p["w2_t"], p["b2"],
               p["norm2_w"], p["norm2_b"]]
    in_specs = ([pl.BlockSpec((1, S, E), lambda b: (b, 0, 0)),
                 pl.BlockSpec((S, S), lambda b: (0, 0)),
                 pl.BlockSpec((1, 1, S), lambda b: (b, 0, 0))] +
                [pl.BlockSpec(w.shape, lambda b: (0, 0)) for w in weights])
    return pl.pallas_call(
        functools.partial(_enc_layer_kernel, nhead=nhead, scale=1.0 / math.sqrt(hd)),
        out_shape=jax.ShapeDtypeStruct((B, S, E), jnp.bfloat16),
        grid=(B,),
        in_specs=in_specs,
        out_specs=pl.BlockSpec((1, S, E), lambda b: (b, 0, 0)),
        compiler_params=pltpu.CompilerParams(dimension_semantics=("parallel",)),
    )(x, src_mask, src_kpm, *weights)


def decoder_layer(y, memory, trg_mask, trg_kpm, mem_kpm, p, nhead):
    """y: (B, T, E) bf16; memory: (B, S, E) bf16; trg_mask: (T, T) f32; kpms additive f32."""
    B, T, E = y.shape
    S = memory.shape[1]
    hd = E // nhead
    sa, ca = p["self_attn"], p["cross_attn"]
    weights = [sa["wqkv_t"], sa["bqkv"], sa["wo_t"], sa["bo"],
               p["norm1_w"], p["norm1_b"],
               ca["wq_t"], ca["bq"], ca["wkv_t"], ca["bkv"], ca["wo_t"], ca["bo"],
               p["norm2_w"], p["norm2_b"],
               p["w1_t"], p["b1"], p["w2_t"], p["b2"],
               p["norm3_w"], p["norm3_b"]]
    in_specs = ([pl.BlockSpec((1, T, E), lambda b: (b, 0, 0)),
                 pl.BlockSpec((1, S, E), lambda b: (b, 0, 0)),
                 pl.BlockSpec((T, T), lambda b: (0, 0)),
                 pl.BlockSpec((1, 1, T), lambda b: (b, 0, 0)),
                 pl.BlockSpec((1, 1, S), lambda b: (b, 0, 0))] +
                [pl.BlockSpec(w.shape, lambda b: (0, 0)) for w in weights])
    return pl.pallas_call(
        functools.partial(_dec_layer_kernel, nhead=nhead, scale=1.0 / math.sqrt(hd)),
        out_shape=jax.ShapeDtypeStruct((B, T, E), jnp.bfloat16),
        grid=(B,),
        in_specs=in_specs,
        out_specs=pl.BlockSpec((1, T, E), lambda b: (b, 0, 0)),
        compiler_params=pltpu.CompilerParams(dimension_semantics=("parallel",)),
    )(y, memory, trg_mask, trg_kpm, mem_kpm, *weights)


def final_layer_norm(x2d, g, b):
    """x2d: (N, E) bf16 -> (N, E) bf16 (single fully-VMEM-resident call)."""
    return pl.pallas_call(
        _ln_kernel,
        out_shape=jax.ShapeDtypeStruct(x2d.shape, jnp.bfloat16),
    )(x2d, g, b)


def final_norm_and_generator(y2d, g, b, gen_wt, gen_b):
    """y2d: (N, E) bf16 -> (N, Vpad) f32 logits (lane-dense, Vpad % 128 == 0)."""
    N = y2d.shape[0]
    Vpad = gen_wt.shape[1]
    return pl.pallas_call(
        _ln_gen_kernel,
        out_shape=jax.ShapeDtypeStruct((N, Vpad), jnp.float32),
    )(y2d, g, b, gen_wt, gen_b)


# ----------------------------- model forward (JAX glue: embeddings, free reshapes) -----------------------------

def seq2seq_transformer_forward(params, src, trg, src_mask, trg_mask,
                                src_padding_mask, trg_padding_mask,
                                memory_key_padding_mask, nhead, trg_vocab):
    S, B = src.shape
    T, _ = trg.shape
    E = params["src_emb"].shape[1]
    sqrt_e = math.sqrt(E)

    # TokenEmbedding * sqrt(E) + PositionalEncoding; internal layout batch-first (B, L, E), bf16.
    # TODO(synk): embedding gather has no dedicated Pallas kernel here (tiny table; plain-JAX gather).
    src_x = (params["src_emb"][src.T] * sqrt_e
             + params["pos_embedding"][None, :S, :]).astype(jnp.bfloat16)
    trg_x = (params["trg_emb"][trg.T] * sqrt_e
             + params["pos_embedding"][None, :T, :]).astype(jnp.bfloat16)

    # key_padding_masks as additive f32 biases (B, 1, L); never expanded to (B*H, L, S).
    src_kpm = jnp.where(src_padding_mask, NEG_INF, 0.0).astype(jnp.float32)[:, None, :]
    trg_kpm = jnp.where(trg_padding_mask, NEG_INF, 0.0).astype(jnp.float32)[:, None, :]
    mem_kpm = jnp.where(memory_key_padding_mask, NEG_INF, 0.0).astype(jnp.float32)[:, None, :]
    src_mask = src_mask.astype(jnp.float32)
    trg_mask = trg_mask.astype(jnp.float32)

    # --- encoder stack (one fused pallas_call per layer) ---
    x = src_x
    for lp in params["enc_layers"]:
        x = encoder_layer(x, src_mask, src_kpm, lp, nhead)
    memory = final_layer_norm(x.reshape(B * S, E),
                              params["enc_norm_w"], params["enc_norm_b"]).reshape(B, S, E)

    # --- decoder stack (one fused pallas_call per layer) ---
    y = trg_x
    for lp in params["dec_layers"]:
        y = decoder_layer(y, memory, trg_mask, trg_kpm, mem_kpm, lp, nhead)

    # --- decoder final LN + generator (vocab padded to 128 lanes, sliced back here) ---
    logits = final_norm_and_generator(y.reshape(B * T, E),
                                      params["dec_norm_w"], params["dec_norm_b"],
                                      params["gen_wt"], params["gen_b"])
    logits = logits[:, :trg_vocab].reshape(B, T, trg_vocab)
    return jnp.transpose(logits, (1, 0, 2))                   # back to seq-first (T, B, V)


# ----------------------------- deterministic parameter init (pre-transposed bf16 weights) -----------------------------

def init_params(num_enc, num_dec, E, src_vocab, trg_vocab, dff, maxlen=64):
    keys = iter(jax.random.split(jax.random.PRNGKey(0), 512))

    def randn(shape, scale=0.02):
        return (scale * jax.random.normal(next(keys), shape)).astype(jnp.float32)

    def w_t(din, dout):                    # pre-transposed (Din, Dout), bf16 for the MXU
        return randn((din, dout)).astype(jnp.bfloat16)

    def bias(d):
        return randn((1, d))

    def ln(d):
        return jnp.ones((1, d), jnp.float32), jnp.zeros((1, d), jnp.float32)

    def self_attn_p():
        return {"wqkv_t": w_t(E, 3 * E), "bqkv": bias(3 * E),
                "wo_t": w_t(E, E), "bo": bias(E)}

    def cross_attn_p():
        return {"wq_t": w_t(E, E), "bq": bias(E),
                "wkv_t": w_t(E, 2 * E), "bkv": bias(2 * E),
                "wo_t": w_t(E, E), "bo": bias(E)}

    def enc_layer_p():
        sa = self_attn_p()
        n1w, n1b = ln(E); n2w, n2b = ln(E)
        return {"wqkv_t": sa["wqkv_t"], "bqkv": sa["bqkv"], "wo_t": sa["wo_t"], "bo": sa["bo"],
                "w1_t": w_t(E, dff), "b1": bias(dff),
                "w2_t": w_t(dff, E), "b2": bias(E),
                "norm1_w": n1w, "norm1_b": n1b, "norm2_w": n2w, "norm2_b": n2b}

    def dec_layer_p():
        n1w, n1b = ln(E); n2w, n2b = ln(E); n3w, n3b = ln(E)
        return {"self_attn": self_attn_p(), "cross_attn": cross_attn_p(),
                "w1_t": w_t(E, dff), "b1": bias(dff),
                "w2_t": w_t(dff, E), "b2": bias(E),
                "norm1_w": n1w, "norm1_b": n1b, "norm2_w": n2w, "norm2_b": n2b,
                "norm3_w": n3w, "norm3_b": n3b}

    # PositionalEncoding buffer, same recipe as the PyTorch module.
    den = jnp.exp(-jnp.arange(0, E, 2, dtype=jnp.float32) * math.log(10000.0) / E)
    pos = jnp.arange(0, maxlen, dtype=jnp.float32).reshape(maxlen, 1)
    pe = jnp.zeros((maxlen, E), jnp.float32)
    pe = pe.at[:, 0::2].set(jnp.sin(pos * den))
    pe = pe.at[:, 1::2].set(jnp.cos(pos * den))

    # Generator padded to a multiple of 128 output lanes for lane-dense stores.
    vpad = ((trg_vocab + 127) // 128) * 128
    gen_wt_full = randn((E, trg_vocab)).astype(jnp.bfloat16)
    gen_wt = jnp.zeros((E, vpad), jnp.bfloat16).at[:, :trg_vocab].set(gen_wt_full)
    gen_b = jnp.zeros((1, vpad), jnp.float32).at[:, :trg_vocab].set(bias(trg_vocab)[0])

    enc_nw, enc_nb = ln(E)
    dec_nw, dec_nb = ln(E)
    return {
        "src_emb": randn((src_vocab, E), scale=1.0),
        "trg_emb": randn((trg_vocab, E), scale=1.0),
        "pos_embedding": pe,
        "enc_layers": [enc_layer_p() for _ in range(num_enc)],
        "dec_layers": [dec_layer_p() for _ in range(num_dec)],
        "enc_norm_w": enc_nw, "enc_norm_b": enc_nb,
        "dec_norm_w": dec_nw, "dec_norm_b": dec_nb,
        "gen_wt": gen_wt, "gen_b": gen_b,
    }


# ----------------------------- main -----------------------------

if __name__ == "__main__":
    NUM_ENC, NUM_DEC = 2, 2
    EMB, NHEAD, DFF = 32, 4, 64
    SRC_VOCAB, TRG_VOCAB = 50, 60
    S, T, B = 8, 8, 2

    params = init_params(NUM_ENC, NUM_DEC, EMB, SRC_VOCAB, TRG_VOCAB, DFF)

    k1, k2 = jax.random.split(jax.random.PRNGKey(0))
    src = jax.random.randint(k1, (S, B), 0, SRC_VOCAB, dtype=jnp.int32)    # (S, B) seq-first
    trg = jax.random.randint(k2, (T, B), 0, TRG_VOCAB, dtype=jnp.int32)    # (T, B) seq-first

    src_mask = jnp.zeros((S, S), jnp.float32)                              # no src masking
    trg_mask = jnp.triu(jnp.full((T, T), NEG_INF, jnp.float32), k=1)       # causal
    src_padding_mask = jnp.zeros((B, S), bool)
    trg_padding_mask = jnp.zeros((B, T), bool)
    memory_key_padding_mask = jnp.zeros((B, S), bool)

    fwd = jax.jit(functools.partial(seq2seq_transformer_forward,
                                    nhead=NHEAD, trg_vocab=TRG_VOCAB))
    out = fwd(params, src, trg, src_mask, trg_mask,
              src_padding_mask, trg_padding_mask, memory_key_padding_mask)
    out = jax.block_until_ready(out)
    assert out.shape == (T, B, TRG_VOCAB), out.shape
    assert bool(jnp.all(jnp.isfinite(out)))
    # TODO(synk): dropout is identity (eval-mode); training-mode dropout RNG is not implemented here.
    print("KERNEL_OK")
</pallas_src>

<mosaic_0001>
module attributes {stable_mosaic.version = 11 : i64} {
  func.func @_ln_kernel(%arg0: memref<16x32xbf16, #tpu.memory_space<vmem>>, %arg1: memref<1x32xf32, #tpu.memory_space<vmem>>, %arg2: memref<1x32xf32, #tpu.memory_space<vmem>>, %arg3: memref<16x32xbf16, #tpu.memory_space<vmem>>) attributes {dimension_semantics = [], scalar_prefetch = 0 : i64, scratch_operands = 0 : i64, tpu.core_type = #tpu.core_type<tc>} {
    %c0 = arith.constant 0 : index
    %c0_0 = arith.constant 0 : index
    %0 = vector.load %arg0[%c0, %c0_0] : memref<16x32xbf16, #tpu.memory_space<vmem>>, vector<16x32xbf16>
    %1 = arith.extf %0 : vector<16x32xbf16> to vector<16x32xf32>
    %c0_1 = arith.constant 0 : index
    %c0_2 = arith.constant 0 : index
    %2 = vector.load %arg1[%c0_1, %c0_2] : memref<1x32xf32, #tpu.memory_space<vmem>>, vector<1x32xf32>
    %c0_3 = arith.constant 0 : index
    %c0_4 = arith.constant 0 : index
    %3 = vector.load %arg2[%c0_3, %c0_4] : memref<1x32xf32, #tpu.memory_space<vmem>>, vector<1x32xf32>
    %cst = arith.constant dense<0.000000e+00> : vector<16xf32>
    %4 = vector.multi_reduction <add>, %1, %cst [1] : vector<16x32xf32> to vector<16xf32>
    %5 = vector.shape_cast %4 : vector<16xf32> to vector<16x1xf32>
    %cst_5 = arith.constant 3.200000e+01 : f32
    %6 = vector.broadcast %cst_5 : f32 to vector<16x1xf32>
    %7 = arith.divf %5, %6 : vector<16x1xf32>
    %8 = vector.broadcast %7 : vector<16x1xf32> to vector<16x32xf32>
    %9 = arith.subf %1, %8 : vector<16x32xf32>
    %10 = arith.mulf %9, %9 : vector<16x32xf32>
    %cst_6 = arith.constant dense<0.000000e+00> : vector<16xf32>
    %11 = vector.multi_reduction <add>, %10, %cst_6 [1] : vector<16x32xf32> to vector<16xf32>
    %12 = vector.shape_cast %11 : vector<16xf32> to vector<16x1xf32>
    %cst_7 = arith.constant 3.200000e+01 : f32
    %13 = vector.broadcast %cst_7 : f32 to vector<16x1xf32>
    %14 = arith.divf %12, %13 : vector<16x1xf32>
    %15 = vector.broadcast %7 : vector<16x1xf32> to vector<16x32xf32>
    %16 = arith.subf %1, %15 : vector<16x32xf32>
    %cst_8 = arith.constant 9.99999974E-6 : f32
    %17 = vector.broadcast %cst_8 : f32 to vector<16x1xf32>
    %18 = arith.addf %14, %17 : vector<16x1xf32>
    %19 = math.rsqrt %18 : vector<16x1xf32>
    %20 = vector.broadcast %19 : vector<16x1xf32> to vector<16x32xf32>
    %21 = arith.mulf %16, %20 : vector<16x32xf32>
    %22 = vector.broadcast %2 : vector<1x32xf32> to vector<16x32xf32>
    %23 = arith.mulf %21, %22 : vector<16x32xf32>
    %24 = vector.broadcast %3 : vector<1x32xf32> to vector<16x32xf32>
    %25 = arith.addf %23, %24 : vector<16x32xf32>
    %26 = arith.truncf %25 : vector<16x32xf32> to vector<16x32xbf16>
    %c0_9 = arith.constant 0 : index
    %c0_10 = arith.constant 0 : index
    %27 = vector.load %arg3[%c0_9, %c0_10] : memref<16x32xbf16, #tpu.memory_space<vmem>>, vector<16x32xbf16>
    tpu.vector_store %arg3[%c0_9, %c0_10], %26 {strides = array<i32>} : memref<16x32xbf16, #tpu.memory_space<vmem>>, vector<16x32xbf16>,
    return
  }
}

module attributes {stable_mosaic.version = 11 : i64} {
  func.func @_enc_layer_kernel(%arg0: i32, %arg1: memref<1x8x32xbf16, #tpu.memory_space<vmem>>, %arg2: memref<8x8xf32, #tpu.memory_space<vmem>>, %arg3: memref<1x1x8xf32, #tpu.memory_space<vmem>>, %arg4: memref<32x96xbf16, #tpu.memory_space<vmem>>, %arg5: memref<1x96xf32, #tpu.memory_space<vmem>>, %arg6: memref<32x32xbf16, #tpu.memory_space<vmem>>, %arg7: memref<1x32xf32, #tpu.memory_space<vmem>>, %arg8: memref<1x32xf32, #tpu.memory_space<vmem>>, %arg9: memref<1x32xf32, #tpu.memory_space<vmem>>, %arg10: memref<32x64xbf16, #tpu.memory_space<vmem>>, %arg11: memref<1x64xf32, #tpu.memory_space<vmem>>, %arg12: memref<64x32xbf16, #tpu.memory_space<vmem>>, %arg13: memref<1x32xf32, #tpu.memory_space<vmem>>, %arg14: memref<1x32xf32, #tpu.memory_space<vmem>>, %arg15: memref<1x32xf32, #tpu.memory_space<vmem>>, %arg16: memref<1x8x32xbf16, #tpu.memory_space<vmem>>) attributes {dimension_semantics = [#tpu.dimension_semantics<parallel>], iteration_bounds = array<i64: 2>, scalar_prefetch = 0 : i64, scratch_operands = 0 : i64, tpu.core_type = #tpu.core_type<tc>, window_params = [{transform_indices = @transform_0, window_bounds = array<i64: 1, 8, 32>}, {pipeline_mode = #tpu.pipeline_mode<synchronous>, transform_indices = @transform_1, window_bounds = array<i64: 8, 8>}, {transform_indices = @transform_2, window_bounds = array<i64: 1, 1, 8>}, {pipeline_mode = #tpu.pipeline_mode<synchronous>, transform_indices = @transform_3, window_bounds = array<i64: 32, 96>}, {pipeline_mode = #tpu.pipeline_mode<synchronous>, transform_indices = @transform_4, window_bounds = array<i64: 1, 96>}, {pipeline_mode = #tpu.pipeline_mode<synchronous>, transform_indices = @transform_5, window_bounds = array<i64: 32, 32>}, {pipeline_mode = #tpu.pipeline_mode<synchronous>, transform_indices = @transform_6, window_bounds = array<i64: 1, 32>}, {pipeline_mode = #tpu.pipeline_mode<synchronous>, transform_indices = @transform_7, window_bounds = array<i64: 1, 32>}, {pipeline_mode = #tpu.pipeline_mode<synchronous>, transform_indices = @transform_8, window_bounds = array<i64: 1, 32>}, {pipeline_mode = #tpu.pipeline_mode<synchronous>, transform_indices = @transform_9, window_bounds = array<i64: 32, 64>}, {pipeline_mode = #tpu.pipeline_mode<synchronous>, transform_indices = @transform_10, window_bounds = array<i64: 1, 64>}, {pipeline_mode = #tpu.pipeline_mode<synchronous>, transform_indices = @transform_11, window_bounds = array<i64: 64, 32>}, {pipeline_mode = #tpu.pipeline_mode<synchronous>, transform_indices = @transform_12, window_bounds = array<i64: 1, 32>}, {pipeline_mode = #tpu.pipeline_mode<synchronous>, transform_indices = @transform_13, window_bounds = array<i64: 1, 32>}, {pipeline_mode = #tpu.pipeline_mode<synchronous>, transform_indices = @transform_14, window_bounds = array<i64: 1, 32>}, {transform_indices = @transform_15, window_bounds = array<i64: 1, 8, 32>}]} {
    %c0 = arith.constant 0 : index
    %c0_0 = arith.constant 0 : index
    %c0_1 = arith.constant 0 : index
    %0 = vector.load %arg1[%c0, %c0_0, %c0_1] : memref<1x8x32xbf16, #tpu.memory_space<vmem>>, vector<1x8x32xbf16>
    %1 = vector.shape_cast %0 : vector<1x8x32xbf16> to vector<8x32xbf16>
    %c0_2 = arith.constant 0 : index
    %c0_3 = arith.constant 0 : index
    %2 = vector.load %arg2[%c0_2, %c0_3] : memref<8x8xf32, #tpu.memory_space<vmem>>, vector<8x8xf32>
    %c0_4 = arith.constant 0 : index
    %c0_5 = arith.constant 0 : index
    %c0_6 = arith.constant 0 : index
    %3 = vector.load %arg3[%c0_4, %c0_5, %c0_6] : memref<1x1x8xf32, #tpu.memory_space<vmem>>, vector<1x1x8xf32>
    %4 = vector.shape_cast %3 : vector<1x1x8xf32> to vector<1x8xf32>
    %5 = vector.broadcast %4 : vector<1x8xf32> to vector<8x8xf32>
    %6 = arith.addf %2, %5 : vector<8x8xf32>
    %c0_7 = arith.constant 0 : index
    %c0_8 = arith.constant 0 : index
    %7 = vector.load %arg4[%c0_7, %c0_8] : memref<32x96xbf16, #tpu.memory_space<vmem>>, vector<32x96xbf16>
    %cst = arith.constant dense<0.000000e+00> : vector<8x96xf32>
    %8 = tpu.matmul %1, %7, %cst {dimension_numbers = #tpu.dot_dimension_numbers<[1], [0], [0], [1], [0, 0, 1, 1], [], []>} : vector<8x32xbf16>, vector<32x96xbf16>, vector<8x96xf32> -> vector<8x96xf32>
    %c0_9 = arith.constant 0 : index
    %c0_10 = arith.constant 0 : index
    %9 = vector.load %arg5[%c0_9, %c0_10] : memref<1x96xf32, #tpu.memory_space<vmem>>, vector<1x96xf32>
    %10 = vector.broadcast %9 : vector<1x96xf32> to vector<8x96xf32>
    %11 = arith.addf %8, %10 : vector<8x96xf32>
    %12 = arith.truncf %11 : vector<8x96xf32> to vector<8x96xbf16>
    %13 = vector.extract_strided_slice %12 {offsets = [0, 0], sizes = [8, 32], strides = [1, 1]} : vector<8x96xbf16> to vector<8x32xbf16>
    %14 = vector.extract_strided_slice %12 {offsets = [0, 32], sizes = [8, 32], strides = [1, 1]} : vector<8x96xbf16> to vector<8x32xbf16>
    %15 = vector.extract_strided_slice %12 {offsets = [0, 64], sizes = [8, 32], strides = [1, 1]} : vector<8x96xbf16> to vector<8x32xbf16>
    %16 = vector.shape_cast %13 : vector<8x32xbf16> to vector<8x4x8xbf16>
    %17 = vector.shape_cast %14 : vector<8x32xbf16> to vector<8x4x8xbf16>
    %18 = vector.shape_cast %15 : vector<8x32xbf16> to vector<8x4x8xbf16>
    "tpu.trace_start"() <{level = 10 : i32, message = "lhd,shd->hls"}> : () -> ()
    %cst_11 = arith.constant dense<0.000000e+00> : vector<4x8x8xf32>
    %19 = tpu.matmul %16, %17, %cst_11 {dimension_numbers = #tpu.dot_dimension_numbers<[2], [2], [0], [0], [0, 1, 0, 0, 1, 0], [1], [1]>} : vector<8x4x8xbf16>, vector<8x4x8xbf16>, vector<4x8x8xf32> -> vector<4x8x8xf32>
    "tpu.trace_stop"() : () -> ()
    %cst_12 = arith.constant 0.353553385 : f32
    %20 = vector.broadcast %cst_12 : f32 to vector<4x8x8xf32>
    %21 = arith.mulf %19, %20 : vector<4x8x8xf32>
    %22 = vector.shape_cast %6 : vector<8x8xf32> to vector<1x8x8xf32>
    %23 = vector.broadcast %22 : vector<1x8x8xf32> to vector<4x8x8xf32>
    %24 = arith.addf %21, %23 : vector<4x8x8xf32>
    %cst_13 = arith.constant dense<0xFF800000> : vector<4x8xf32>
    %25 = vector.multi_reduction <maximumf>, %24, %cst_13 [2] : vector<4x8x8xf32> to vector<4x8xf32>
    %26 = vector.shape_cast %25 : vector<4x8xf32> to vector<4x8x1xf32>
    %27 = vector.broadcast %26 : vector<4x8x1xf32> to vector<4x8x8xf32>
    %28 = arith.subf %24, %27 : vector<4x8x8xf32>
    %29 = math.exp %28 : vector<4x8x8xf32>
    %cst_14 = arith.constant dense<0.000000e+00> : vector<4x8xf32>
    %30 = vector.multi_reduction <add>, %29, %cst_14 [2] : vector<4x8x8xf32> to vector<4x8xf32>
    %31 = vector.shape_cast %30 : vector<4x8xf32> to vector<4x8x1xf32>
    %32 = tpu.reciprocal %31 {approx = true} : vector<4x8x1xf32> -> vector<4x8x1xf32>
    %33 = vector.broadcast %32 : vector<4x8x1xf32> to vector<4x8x8xf32>
    %34 = arith.mulf %29, %33 : vector<4x8x8xf32>
    %35 = arith.truncf %34 : vector<4x8x8xf32> to vector<4x8x8xbf16>
    "tpu.trace_start"() <{level = 10 : i32, message = "hls,shd->lhd"}> : () -> ()
    %cst_15 = arith.constant dense<0.000000e+00> : vector<4x8x8xf32>
    %36 = tpu.matmul %18, %35, %cst_15 {dimension_numbers = #tpu.dot_dimension_numbers<[0], [2], [2], [1], [0, 1, 0, 2, 1, 1], [1], [0]>} : vector<8x4x8xbf16>, vector<4x8x8xbf16>, vector<4x8x8xf32> -> vector<4x8x8xf32>
    %37 = tpu.transpose %36, [2, 0, 1] : vector<4x8x8xf32> -> vector<8x4x8xf32>
    "tpu.trace_stop"() : () -> ()
    %38 = vector.shape_cast %37 : vector<8x4x8xf32> to vector<8x32xf32>
    %39 = arith.truncf %38 : vector<8x32xf32> to vector<8x32xbf16>
    %c0_16 = arith.constant 0 : index
    %c0_17 = arith.constant 0 : index
    %40 = vector.load %arg6[%c0_16, %c0_17] : memref<32x32xbf16, #tpu.memory_space<vmem>>, vector<32x32xbf16>
    %cst_18 = arith.constant dense<0.000000e+00> : vector<8x32xf32>
    %41 = tpu.matmul %39, %40, %cst_18 {dimension_numbers = #tpu.dot_dimension_numbers<[1], [0], [0], [1], [0, 0, 1, 1], [], []>} : vector<8x32xbf16>, vector<32x32xbf16>, vector<8x32xf32> -> vector<8x32xf32>
    %c0_19 = arith.constant 0 : index
    %c0_20 = arith.constant 0 : index
    %42 = vector.load %arg7[%c0_19, %c0_20] : memref<1x32xf32, #tpu.memory_space<vmem>>, vector<1x32xf32>
    %43 = vector.broadcast %42 : vector<1x32xf32> to vector<8x32xf32>
    %44 = arith.addf %41, %43 : vector<8x32xf32>
    %45 = arith.extf %1 : vector<8x32xbf16> to vector<8x32xf32>
    %46 = arith.addf %44, %45 : vector<8x32xf32>
    %c0_21 = arith.constant 0 : index
    %c0_22 = arith.constant 0 : index
    %47 = vector.load %arg8[%c0_21, %c0_22] : memref<1x32xf32, #tpu.memory_space<vmem>>, vector<1x32xf32>
    %c0_23 = arith.constant 0 : index
    %c0_24 = arith.constant 0 : index
    %48 = vector.load %arg9[%c0_23, %c0_24] : memref<1x32xf32, #tpu.memory_space<vmem>>, vector<1x32xf32>
    %cst_25 = arith.constant dense<0.000000e+00> : vector<8xf32>
    %49 = vector.multi_reduction <add>, %46, %cst_25 [1] : vector<8x32xf32> to vector<8xf32>
    %50 = vector.shape_cast %49 : vector<8xf32> to vector<8x1xf32>
    %cst_26 = arith.constant 3.200000e+01 : f32
    %51 = vector.broadcast %cst_26 : f32 to vector<8x1xf32>
    %52 = arith.divf %50, %51 : vector<8x1xf32>
    %53 = vector.broadcast %52 : vector<8x1xf32> to vector<8x32xf32>
    %54 = arith.subf %46, %53 : vector<8x32xf32>
    %55 = arith.mulf %54, %54 : vector<8x32xf32>
    %cst_27 = arith.constant dense<0.000000e+00> : vector<8xf32>
    %56 = vector.multi_reduction <add>, %55, %cst_27 [1] : vector<8x32xf32> to vector<8xf32>
    %57 = vector.shape_cast %56 : vector<8xf32> to vector<8x1xf32>
    %cst_28 = arith.constant 3.200000e+01 : f32
    %58 = vector.broadcast %cst_28 : f32 to vector<8x1xf32>
    %59 = arith.divf %57, %58 : vector<8x1xf32>
    %60 = vector.broadcast %52 : vector<8x1xf32> to vector<8x32xf32>
    %61 = arith.subf %46, %60 : vector<8x32xf32>
    %cst_29 = arith.constant 9.99999974E-6 : f32
    %62 = vector.broadcast %cst_29 : f32 to vector<8x1xf32>
    %63 = arith.addf %59, %62 : vector<8x1xf32>
    %64 = math.rsqrt %63 : vector<8x1xf32>
    %65 = vector.broadcast %64 : vector<8x1xf32> to vector<8x32xf32>
    %66 = arith.mulf %61, %65 : vector<8x32xf32>
    %67 = vector.broadcast %47 : vector<1x32xf32> to vector<8x32xf32>
    %68 = arith.mulf %66, %67 : vector<8x32xf32>
    %69 = vector.broadcast %48 : vector<1x32xf32> to vector<8x32xf32>
    %70 = arith.addf %68, %69 : vector<8x32xf32>
    %71 = arith.truncf %70 : vector<8x32xf32> to vector<8x32xbf16>
    %c0_30 = arith.constant 0 : index
    %c0_31 = arith.constant 0 : index
    %72 = vector.load %arg10[%c0_30, %c0_31] : memref<32x64xbf16, #tpu.memory_space<vmem>>, vector<32x64xbf16>
    %cst_32 = arith.constant dense<0.000000e+00> : vector<8x64xf32>
    %73 = tpu.matmul %71, %72, %cst_32 {dimension_numbers = #tpu.dot_dimension_numbers<[1], [0], [0], [1], [0, 0, 1, 1], [], []>} : vector<8x32xbf16>, vector<32x64xbf16>, vector<8x64xf32> -> vector<8x64xf32>
    %c0_33 = arith.constant 0 : index
    %c0_34 = arith.constant 0 : index
    %74 = vector.load %arg11[%c0_33, %c0_34] : memref<1x64xf32, #tpu.memory_space<vmem>>, vector<1x64xf32>
    %75 = vector.broadcast %74 : vector<1x64xf32> to vector<8x64xf32>
    %76 = arith.addf %73, %75 : vector<8x64xf32>
    %cst_35 = arith.constant 0.000000e+00 : f32
    %77 = vector.broadcast %cst_35 : f32 to vector<8x64xf32>
    %78 = arith.maximumf %76, %77 : vector<8x64xf32>
    %79 = arith.truncf %78 : vector<8x64xf32> to vector<8x64xbf16>
    %c0_36 = arith.constant 0 : index
    %c0_37 = arith.constant 0 : index
    %80 = vector.load %arg12[%c0_36, %c0_37] : memref<64x32xbf16, #tpu.memory_space<vmem>>, vector<64x32xbf16>
    %cst_38 = arith.constant dense<0.000000e+00> : vector<8x32xf32>
    %81 = tpu.matmul %79, %80, %cst_38 {dimension_numbers = #tpu.dot_dimension_numbers<[1], [0], [0], [1], [0, 0, 1, 1], [], []>} : vector<8x64xbf16>, vector<64x32xbf16>, vector<8x32xf32> -> vector<8x32xf32>
    %c0_39 = arith.constant 0 : index
    %c0_40 = arith.constant 0 : index
    %82 = vector.load %arg13[%c0_39, %c0_40] : memref<1x32xf32, #tpu.memory_space<vmem>>, vector<1x32xf32>
    %83 = vector.broadcast %82 : vector<1x32xf32> to vector<8x32xf32>
    %84 = arith.addf %81, %83 : vector<8x32xf32>
    %85 = arith.addf %84, %70 : vector<8x32xf32>
    %c0_41 = arith.constant 0 : index
    %c0_42 = arith.constant 0 : index
    %86 = vector.load %arg14[%c0_41, %c0_42] : memref<1x32xf32, #tpu.memory_space<vmem>>, vector<1x32xf32>
    %c0_43 = arith.constant 0 : index
    %c0_44 = arith.constant 0 : index
    %87 = vector.load %arg15[%c0_43, %c0_44] : memref<1x32xf32, #tpu.memory_space<vmem>>, vector<1x32xf32>
    %cst_45 = arith.constant dense<0.000000e+00> : vector<8xf32>
    %88 = vector.multi_reduction <add>, %85, %cst_45 [1] : vector<8x32xf32> to vector<8xf32>
    %89 = vector.shape_cast %88 : vector<8xf32> to vector<8x1xf32>
    %cst_46 = arith.constant 3.200000e+01 : f32
    %90 = vector.broadcast %cst_46 : f32 to vector<8x1xf32>
    %91 = arith.divf %89, %90 : vector<8x1xf32>
    %92 = vector.broadcast %91 : vector<8x1xf32> to vector<8x32xf32>
    %93 = arith.subf %85, %92 : vector<8x32xf32>
    %94 = arith.mulf %93, %93 : vector<8x32xf32>
    %cst_47 = arith.constant dense<0.000000e+00> : vector<8xf32>
    %95 = vector.multi_reduction <add>, %94, %cst_47 [1] : vector<8x32xf32> to vector<8xf32>
    %96 = vector.shape_cast %95 : vector<8xf32> to vector<8x1xf32>
    %cst_48 = arith.constant 3.200000e+01 : f32
    %97 = vector.broadcast %cst_48 : f32 to vector<8x1xf32>
    %98 = arith.divf %96, %97 : vector<8x1xf32>
    %99 = vector.broadcast %91 : vector<8x1xf32> to vector<8x32xf32>
    %100 = arith.subf %85, %99 : vector<8x32xf32>
    %cst_49 = arith.constant 9.99999974E-6 : f32
    %101 = vector.broadcast %cst_49 : f32 to vector<8x1xf32>
    %102 = arith.addf %98, %101 : vector<8x1xf32>
    %103 = math.rsqrt %102 : vector<8x1xf32>
    %104 = vector.broadcast %103 : vector<8x1xf32> to vector<8x32xf32>
    %105 = arith.mulf %100, %104 : vector<8x32xf32>
    %106 = vector.broadcast %86 : vector<1x32xf32> to vector<8x32xf32>
    %107 = arith.mulf %105, %106 : vector<8x32xf32>
    %108 = vector.broadcast %87 : vector<1x32xf32> to vector<8x32xf32>
    %109 = arith.addf %107, %108 : vector<8x32xf32>
    %110 = arith.truncf %109 : vector<8x32xf32> to vector<8x32xbf16>
    %c0_50 = arith.constant 0 : index
    %c0_51 = arith.constant 0 : index
    %c0_52 = arith.constant 0 : index
    %111 = vector.load %arg16[%c0_50, %c0_51, %c0_52] : memref<1x8x32xbf16, #tpu.memory_space<vmem>>, vector<1x8x32xbf16>
    %112 = vector.shape_cast %111 : vector<1x8x32xbf16> to vector<8x32xbf16>
    %113 = vector.shape_cast %110 : vector<8x32xbf16> to vector<1x8x32xbf16>
    tpu.vector_store %arg16[%c0_50, %c0_51, %c0_52], %113 {strides = array<i32>} : memref<1x8x32xbf16, #tpu.memory_space<vmem>>, vector<1x8x32xbf16>,
    return
  }
  func.func @transform_0(%arg0: i32) -> (i32, i32, i32) {
    %c0_i32 = arith.constant 0 : i32
    %c0_i32_0 = arith.constant 0 : i32
    %c0_i32_1 = arith.constant 0 : i32
    return %arg0, %c0_i32, %c0_i32_0 : i32, i32, i32
  }
  func.func @transform_1(%arg0: i32) -> (i32, i32) {
    %c0_i32 = arith.constant 0 : i32
    %c0_i32_0 = arith.constant 0 : i32
    %c0_i32_1 = arith.constant 0 : i32
    return %c0_i32, %c0_i32_0 : i32, i32
  }
  func.func @transform_2(%arg0: i32) -> (i32, i32, i32) {
    %c0_i32 = arith.constant 0 : i32
    %c0_i32_0 = arith.constant 0 : i32
    %c0_i32_1 = arith.constant 0 : i32
    return %arg0, %c0_i32, %c0_i32_0 : i32, i32, i32
  }
  func.func @transform_3(%arg0: i32) -> (i32, i32) {
    %c0_i32 = arith.constant 0 : i32
    %c0_i32_0 = arith.constant 0 : i32
    %c0_i32_1 = arith.constant 0 : i32
    return %c0_i32, %c0_i32_0 : i32, i32
  }
  func.func @transform_4(%arg0: i32) -> (i32, i32) {
    %c0_i32 = arith.constant 0 : i32
    %c0_i32_0 = arith.constant 0 : i32
    %c0_i32_1 = arith.constant 0 : i32
    return %c0_i32, %c0_i32_0 : i32, i32
  }
  func.func @transform_5(%arg0: i32) -> (i32, i32) {
    %c0_i32 = arith.constant 0 : i32
    %c0_i32_0 = arith.constant 0 : i32
    %c0_i32_1 = arith.constant 0 : i32
    return %c0_i32, %c0_i32_0 : i32, i32
  }
  func.func @transform_6(%arg0: i32) -> (i32, i32) {
    %c0_i32 = arith.constant 0 : i32
    %c0_i32_0 = arith.constant 0 : i32
    %c0_i32_1 = arith.constant 0 : i32
    return %c0_i32, %c0_i32_0 : i32, i32
  }
  func.func @transform_7(%arg0: i32) -> (i32, i32) {
    %c0_i32 = arith.constant 0 : i32
    %c0_i32_0 = arith.constant 0 : i32
    %c0_i32_1 = arith.constant 0 : i32
    return %c0_i32, %c0_i32_0 : i32, i32
  }
  func.func @transform_8(%arg0: i32) -> (i32, i32) {
    %c0_i32 = arith.constant 0 : i32
    %c0_i32_0 = arith.constant 0 : i32
    %c0_i32_1 = arith.constant 0 : i32
    return %c0_i32, %c0_i32_0 : i32, i32
  }
  func.func @transform_9(%arg0: i32) -> (i32, i32) {
    %c0_i32 = arith.constant 0 : i32
    %c0_i32_0 = arith.constant 0 : i32
    %c0_i32_1 = arith.constant 0 : i32
    return %c0_i32, %c0_i32_0 : i32, i32
  }
  func.func @transform_10(%arg0: i32) -> (i32, i32) {
    %c0_i32 = arith.constant 0 : i32
    %c0_i32_0 = arith.constant 0 : i32
    %c0_i32_1 = arith.constant 0 : i32
    return %c0_i32, %c0_i32_0 : i32, i32
  }
  func.func @transform_11(%arg0: i32) -> (i32, i32) {
    %c0_i32 = arith.constant 0 : i32
    %c0_i32_0 = arith.constant 0 : i32
    %c0_i32_1 = arith.constant 0 : i32
    return %c0_i32, %c0_i32_0 : i32, i32
  }
  func.func @transform_12(%arg0: i32) -> (i32, i32) {
    %c0_i32 = arith.constant 0 : i32
    %c0_i32_0 = arith.constant 0 : i32
    %c0_i32_1 = arith.constant 0 : i32
    return %c0_i32, %c0_i32_0 : i32, i32
  }
  func.func @transform_13(%arg0: i32) -> (i32, i32) {
    %c0_i32 = arith.constant 0 : i32
    %c0_i32_0 = arith.constant 0 : i32
    %c0_i32_1 = arith.constant 0 : i32
    return %c0_i32, %c0_i32_0 : i32, i32
  }
  func.func @transform_14(%arg0: i32) -> (i32, i32) {
    %c0_i32 = arith.constant 0 : i32
    %c0_i32_0 = arith.constant 0 : i32
    %c0_i32_1 = arith.constant 0 : i32
    return %c0_i32, %c0_i32_0 : i32, i32
  }
  func.func @transform_15(%arg0: i32) -> (i32, i32, i32) {
    %c0_i32 = arith.constant 0 : i32
    %c0_i32_0 = arith.constant 0 : i32
    %c0_i32_1 = arith.constant 0 : i32
    return %arg0, %c0_i32, %c0_i32_0 : i32, i32, i32
  }
}

module attributes {stable_mosaic.version = 11 : i64} {
  func.func @_dec_layer_kernel(%arg0: i32, %arg1: memref<1x8x32xbf16, #tpu.memory_space<vmem>>, %arg2: memref<1x8x32xbf16, #tpu.memory_space<vmem>>, %arg3: memref<8x8xf32, #tpu.memory_space<vmem>>, %arg4: memref<1x1x8xf32, #tpu.memory_space<vmem>>, %arg5: memref<1x1x8xf32, #tpu.memory_space<vmem>>, %arg6: memref<32x96xbf16, #tpu.memory_space<vmem>>, %arg7: memref<1x96xf32, #tpu.memory_space<vmem>>, %arg8: memref<32x32xbf16, #tpu.memory_space<vmem>>, %arg9: memref<1x32xf32, #tpu.memory_space<vmem>>, %arg10: memref<1x32xf32, #tpu.memory_space<vmem>>, %arg11: memref<1x32xf32, #tpu.memory_space<vmem>>, %arg12: memref<32x32xbf16, #tpu.memory_space<vmem>>, %arg13: memref<1x32xf32, #tpu.memory_space<vmem>>, %arg14: memref<32x64xbf16, #tpu.memory_space<vmem>>, %arg15: memref<1x64xf32, #tpu.memory_space<vmem>>, %arg16: memref<32x32xbf16, #tpu.memory_space<vmem>>, %arg17: memref<1x32xf32, #tpu.memory_space<vmem>>, %arg18: memref<1x32xf32, #tpu.memory_space<vmem>>, %arg19: memref<1x32xf32, #tpu.memory_space<vmem>>, %arg20: memref<32x64xbf16, #tpu.memory_space<vmem>>, %arg21: memref<1x64xf32, #tpu.memory_space<vmem>>, %arg22: memref<64x32xbf16, #tpu.memory_space<vmem>>, %arg23: memref<1x32xf32, #tpu.memory_space<vmem>>, %arg24: memref<1x32xf32, #tpu.memory_space<vmem>>, %arg25: memref<1x32xf32, #tpu.memory_space<vmem>>, %arg26: memref<1x8x32xbf16, #tpu.memory_space<vmem>>) attributes {dimension_semantics = [#tpu.dimension_semantics<parallel>], iteration_bounds = array<i64: 2>, scalar_prefetch = 0 : i64, scratch_operands = 0 : i64, tpu.core_type = #tpu.core_type<tc>, window_params = [{transform_indices = @transform_0, window_bounds = array<i64: 1, 8, 32>}, {transform_indices = @transform_1, window_bounds = array<i64: 1, 8, 32>}, {pipeline_mode = #tpu.pipeline_mode<synchronous>, transform_indices = @transform_2, window_bounds = array<i64: 8, 8>}, {transform_indices = @transform_3, window_bounds = array<i64: 1, 1, 8>}, {transform_indices = @transform_4, window_bounds = array<i64: 1, 1, 8>}, {pipeline_mode = #tpu.pipeline_mode<synchronous>, transform_indices = @transform_5, window_bounds = array<i64: 32, 96>}, {pipeline_mode = #tpu.pipeline_mode<synchronous>, transform_indices = @transform_6, window_bounds = array<i64: 1, 96>}, {pipeline_mode = #tpu.pipeline_mode<synchronous>, transform_indices = @transform_7, window_bounds = array<i64: 32, 32>}, {pipeline_mode = #tpu.pipeline_mode<synchronous>, transform_indices = @transform_8, window_bounds = array<i64: 1, 32>}, {pipeline_mode = #tpu.pipeline_mode<synchronous>, transform_indices = @transform_9, window_bounds = array<i64: 1, 32>}, {pipeline_mode = #tpu.pipeline_mode<synchronous>, transform_indices = @transform_10, window_bounds = array<i64: 1, 32>}, {pipeline_mode = #tpu.pipeline_mode<synchronous>, transform_indices = @transform_11, window_bounds = array<i64: 32, 32>}, {pipeline_mode = #tpu.pipeline_mode<synchronous>, transform_indices = @transform_12, window_bounds = array<i64: 1, 32>}, {pipeline_mode = #tpu.pipeline_mode<synchronous>, transform_indices = @transform_13, window_bounds = array<i64: 32, 64>}, {pipeline_mode = #tpu.pipeline_mode<synchronous>, transform_indices = @transform_14, window_bounds = array<i64: 1, 64>}, {pipeline_mode = #tpu.pipeline_mode<synchronous>, transform_indices = @transform_15, window_bounds = array<i64: 32, 32>}, {pipeline_mode = #tpu.pipeline_mode<synchronous>, transform_indices = @transform_16, window_bounds = array<i64: 1, 32>}, {pipeline_mode = #tpu.pipeline_mode<synchronous>, transform_indices = @transform_17, window_bounds = array<i64: 1, 32>}, {pipeline_mode = #tpu.pipeline_mode<synchronous>, transform_indices = @transform_18, window_bounds = array<i64: 1, 32>}, {pipeline_mode = #tpu.pipeline_mode<synchronous>, transform_indices = @transform_19, window_bounds = array<i64: 32, 64>}, {pipeline_mode = #tpu.pipeline_mode<synchronous>, transform_indices = @transform_20, window_bounds = array<i64: 1, 64>}, {pipeline_mode = #tpu.pipeline_mode<synchronous>, transform_indices = @transform_21, window_bounds = array<i64: 64, 32>}, {pipeline_mode = #tpu.pipeline_mode<synchronous>, transform_indices = @transform_22, window_bounds = array<i64: 1, 32>}, {pipeline_mode = #tpu.pipeline_mode<synchronous>, transform_indices = @transform_23, window_bounds = array<i64: 1, 32>}, {pipeline_mode = #tpu.pipeline_mode<synchronous>, transform_indices = @transform_24, window_bounds = array<i64: 1, 32>}, {transform_indices = @transform_25, window_bounds = array<i64: 1, 8, 32>}]} {
    %c0 = arith.constant 0 : index
    %c0_0 = arith.constant 0 : index
    %c0_1 = arith.constant 0 : index
    %0 = vector.load %arg1[%c0, %c0_0, %c0_1] : memref<1x8x32xbf16, #tpu.memory_space<vmem>>, vector<1x8x32xbf16>
    %1 = vector.shape_cast %0 : vector<1x8x32xbf16> to vector<8x32xbf16>
    %c0_2 = arith.constant 0 : index
    %c0_3 = arith.constant 0 : index
    %c0_4 = arith.constant 0 : index
    %2 = vector.load %arg2[%c0_2, %c0_3, %c0_4] : memref<1x8x32xbf16, #tpu.memory_space<vmem>>, vector<1x8x32xbf16>
    %3 = vector.shape_cast %2 : vector<1x8x32xbf16> to vector<8x32xbf16>
    %c0_5 = arith.constant 0 : index
    %c0_6 = arith.constant 0 : index
    %4 = vector.load %arg3[%c0_5, %c0_6] : memref<8x8xf32, #tpu.memory_space<vmem>>, vector<8x8xf32>
    %c0_7 = arith.constant 0 : index
    %c0_8 = arith.constant 0 : index
    %c0_9 = arith.constant 0 : index
    %5 = vector.load %arg4[%c0_7, %c0_8, %c0_9] : memref<1x1x8xf32, #tpu.memory_space<vmem>>, vector<1x1x8xf32>
    %6 = vector.shape_cast %5 : vector<1x1x8xf32> to vector<1x8xf32>
    %7 = vector.broadcast %6 : vector<1x8xf32> to vector<8x8xf32>
    %8 = arith.addf %4, %7 : vector<8x8xf32>
    %c0_10 = arith.constant 0 : index
    %c0_11 = arith.constant 0 : index
    %c0_12 = arith.constant 0 : index
    %9 = vector.load %arg5[%c0_10, %c0_11, %c0_12] : memref<1x1x8xf32, #tpu.memory_space<vmem>>, vector<1x1x8xf32>
    %10 = vector.shape_cast %9 : vector<1x1x8xf32> to vector<1x8xf32>
    %c0_13 = arith.constant 0 : index
    %c0_14 = arith.constant 0 : index
    %11 = vector.load %arg6[%c0_13, %c0_14] : memref<32x96xbf16, #tpu.memory_space<vmem>>, vector<32x96xbf16>
    %cst = arith.constant dense<0.000000e+00> : vector<8x96xf32>
    %12 = tpu.matmul %1, %11, %cst {dimension_numbers = #tpu.dot_dimension_numbers<[1], [0], [0], [1], [0, 0, 1, 1], [], []>} : vector<8x32xbf16>, vector<32x96xbf16>, vector<8x96xf32> -> vector<8x96xf32>
    %c0_15 = arith.constant 0 : index
    %c0_16 = arith.constant 0 : index
    %13 = vector.load %arg7[%c0_15, %c0_16] : memref<1x96xf32, #tpu.memory_space<vmem>>, vector<1x96xf32>
    %14 = vector.broadcast %13 : vector<1x96xf32> to vector<8x96xf32>
    %15 = arith.addf %12, %14 : vector<8x96xf32>
    %16 = arith.truncf %15 : vector<8x96xf32> to vector<8x96xbf16>
    %17 = vector.extract_strided_slice %16 {offsets = [0, 0], sizes = [8, 32], strides = [1, 1]} : vector<8x96xbf16> to vector<8x32xbf16>
    %18 = vector.extract_strided_slice %16 {offsets = [0, 32], sizes = [8, 32], strides = [1, 1]} : vector<8x96xbf16> to vector<8x32xbf16>
    %19 = vector.extract_strided_slice %16 {offsets = [0, 64], sizes = [8, 32], strides = [1, 1]} : vector<8x96xbf16> to vector<8x32xbf16>
    %20 = vector.shape_cast %17 : vector<8x32xbf16> to vector<8x4x8xbf16>
    %21 = vector.shape_cast %18 : vector<8x32xbf16> to vector<8x4x8xbf16>
    %22 = vector.shape_cast %19 : vector<8x32xbf16> to vector<8x4x8xbf16>
    "tpu.trace_start"() <{level = 10 : i32, message = "lhd,shd->hls"}> : () -> ()
    %cst_17 = arith.constant dense<0.000000e+00> : vector<4x8x8xf32>
    %23 = tpu.matmul %20, %21, %cst_17 {dimension_numbers = #tpu.dot_dimension_numbers<[2], [2], [0], [0], [0, 1, 0, 0, 1, 0], [1], [1]>} : vector<8x4x8xbf16>, vector<8x4x8xbf16>, vector<4x8x8xf32> -> vector<4x8x8xf32>
    "tpu.trace_stop"() : () -> ()
    %cst_18 = arith.constant 0.353553385 : f32
    %24 = vector.broadcast %cst_18 : f32 to vector<4x8x8xf32>
    %25 = arith.mulf %23, %24 : vector<4x8x8xf32>
    %26 = vector.shape_cast %8 : vector<8x8xf32> to vector<1x8x8xf32>
    %27 = vector.broadcast %26 : vector<1x8x8xf32> to vector<4x8x8xf32>
    %28 = arith.addf %25, %27 : vector<4x8x8xf32>
    %cst_19 = arith.constant dense<0xFF800000> : vector<4x8xf32>
    %29 = vector.multi_reduction <maximumf>, %28, %cst_19 [2] : vector<4x8x8xf32> to vector<4x8xf32>
    %30 = vector.shape_cast %29 : vector<4x8xf32> to vector<4x8x1xf32>
    %31 = vector.broadcast %30 : vector<4x8x1xf32> to vector<4x8x8xf32>
    %32 = arith.subf %28, %31 : vector<4x8x8xf32>
    %33 = math.exp %32 : vector<4x8x8xf32>
    %cst_20 = arith.constant dense<0.000000e+00> : vector<4x8xf32>
    %34 = vector.multi_reduction <add>, %33, %cst_20 [2] : vector<4x8x8xf32> to vector<4x8xf32>
    %35 = vector.shape_cast %34 : vector<4x8xf32> to vector<4x8x1xf32>
    %36 = tpu.reciprocal %35 {approx = true} : vector<4x8x1xf32> -> vector<4x8x1xf32>
    %37 = vector.broadcast %36 : vector<4x8x1xf32> to vector<4x8x8xf32>
    %38 = arith.mulf %33, %37 : vector<4x8x8xf32>
    %39 = arith.truncf %38 : vector<4x8x8xf32> to vector<4x8x8xbf16>
    "tpu.trace_start"() <{level = 10 : i32, message = "hls,shd->lhd"}> : () -> ()
    %cst_21 = arith.constant dense<0.000000e+00> : vector<4x8x8xf32>
    %40 = tpu.matmul %22, %39, %cst_21 {dimension_numbers = #tpu.dot_dimension_numbers<[0], [2], [2], [1], [0, 1, 0, 2, 1, 1], [1], [0]>} : vector<8x4x8xbf16>, vector<4x8x8xbf16>, vector<4x8x8xf32> -> vector<4x8x8xf32>
    %41 = tpu.transpose %40, [2, 0, 1] : vector<4x8x8xf32> -> vector<8x4x8xf32>
    "tpu.trace_stop"() : () -> ()
    %42 = vector.shape_cast %41 : vector<8x4x8xf32> to vector<8x32xf32>
    %43 = arith.truncf %42 : vector<8x32xf32> to vector<8x32xbf16>
    %c0_22 = arith.constant 0 : index
    %c0_23 = arith.constant 0 : index
    %44 = vector.load %arg8[%c0_22, %c0_23] : memref<32x32xbf16, #tpu.memory_space<vmem>>, vector<32x32xbf16>
    %cst_24 = arith.constant dense<0.000000e+00> : vector<8x32xf32>
    %45 = tpu.matmul %43, %44, %cst_24 {dimension_numbers = #tpu.dot_dimension_numbers<[1], [0], [0], [1], [0, 0, 1, 1], [], []>} : vector<8x32xbf16>, vector<32x32xbf16>, vector<8x32xf32> -> vector<8x32xf32>
    %c0_25 = arith.constant 0 : index
    %c0_26 = arith.constant 0 : index
    %46 = vector.load %arg9[%c0_25, %c0_26] : memref<1x32xf32, #tpu.memory_space<vmem>>, vector<1x32xf32>
    %47 = vector.broadcast %46 : vector<1x32xf32> to vector<8x32xf32>
    %48 = arith.addf %45, %47 : vector<8x32xf32>
    %49 = arith.extf %1 : vector<8x32xbf16> to vector<8x32xf32>
    %50 = arith.addf %48, %49 : vector<8x32xf32>
    %c0_27 = arith.constant 0 : index
    %c0_28 = arith.constant 0 : index
    %51 = vector.load %arg10[%c0_27, %c0_28] : memref<1x32xf32, #tpu.memory_space<vmem>>, vector<1x32xf32>
    %c0_29 = arith.constant 0 : index
    %c0_30 = arith.constant 0 : index
    %52 = vector.load %arg11[%c0_29, %c0_30] : memref<1x32xf32, #tpu.memory_space<vmem>>, vector<1x32xf32>
    %cst_31 = arith.constant dense<0.000000e+00> : vector<8xf32>
    %53 = vector.multi_reduction <add>, %50, %cst_31 [1] : vector<8x32xf32> to vector<8xf32>
    %54 = vector.shape_cast %53 : vector<8xf32> to vector<8x1xf32>
    %cst_32 = arith.constant 3.200000e+01 : f32
    %55 = vector.broadcast %cst_32 : f32 to vector<8x1xf32>
    %56 = arith.divf %54, %55 : vector<8x1xf32>
    %57 = vector.broadcast %56 : vector<8x1xf32> to vector<8x32xf32>
    %58 = arith.subf %50, %57 : vector<8x32xf32>
    %59 = arith.mulf %58, %58 : vector<8x32xf32>
    %cst_33 = arith.constant dense<0.000000e+00> : vector<8xf32>
    %60 = vector.multi_reduction <add>, %59, %cst_33 [1] : vector<8x32xf32> to vector<8xf32>
    %61 = vector.shape_cast %60 : vector<8xf32> to vector<8x1xf32>
    %cst_34 = arith.constant 3.200000e+01 : f32
    %62 = vector.broadcast %cst_34 : f32 to vector<8x1xf32>
    %63 = arith.divf %61, %62 : vector<8x1xf32>
    %64 = vector.broadcast %56 : vector<8x1xf32> to vector<8x32xf32>
    %65 = arith.subf %50, %64 : vector<8x32xf32>
    %cst_35 = arith.constant 9.99999974E-6 : f32
    %66 = vector.broadcast %cst_35 : f32 to vector<8x1xf32>
    %67 = arith.addf %63, %66 : vector<8x1xf32>
    %68 = math.rsqrt %67 : vector<8x1xf32>
    %69 = vector.broadcast %68 : vector<8x1xf32> to vector<8x32xf32>
    %70 = arith.mulf %65, %69 : vector<8x32xf32>
    %71 = vector.broadcast %51 : vector<1x32xf32> to vector<8x32xf32>
    %72 = arith.mulf %70, %71 : vector<8x32xf32>
    %73 = vector.broadcast %52 : vector<1x32xf32> to vector<8x32xf32>
    %74 = arith.addf %72, %73 : vector<8x32xf32>
    %75 = arith.truncf %74 : vector<8x32xf32> to vector<8x32xbf16>
    %c0_36 = arith.constant 0 : index
    %c0_37 = arith.constant 0 : index
    %76 = vector.load %arg12[%c0_36, %c0_37] : memref<32x32xbf16, #tpu.memory_space<vmem>>, vector<32x32xbf16>
    %cst_38 = arith.constant dense<0.000000e+00> : vector<8x32xf32>
    %77 = tpu.matmul %75, %76, %cst_38 {dimension_numbers = #tpu.dot_dimension_numbers<[1], [0], [0], [1], [0, 0, 1, 1], [], []>} : vector<8x32xbf16>, vector<32x32xbf16>, vector<8x32xf32> -> vector<8x32xf32>
    %c0_39 = arith.constant 0 : index
    %c0_40 = arith.constant 0 : index
    %78 = vector.load %arg13[%c0_39, %c0_40] : memref<1x32xf32, #tpu.memory_space<vmem>>, vector<1x32xf32>
    %79 = vector.broadcast %78 : vector<1x32xf32> to vector<8x32xf32>
    %80 = arith.addf %77, %79 : vector<8x32xf32>
    %81 = arith.truncf %80 : vector<8x32xf32> to vector<8x32xbf16>
    %c0_41 = arith.constant 0 : index
    %c0_42 = arith.constant 0 : index
    %82 = vector.load %arg14[%c0_41, %c0_42] : memref<32x64xbf16, #tpu.memory_space<vmem>>, vector<32x64xbf16>
    %cst_43 = arith.constant dense<0.000000e+00> : vector<8x64xf32>
    %83 = tpu.matmul %3, %82, %cst_43 {dimension_numbers = #tpu.dot_dimension_numbers<[1], [0], [0], [1], [0, 0, 1, 1], [], []>} : vector<8x32xbf16>, vector<32x64xbf16>, vector<8x64xf32> -> vector<8x64xf32>
    %c0_44 = arith.constant 0 : index
    %c0_45 = arith.constant 0 : index
    %84 = vector.load %arg15[%c0_44, %c0_45] : memref<1x64xf32, #tpu.memory_space<vmem>>, vector<1x64xf32>
    %85 = vector.broadcast %84 : vector<1x64xf32> to vector<8x64xf32>
    %86 = arith.addf %83, %85 : vector<8x64xf32>
    %87 = arith.truncf %86 : vector<8x64xf32> to vector<8x64xbf16>
    %88 = vector.extract_strided_slice %87 {offsets = [0, 0], sizes = [8, 32], strides = [1, 1]} : vector<8x64xbf16> to vector<8x32xbf16>
    %89 = vector.extract_strided_slice %87 {offsets = [0, 32], sizes = [8, 32], strides = [1, 1]} : vector<8x64xbf16> to vector<8x32xbf16>
    %90 = vector.shape_cast %81 : vector<8x32xbf16> to vector<8x4x8xbf16>
    %91 = vector.shape_cast %88 : vector<8x32xbf16> to vector<8x4x8xbf16>
    %92 = vector.shape_cast %89 : vector<8x32xbf16> to vector<8x4x8xbf16>
    "tpu.trace_start"() <{level = 10 : i32, message = "lhd,shd->hls"}> : () -> ()
    %cst_46 = arith.constant dense<0.000000e+00> : vector<4x8x8xf32>
    %93 = tpu.matmul %90, %91, %cst_46 {dimension_numbers = #tpu.dot_dimension_numbers<[2], [2], [0], [0], [0, 1, 0, 0, 1, 0], [1], [1]>} : vector<8x4x8xbf16>, vector<8x4x8xbf16>, vector<4x8x8xf32> -> vector<4x8x8xf32>
    "tpu.trace_stop"() : () -> ()
    %cst_47 = arith.constant 0.353553385 : f32
    %94 = vector.broadcast %cst_47 : f32 to vector<4x8x8xf32>
    %95 = arith.mulf %93, %94 : vector<4x8x8xf32>
    %96 = vector.shape_cast %10 : vector<1x8xf32> to vector<1x1x8xf32>
    %97 = vector.broadcast %96 : vector<1x1x8xf32> to vector<4x8x8xf32>
    %98 = arith.addf %95, %97 : vector<4x8x8xf32>
    %cst_48 = arith.constant dense<0xFF800000> : vector<4x8xf32>
    %99 = vector.multi_reduction <maximumf>, %98, %cst_48 [2] : vector<4x8x8xf32> to vector<4x8xf32>
    %100 = vector.shape_cast %99 : vector<4x8xf32> to vector<4x8x1xf32>
    %101 = vector.broadcast %100 : vector<4x8x1xf32> to vector<4x8x8xf32>
    %102 = arith.subf %98, %101 : vector<4x8x8xf32>
    %103 = math.exp %102 : vector<4x8x8xf32>
    %cst_49 = arith.constant dense<0.000000e+00> : vector<4x8xf32>
    %104 = vector.multi_reduction <add>, %103, %cst_49 [2] : vector<4x8x8xf32> to vector<4x8xf32>
    %105 = vector.shape_cast %104 : vector<4x8xf32> to vector<4x8x1xf32>
    %106 = tpu.reciprocal %105 {approx = true} : vector<4x8x1xf32> -> vector<4x8x1xf32>
    %107 = vector.broadcast %106 : vector<4x8x1xf32> to vector<4x8x8xf32>
    %108 = arith.mulf %103, %107 : vector<4x8x8xf32>
    %109 = arith.truncf %108 : vector<4x8x8xf32> to vector<4x8x8xbf16>
    "tpu.trace_start"() <{level = 10 : i32, message = "hls,shd->lhd"}> : () -> ()
    %cst_50 = arith.constant dense<0.000000e+00> : vector<4x8x8xf32>
    %110 = tpu.matmul %92, %109, %cst_50 {dimension_numbers = #tpu.dot_dimension_numbers<[0], [2], [2], [1], [0, 1, 0, 2, 1, 1], [1], [0]>} : vector<8x4x8xbf16>, vector<4x8x8xbf16>, vector<4x8x8xf32> -> vector<4x8x8xf32>
    %111 = tpu.transpose %110, [2, 0, 1] : vector<4x8x8xf32> -> vector<8x4x8xf32>
    "tpu.trace_stop"() : () -> ()
    %112 = vector.shape_cast %111 : vector<8x4x8xf32> to vector<8x32xf32>
    %113 = arith.truncf %112 : vector<8x32xf32> to vector<8x32xbf16>
    %c0_51 = arith.constant 0 : index
    %c0_52 = arith.constant 0 : index
    %114 = vector.load %arg16[%c0_51, %c0_52] : memref<32x32xbf16, #tpu.memory_space<vmem>>, vector<32x32xbf16>
    %cst_53 = arith.constant dense<0.000000e+00> : vector<8x32xf32>
    %115 = tpu.matmul %113, %114, %cst_53 {dimension_numbers = #tpu.dot_dimension_numbers<[1], [0], [0], [1], [0, 0, 1, 1], [], []>} : vector<8x32xbf16>, vector<32x32xbf16>, vector<8x32xf32> -> vector<8x32xf32>
    %c0_54 = arith.constant 0 : index
    %c0_55 = arith.constant 0 : index
    %116 = vector.load %arg17[%c0_54, %c0_55] : memref<1x32xf32, #tpu.memory_space<vmem>>, vector<1x32xf32>
    %117 = vector.broadcast %116 : vector<1x32xf32> to vector<8x32xf32>
    %118 = arith.addf %115, %117 : vector<8x32xf32>
    %119 = arith.addf %118, %74 : vector<8x32xf32>
    %c0_56 = arith.constant 0 : index
    %c0_57 = arith.constant 0 : index
    %120 = vector.load %arg18[%c0_56, %c0_57] : memref<1x32xf32, #tpu.memory_space<vmem>>, vector<1x32xf32>
    %c0_58 = arith.constant 0 : index
    %c0_59 = arith.constant 0 : index
    %121 = vector.load %arg19[%c0_58, %c0_59] : memref<1x32xf32, #tpu.memory_space<vmem>>, vector<1x32xf32>
    %cst_60 = arith.constant dense<0.000000e+00> : vector<8xf32>
    %122 = vector.multi_reduction <add>, %119, %cst_60 [1] : vector<8x32xf32> to vector<8xf32>
    %123 = vector.shape_cast %122 : vector<8xf32> to vector<8x1xf32>
    %cst_61 = arith.constant 3.200000e+01 : f32
    %124 = vector.broadcast %cst_61 : f32 to vector<8x1xf32>
    %125 = arith.divf %123, %124 : vector<8x1xf32>
    %126 = vector.broadcast %125 : vector<8x1xf32> to vector<8x32xf32>
    %127 = arith.subf %119, %126 : vector<8x32xf32>
    %128 = arith.mulf %127, %127 : vector<8x32xf32>
    %cst_62 = arith.constant dense<0.000000e+00> : vector<8xf32>
    %129 = vector.multi_reduction <add>, %128, %cst_62 [1] : vector<8x32xf32> to vector<8xf32>
    %130 = vector.shape_cast %129 : vector<8xf32> to vector<8x1xf32>
    %cst_63 = arith.constant 3.200000e+01 : f32
    %131 = vector.broadcast %cst_63 : f32 to vector<8x1xf32>
    %132 = arith.divf %130, %131 : vector<8x1xf32>
    %133 = vector.broadcast %125 : vector<8x1xf32> to vector<8x32xf32>
    %134 = arith.subf %119, %133 : vector<8x32xf32>
    %cst_64 = arith.constant 9.99999974E-6 : f32
    %135 = vector.broadcast %cst_64 : f32 to vector<8x1xf32>
    %136 = arith.addf %132, %135 : vector<8x1xf32>
    %137 = math.rsqrt %136 : vector<8x1xf32>
    %138 = vector.broadcast %137 : vector<8x1xf32> to vector<8x32xf32>
    %139 = arith.mulf %134, %138 : vector<8x32xf32>
    %140 = vector.broadcast %120 : vector<1x32xf32> to vector<8x32xf32>
    %141 = arith.mulf %139, %140 : vector<8x32xf32>
    %142 = vector.broadcast %121 : vector<1x32xf32> to vector<8x32xf32>
    %143 = arith.addf %141, %142 : vector<8x32xf32>
    %144 = arith.truncf %143 : vector<8x32xf32> to vector<8x32xbf16>
    %c0_65 = arith.constant 0 : index
    %c0_66 = arith.constant 0 : index
    %145 = vector.load %arg20[%c0_65, %c0_66] : memref<32x64xbf16, #tpu.memory_space<vmem>>, vector<32x64xbf16>
    %cst_67 = arith.constant dense<0.000000e+00> : vector<8x64xf32>
    %146 = tpu.matmul %144, %145, %cst_67 {dimension_numbers = #tpu.dot_dimension_numbers<[1], [0], [0], [1], [0, 0, 1, 1], [], []>} : vector<8x32xbf16>, vector<32x64xbf16>, vector<8x64xf32> -> vector<8x64xf32>
    %c0_68 = arith.constant 0 : index
    %c0_69 = arith.constant 0 : index
    %147 = vector.load %arg21[%c0_68, %c0_69] : memref<1x64xf32, #tpu.memory_space<vmem>>, vector<1x64xf32>
    %148 = vector.broadcast %147 : vector<1x64xf32> to vector<8x64xf32>
    %149 = arith.addf %146, %148 : vector<8x64xf32>
    %cst_70 = arith.constant 0.000000e+00 : f32
    %150 = vector.broadcast %cst_70 : f32 to vector<8x64xf32>
    %151 = arith.maximumf %149, %150 : vector<8x64xf32>
    %152 = arith.truncf %151 : vector<8x64xf32> to vector<8x64xbf16>
    %c0_71 = arith.constant 0 : index
    %c0_72 = arith.constant 0 : index
    %153 = vector.load %arg22[%c0_71, %c0_72] : memref<64x32xbf16, #tpu.memory_space<vmem>>, vector<64x32xbf16>
    %cst_73 = arith.constant dense<0.000000e+00> : vector<8x32xf32>
    %154 = tpu.matmul %152, %153, %cst_73 {dimension_numbers = #tpu.dot_dimension_numbers<[1], [0], [0], [1], [0, 0, 1, 1], [], []>} : vector<8x64xbf16>, vector<64x32xbf16>, vector<8x32xf32> -> vector<8x32xf32>
    %c0_74 = arith.constant 0 : index
    %c0_75 = arith.constant 0 : index
    %155 = vector.load %arg23[%c0_74, %c0_75] : memref<1x32xf32, #tpu.memory_space<vmem>>, vector<1x32xf32>
    %156 = vector.broadcast %155 : vector<1x32xf32> to vector<8x32xf32>
    %157 = arith.addf %154, %156 : vector<8x32xf32>
    %158 = arith.addf %157, %143 : vector<8x32xf32>
    %c0_76 = arith.constant 0 : index
    %c0_77 = arith.constant 0 : index
    %159 = vector.load %arg24[%c0_76, %c0_77] : memref<1x32xf32, #tpu.memory_space<vmem>>, vector<1x32xf32>
    %c0_78 = arith.constant 0 : index
    %c0_79 = arith.constant 0 : index
    %160 = vector.load %arg25[%c0_78, %c0_79] : memref<1x32xf32, #tpu.memory_space<vmem>>, vector<1x32xf32>
    %cst_80 = arith.constant dense<0.000000e+00> : vector<8xf32>
    %161 = vector.multi_reduction <add>, %158, %cst_80 [1] : vector<8x32xf32> to vector<8xf32>
    %162 = vector.shape_cast %161 : vector<8xf32> to vector<8x1xf32>
    %cst_81 = arith.constant 3.200000e+01 : f32
    %163 = vector.broadcast %cst_81 : f32 to vector<8x1xf32>
    %164 = arith.divf %162, %163 : vector<8x1xf32>
    %165 = vector.broadcast %164 : vector<8x1xf32> to vector<8x32xf32>
    %166 = arith.subf %158, %165 : vector<8x32xf32>
    %167 = arith.mulf %166, %166 : vector<8x32xf32>
    %cst_82 = arith.constant dense<0.000000e+00> : vector<8xf32>
    %168 = vector.multi_reduction <add>, %167, %cst_82 [1] : vector<8x32xf32> to vector<8xf32>
    %169 = vector.shape_cast %168 : vector<8xf32> to vector<8x1xf32>
    %cst_83 = arith.constant 3.200000e+01 : f32
    %170 = vector.broadcast %cst_83 : f32 to vector<8x1xf32>
    %171 = arith.divf %169, %170 : vector<8x1xf32>
    %172 = vector.broadcast %164 : vector<8x1xf32> to vector<8x32xf32>
    %173 = arith.subf %158, %172 : vector<8x32xf32>
    %cst_84 = arith.constant 9.99999974E-6 : f32
    %174 = vector.broadcast %cst_84 : f32 to vector<8x1xf32>
    %175 = arith.addf %171, %174 : vector<8x1xf32>
    %176 = math.rsqrt %175 : vector<8x1xf32>
    %177 = vector.broadcast %176 : vector<8x1xf32> to vector<8x32xf32>
    %178 = arith.mulf %173, %177 : vector<8x32xf32>
    %179 = vector.broadcast %159 : vector<1x32xf32> to vector<8x32xf32>
    %180 = arith.mulf %178, %179 : vector<8x32xf32>
    %181 = vector.broadcast %160 : vector<1x32xf32> to vector<8x32xf32>
    %182 = arith.addf %180, %181 : vector<8x32xf32>
    %183 = arith.truncf %182 : vector<8x32xf32> to vector<8x32xbf16>
    %c0_85 = arith.constant 0 : index
    %c0_86 = arith.constant 0 : index
    %c0_87 = arith.constant 0 : index
    %184 = vector.load %arg26[%c0_85, %c0_86, %c0_87] : memref<1x8x32xbf16, #tpu.memory_space<vmem>>, vector<1x8x32xbf16>
    %185 = vector.shape_cast %184 : vector<1x8x32xbf16> to vector<8x32xbf16>
    %186 = vector.shape_cast %183 : vector<8x32xbf16> to vector<1x8x32xbf16>
    tpu.vector_store %arg26[%c0_85, %c0_86, %c0_87], %186 {strides = array<i32>} : memref<1x8x32xbf16, #tpu.memory_space<vmem>>, vector<1x8x32xbf16>,
    return
  }
  func.func @transform_0(%arg0: i32) -> (i32, i32, i32) {
    %c0_i32 = arith.constant 0 : i32
    %c0_i32_0 = arith.constant 0 : i32
    %c0_i32_1 = arith.constant 0 : i32
    return %arg0, %c0_i32, %c0_i32_0 : i32, i32, i32
  }
  func.func @transform_1(%arg0: i32) -> (i32, i32, i32) {
    %c0_i32 = arith.constant 0 : i32
    %c0_i32_0 = arith.constant 0 : i32
    %c0_i32_1 = arith.constant 0 : i32
    return %arg0, %c0_i32, %c0_i32_0 : i32, i32, i32
  }
  func.func @transform_2(%arg0: i32) -> (i32, i32) {
    %c0_i32 = arith.constant 0 : i32
    %c0_i32_0 = arith.constant 0 : i32
    %c0_i32_1 = arith.constant 0 : i32
    return %c0_i32, %c0_i32_0 : i32, i32
  }
  func.func @transform_3(%arg0: i32) -> (i32, i32, i32) {
    %c0_i32 = arith.constant 0 : i32
    %c0_i32_0 = arith.constant 0 : i32
    %c0_i32_1 = arith.constant 0 : i32
    return %arg0, %c0_i32, %c0_i32_0 : i32, i32, i32
  }
  func.func @transform_4(%arg0: i32) -> (i32, i32, i32) {
    %c0_i32 = arith.constant 0 : i32
    %c0_i32_0 = arith.constant 0 : i32
    %c0_i32_1 = arith.constant 0 : i32
    return %arg0, %c0_i32, %c0_i32_0 : i32, i32, i32
  }
  func.func @transform_5(%arg0: i32) -> (i32, i32) {
    %c0_i32 = arith.constant 0 : i32
    %c0_i32_0 = arith.constant 0 : i32
    %c0_i32_1 = arith.constant 0 : i32
    return %c0_i32, %c0_i32_0 : i32, i32
  }
  func.func @transform_6(%arg0: i32) -> (i32, i32) {
    %c0_i32 = arith.constant 0 : i32
    %c0_i32_0 = arith.constant 0 : i32
    %c0_i32_1 = arith.constant 0 : i32
    return %c0_i32, %c0_i32_0 : i32, i32
  }
  func.func @transform_7(%arg0: i32) -> (i32, i32) {
    %c0_i32 = arith.constant 0 : i32
    %c0_i32_0 = arith.constant 0 : i32
    %c0_i32_1 = arith.constant 0 : i32
    return %c0_i32, %c0_i32_0 : i32, i32
  }
  func.func @transform_8(%arg0: i32) -> (i32, i32) {
    %c0_i32 = arith.constant 0 : i32
    %c0_i32_0 = arith.constant 0 : i32
    %c0_i32_1 = arith.constant 0 : i32
    return %c0_i32, %c0_i32_0 : i32, i32
  }
  func.func @transform_9(%arg0: i32) -> (i32, i32) {
    %c0_i32 = arith.constant 0 : i32
    %c0_i32_0 = arith.constant 0 : i32
    %c0_i32_1 = arith.constant 0 : i32
    return %c0_i32, %c0_i32_0 : i32, i32
  }
  func.func @transform_10(%arg0: i32) -> (i32, i32) {
    %c0_i32 = arith.constant 0 : i32
    %c0_i32_0 = arith.constant 0 : i32
    %c0_i32_1 = arith.constant 0 : i32
    return %c0_i32, %c0_i32_0 : i32, i32
  }
  func.func @transform_11(%arg0: i32) -> (i32, i32) {
    %c0_i32 = arith.constant 0 : i32
    %c0_i32_0 = arith.constant 0 : i32
    %c0_i32_1 = arith.constant 0 : i32
    return %c0_i32, %c0_i32_0 : i32, i32
  }
  func.func @transform_12(%arg0: i32) -> (i32, i32) {
    %c0_i32 = arith.constant 0 : i32
    %c0_i32_0 = arith.constant 0 : i32
    %c0_i32_1 = arith.constant 0 : i32
    return %c0_i32, %c0_i32_0 : i32, i32
  }
  func.func @transform_13(%arg0: i32) -> (i32, i32) {
    %c0_i32 = arith.constant 0 : i32
    %c0_i32_0 = arith.constant 0 : i32
    %c0_i32_1 = arith.constant 0 : i32
    return %c0_i32, %c0_i32_0 : i32, i32
  }
  func.func @transform_14(%arg0: i32) -> (i32, i32) {
    %c0_i32 = arith.constant 0 : i32
    %c0_i32_0 = arith.constant 0 : i32
    %c0_i32_1 = arith.constant 0 : i32
    return %c0_i32, %c0_i32_0 : i32, i32
  }
  func.func @transform_15(%arg0: i32) -> (i32, i32) {
    %c0_i32 = arith.constant 0 : i32
    %c0_i32_0 = arith.constant 0 : i32
    %c0_i32_1 = arith.constant 0 : i32
    return %c0_i32, %c0_i32_0 : i32, i32
  }
  func.func @transform_16(%arg0: i32) -> (i32, i32) {
    %c0_i32 = arith.constant 0 : i32
    %c0_i32_0 = arith.constant 0 : i32
    %c0_i32_1 = arith.constant 0 : i32
    return %c0_i32, %c0_i32_0 : i32, i32
  }
  func.func @transform_17(%arg0: i32) -> (i32, i32) {
    %c0_i32 = arith.constant 0 : i32
    %c0_i32_0 = arith.constant 0 : i32
    %c0_i32_1 = arith.constant 0 : i32
    return %c0_i32, %c0_i32_0 : i32, i32
  }
  func.func @transform_18(%arg0: i32) -> (i32, i32) {
    %c0_i32 = arith.constant 0 : i32
    %c0_i32_0 = arith.constant 0 : i32
    %c0_i32_1 = arith.constant 0 : i32
    return %c0_i32, %c0_i32_0 : i32, i32
  }
  func.func @transform_19(%arg0: i32) -> (i32, i32) {
    %c0_i32 = arith.constant 0 : i32
    %c0_i32_0 = arith.constant 0 : i32
    %c0_i32_1 = arith.constant 0 : i32
    return %c0_i32, %c0_i32_0 : i32, i32
  }
  func.func @transform_20(%arg0: i32) -> (i32, i32) {
    %c0_i32 = arith.constant 0 : i32
    %c0_i32_0 = arith.constant 0 : i32
    %c0_i32_1 = arith.constant 0 : i32
    return %c0_i32, %c0_i32_0 : i32, i32
  }
  func.func @transform_21(%arg0: i32) -> (i32, i32) {
    %c0_i32 = arith.constant 0 : i32
    %c0_i32_0 = arith.constant 0 : i32
    %c0_i32_1 = arith.constant 0 : i32
    return %c0_i32, %c0_i32_0 : i32, i32
  }
  func.func @transform_22(%arg0: i32) -> (i32, i32) {
    %c0_i32 = arith.constant 0 : i32
    %c0_i32_0 = arith.constant 0 : i32
    %c0_i32_1 = arith.constant 0 : i32
    return %c0_i32, %c0_i32_0 : i32, i32
  }
  func.func @transform_23(%arg0: i32) -> (i32, i32) {
    %c0_i32 = arith.constant 0 : i32
    %c0_i32_0 = arith.constant 0 : i32
    %c0_i32_1 = arith.constant 0 : i32
    return %c0_i32, %c0_i32_0 : i32, i32
  }
  func.func @transform_24(%arg0: i32) -> (i32, i32) {
    %c0_i32 = arith.constant 0 : i32
    %c0_i32_0 = arith.constant 0 : i32
    %c0_i32_1 = arith.constant 0 : i32
    return %c0_i32, %c0_i32_0 : i32, i32
  }
  func.func @transform_25(%arg0: i32) -> (i32, i32, i32) {
    %c0_i32 = arith.constant 0 : i32
    %c0_i32_0 = arith.constant 0 : i32
    %c0_i32_1 = arith.constant 0 : i32
    return %arg0, %c0_i32, %c0_i32_0 : i32, i32, i32
  }
}

module attributes {stable_mosaic.version = 11 : i64} {
  func.func @_dec_layer_kernel(%arg0: i32, %arg1: memref<1x8x32xbf16, #tpu.memory_space<vmem>>, %arg2: memref<1x8x32xbf16, #tpu.memory_space<vmem>>, %arg3: memref<8x8xf32, #tpu.memory_space<vmem>>, %arg4: memref<1x1x8xf32, #tpu.memory_space<vmem>>, %arg5: memref<1x1x8xf32, #tpu.memory_space<vmem>>, %arg6: memref<32x96xbf16, #tpu.memory_space<vmem>>, %arg7: memref<1x96xf32, #tpu.memory_space<vmem>>, %arg8: memref<32x32xbf16, #tpu.memory_space<vmem>>, %arg9: memref<1x32xf32, #tpu.memory_space<vmem>>, %arg10: memref<1x32xf32, #tpu.memory_space<vmem>>, %arg11: memref<1x32xf32, #tpu.memory_space<vmem>>, %arg12: memref<32x32xbf16, #tpu.memory_space<vmem>>, %arg13: memref<1x32xf32, #tpu.memory_space<vmem>>, %arg14: memref<32x64xbf16, #tpu.memory_space<vmem>>, %arg15: memref<1x64xf32, #tpu.memory_space<vmem>>, %arg16: memref<32x32xbf16, #tpu.memory_space<vmem>>, %arg17: memref<1x32xf32, #tpu.memory_space<vmem>>, %arg18: memref<1x32xf32, #tpu.memory_space<vmem>>, %arg19: memref<1x32xf32, #tpu.memory_space<vmem>>, %arg20: memref<32x64xbf16, #tpu.memory_space<vmem>>, %arg21: memref<1x64xf32, #tpu.memory_space<vmem>>, %arg22: memref<64x32xbf16, #tpu.memory_space<vmem>>, %arg23: memref<1x32xf32, #tpu.memory_space<vmem>>, %arg24: memref<1x32xf32, #tpu.memory_space<vmem>>, %arg25: memref<1x32xf32, #tpu.memory_space<vmem>>, %arg26: memref<1x8x32xbf16, #tpu.memory_space<vmem>>) attributes {dimension_semantics = [#tpu.dimension_semantics<parallel>], iteration_bounds = array<i64: 2>, scalar_prefetch = 0 : i64, scratch_operands = 0 : i64, tpu.core_type = #tpu.core_type<tc>, window_params = [{transform_indices = @transform_0, window_bounds = array<i64: 1, 8, 32>}, {transform_indices = @transform_1, window_bounds = array<i64: 1, 8, 32>}, {pipeline_mode = #tpu.pipeline_mode<synchronous>, transform_indices = @transform_2, window_bounds = array<i64: 8, 8>}, {transform_indices = @transform_3, window_bounds = array<i64: 1, 1, 8>}, {transform_indices = @transform_4, window_bounds = array<i64: 1, 1, 8>}, {pipeline_mode = #tpu.pipeline_mode<synchronous>, transform_indices = @transform_5, window_bounds = array<i64: 32, 96>}, {pipeline_mode = #tpu.pipeline_mode<synchronous>, transform_indices = @transform_6, window_bounds = array<i64: 1, 96>}, {pipeline_mode = #tpu.pipeline_mode<synchronous>, transform_indices = @transform_7, window_bounds = array<i64: 32, 32>}, {pipeline_mode = #tpu.pipeline_mode<synchronous>, transform_indices = @transform_8, window_bounds = array<i64: 1, 32>}, {pipeline_mode = #tpu.pipeline_mode<synchronous>, transform_indices = @transform_9, window_bounds = array<i64: 1, 32>}, {pipeline_mode = #tpu.pipeline_mode<synchronous>, transform_indices = @transform_10, window_bounds = array<i64: 1, 32>}, {pipeline_mode = #tpu.pipeline_mode<synchronous>, transform_indices = @transform_11, window_bounds = array<i64: 32, 32>}, {pipeline_mode = #tpu.pipeline_mode<synchronous>, transform_indices = @transform_12, window_bounds = array<i64: 1, 32>}, {pipeline_mode = #tpu.pipeline_mode<synchronous>, transform_indices = @transform_13, window_bounds = array<i64: 32, 64>}, {pipeline_mode = #tpu.pipeline_mode<synchronous>, transform_indices = @transform_14, window_bounds = array<i64: 1, 64>}, {pipeline_mode = #tpu.pipeline_mode<synchronous>, transform_indices = @transform_15, window_bounds = array<i64: 32, 32>}, {pipeline_mode = #tpu.pipeline_mode<synchronous>, transform_indices = @transform_16, window_bounds = array<i64: 1, 32>}, {pipeline_mode = #tpu.pipeline_mode<synchronous>, transform_indices = @transform_17, window_bounds = array<i64: 1, 32>}, {pipeline_mode = #tpu.pipeline_mode<synchronous>, transform_indices = @transform_18, window_bounds = array<i64: 1, 32>}, {pipeline_mode = #tpu.pipeline_mode<synchronous>, transform_indices = @transform_19, window_bounds = array<i64: 32, 64>}, {pipeline_mode = #tpu.pipeline_mode<synchronous>, transform_indices = @transform_20, window_bounds = array<i64: 1, 64>}, {pipeline_mode = #tpu.pipeline_mode<synchronous>, transform_indices = @transform_21, window_bounds = array<i64: 64, 32>}, {pipeline_mode = #tpu.pipeline_mode<synchronous>, transform_indices = @transform_22, window_bounds = array<i64: 1, 32>}, {pipeline_mode = #tpu.pipeline_mode<synchronous>, transform_indices = @transform_23, window_bounds = array<i64: 1, 32>}, {pipeline_mode = #tpu.pipeline_mode<synchronous>, transform_indices = @transform_24, window_bounds = array<i64: 1, 32>}, {transform_indices = @transform_25, window_bounds = array<i64: 1, 8, 32>}]} {
    %c0 = arith.constant 0 : index
    %c0_0 = arith.constant 0 : index
    %c0_1 = arith.constant 0 : index
    %0 = vector.load %arg1[%c0, %c0_0, %c0_1] : memref<1x8x32xbf16, #tpu.memory_space<vmem>>, vector<1x8x32xbf16>
    %1 = vector.shape_cast %0 : vector<1x8x32xbf16> to vector<8x32xbf16>
    %c0_2 = arith.constant 0 : index
    %c0_3 = arith.constant 0 : index
    %c0_4 = arith.constant 0 : index
    %2 = vector.load %arg2[%c0_2, %c0_3, %c0_4] : memref<1x8x32xbf16, #tpu.memory_space<vmem>>, vector<1x8x32xbf16>
    %3 = vector.shape_cast %2 : vector<1x8x32xbf16> to vector<8x32xbf16>
    %c0_5 = arith.constant 0 : index
    %c0_6 = arith.constant 0 : index
    %4 = vector.load %arg3[%c0_5, %c0_6] : memref<8x8xf32, #tpu.memory_space<vmem>>, vector<8x8xf32>
    %c0_7 = arith.constant 0 : index
    %c0_8 = arith.constant 0 : index
    %c0_9 = arith.constant 0 : index
    %5 = vector.load %arg4[%c0_7, %c0_8, %c0_9] : memref<1x1x8xf32, #tpu.memory_space<vmem>>, vector<1x1x8xf32>
    %6 = vector.shape_cast %5 : vector<1x1x8xf32> to vector<1x8xf32>
    %7 = vector.broadcast %6 : vector<1x8xf32> to vector<8x8xf32>
    %8 = arith.addf %4, %7 : vector<8x8xf32>
    %c0_10 = arith.constant 0 : index
    %c0_11 = arith.constant 0 : index
    %c0_12 = arith.constant 0 : index
    %9 = vector.load %arg5[%c0_10, %c0_11, %c0_12] : memref<1x1x8xf32, #tpu.memory_space<vmem>>, vector<1x1x8xf32>
    %10 = vector.shape_cast %9 : vector<1x1x8xf32> to vector<1x8xf32>
    %c0_13 = arith.constant 0 : index
    %c0_14 = arith.constant 0 : index
    %11 = vector.load %arg6[%c0_13, %c0_14] : memref<32x96xbf16, #tpu.memory_space<vmem>>, vector<32x96xbf16>
    %cst = arith.constant dense<0.000000e+00> : vector<8x96xf32>
    %12 = tpu.matmul %1, %11, %cst {dimension_numbers = #tpu.dot_dimension_numbers<[1], [0], [0], [1], [0, 0, 1, 1], [], []>} : vector<8x32xbf16>, vector<32x96xbf16>, vector<8x96xf32> -> vector<8x96xf32>
    %c0_15 = arith.constant 0 : index
    %c0_16 = arith.constant 0 : index
    %13 = vector.load %arg7[%c0_15, %c0_16] : memref<1x96xf32, #tpu.memory_space<vmem>>, vector<1x96xf32>
    %14 = vector.broadcast %13 : vector<1x96xf32> to vector<8x96xf32>
    %15 = arith.addf %12, %14 : vector<8x96xf32>
    %16 = arith.truncf %15 : vector<8x96xf32> to vector<8x96xbf16>
    %17 = vector.extract_strided_slice %16 {offsets = [0, 0], sizes = [8, 32], strides = [1, 1]} : vector<8x96xbf16> to vector<8x32xbf16>
    %18 = vector.extract_strided_slice %16 {offsets = [0, 32], sizes = [8, 32], strides = [1, 1]} : vector<8x96xbf16> to vector<8x32xbf16>
    %19 = vector.extract_strided_slice %16 {offsets = [0, 64], sizes = [8, 32], strides = [1, 1]} : vector<8x96xbf16> to vector<8x32xbf16>
    %20 = vector.shape_cast %17 : vector<8x32xbf16> to vector<8x4x8xbf16>
    %21 = vector.shape_cast %18 : vector<8x32xbf16> to vector<8x4x8xbf16>
    %22 = vector.shape_cast %19 : vector<8x32xbf16> to vector<8x4x8xbf16>
    "tpu.trace_start"() <{level = 10 : i32, message = "lhd,shd->hls"}> : () -> ()
    %cst_17 = arith.constant dense<0.000000e+00> : vector<4x8x8xf32>
    %23 = tpu.matmul %20, %21, %cst_17 {dimension_numbers = #tpu.dot_dimension_numbers<[2], [2], [0], [0], [0, 1, 0, 0, 1, 0], [1], [1]>} : vector<8x4x8xbf16>, vector<8x4x8xbf16>, vector<4x8x8xf32> -> vector<4x8x8xf32>
    "tpu.trace_stop"() : () -> ()
    %cst_18 = arith.constant 0.353553385 : f32
    %24 = vector.broadcast %cst_18 : f32 to vector<4x8x8xf32>
    %25 = arith.mulf %23, %24 : vector<4x8x8xf32>
    %26 = vector.shape_cast %8 : vector<8x8xf32> to vector<1x8x8xf32>
    %27 = vector.broadcast %26 : vector<1x8x8xf32> to vector<4x8x8xf32>
    %28 = arith.addf %25, %27 : vector<4x8x8xf32>
    %cst_19 = arith.constant dense<0xFF800000> : vector<4x8xf32>
    %29 = vector.multi_reduction <maximumf>, %28, %cst_19 [2] : vector<4x8x8xf32> to vector<4x8xf32>
    %30 = vector.shape_cast %29 : vector<4x8xf32> to vector<4x8x1xf32>
    %31 = vector.broadcast %30 : vector<4x8x1xf32> to vector<4x8x8xf32>
    %32 = arith.subf %28, %31 : vector<4x8x8xf32>
    %33 = math.exp %32 : vector<4x8x8xf32>
    %cst_20 = arith.constant dense<0.000000e+00> : vector<4x8xf32>
    %34 = vector.multi_reduction <add>, %33, %cst_20 [2] : vector<4x8x8xf32> to vector<4x8xf32>
    %35 = vector.shape_cast %34 : vector<4x8xf32> to vector<4x8x1xf32>
    %36 = tpu.reciprocal %35 {approx = true} : vector<4x8x1xf32> -> vector<4x8x1xf32>
    %37 = vector.broadcast %36 : vector<4x8x1xf32> to vector<4x8x8xf32>
    %38 = arith.mulf %33, %37 : vector<4x8x8xf32>
    %39 = arith.truncf %38 : vector<4x8x8xf32> to vector<4x8x8xbf16>
    "tpu.trace_start"() <{level = 10 : i32, message = "hls,shd->lhd"}> : () -> ()
    %cst_21 = arith.constant dense<0.000000e+00> : vector<4x8x8xf32>
    %40 = tpu.matmul %22, %39, %cst_21 {dimension_numbers = #tpu.dot_dimension_numbers<[0], [2], [2], [1], [0, 1, 0, 2, 1, 1], [1], [0]>} : vector<8x4x8xbf16>, vector<4x8x8xbf16>, vector<4x8x8xf32> -> vector<4x8x8xf32>
    %41 = tpu.transpose %40, [2, 0, 1] : vector<4x8x8xf32> -> vector<8x4x8xf32>
    "tpu.trace_stop"() : () -> ()
    %42 = vector.shape_cast %41 : vector<8x4x8xf32> to vector<8x32xf32>
    %43 = arith.truncf %42 : vector<8x32xf32> to vector<8x32xbf16>
    %c0_22 = arith.constant 0 : index
    %c0_23 = arith.constant 0 : index
    %44 = vector.load %arg8[%c0_22, %c0_23] : memref<32x32xbf16, #tpu.memory_space<vmem>>, vector<32x32xbf16>
    %cst_24 = arith.constant dense<0.000000e+00> : vector<8x32xf32>
    %45 = tpu.matmul %43, %44, %cst_24 {dimension_numbers = #tpu.dot_dimension_numbers<[1], [0], [0], [1], [0, 0, 1, 1], [], []>} : vector<8x32xbf16>, vector<32x32xbf16>, vector<8x32xf32> -> vector<8x32xf32>
    %c0_25 = arith.constant 0 : index
    %c0_26 = arith.constant 0 : index
    %46 = vector.load %arg9[%c0_25, %c0_26] : memref<1x32xf32, #tpu.memory_space<vmem>>, vector<1x32xf32>
    %47 = vector.broadcast %46 : vector<1x32xf32> to vector<8x32xf32>
    %48 = arith.addf %45, %47 : vector<8x32xf32>
    %49 = arith.extf %1 : vector<8x32xbf16> to vector<8x32xf32>
    %50 = arith.addf %48, %49 : vector<8x32xf32>
    %c0_27 = arith.constant 0 : index
    %c0_28 = arith.constant 0 : index
    %51 = vector.load %arg10[%c0_27, %c0_28] : memref<1x32xf32, #tpu.memory_space<vmem>>, vector<1x32xf32>
    %c0_29 = arith.constant 0 : index
    %c0_30 = arith.constant 0 : index
    %52 = vector.load %arg11[%c0_29, %c0_30] : memref<1x32xf32, #tpu.memory_space<vmem>>, vector<1x32xf32>
    %cst_31 = arith.constant dense<0.000000e+00> : vector<8xf32>
    %53 = vector.multi_reduction <add>, %50, %cst_31 [1] : vector<8x32xf32> to vector<8xf32>
    %54 = vector.shape_cast %53 : vector<8xf32> to vector<8x1xf32>
    %cst_32 = arith.constant 3.200000e+01 : f32
    %55 = vector.broadcast %cst_32 : f32 to vector<8x1xf32>
    %56 = arith.divf %54, %55 : vector<8x1xf32>
    %57 = vector.broadcast %56 : vector<8x1xf32> to vector<8x32xf32>
    %58 = arith.subf %50, %57 : vector<8x32xf32>
    %59 = arith.mulf %58, %58 : vector<8x32xf32>
    %cst_33 = arith.constant dense<0.000000e+00> : vector<8xf32>
    %60 = vector.multi_reduction <add>, %59, %cst_33 [1] : vector<8x32xf32> to vector<8xf32>
    %61 = vector.shape_cast %60 : vector<8xf32> to vector<8x1xf32>
    %cst_34 = arith.constant 3.200000e+01 : f32
    %62 = vector.broadcast %cst_34 : f32 to vector<8x1xf32>
    %63 = arith.divf %61, %62 : vector<8x1xf32>
    %64 = vector.broadcast %56 : vector<8x1xf32> to vector<8x32xf32>
    %65 = arith.subf %50, %64 : vector<8x32xf32>
    %cst_35 = arith.constant 9.99999974E-6 : f32
    %66 = vector.broadcast %cst_35 : f32 to vector<8x1xf32>
    %67 = arith.addf %63, %66 : vector<8x1xf32>
    %68 = math.rsqrt %67 : vector<8x1xf32>
    %69 = vector.broadcast %68 : vector<8x1xf32> to vector<8x32xf32>
    %70 = arith.mulf %65, %69 : vector<8x32xf32>
    %71 = vector.broadcast %51 : vector<1x32xf32> to vector<8x32xf32>
    %72 = arith.mulf %70, %71 : vector<8x32xf32>
    %73 = vector.broadcast %52 : vector<1x32xf32> to vector<8x32xf32>
    %74 = arith.addf %72, %73 : vector<8x32xf32>
    %75 = arith.truncf %74 : vector<8x32xf32> to vector<8x32xbf16>
    %c0_36 = arith.constant 0 : index
    %c0_37 = arith.constant 0 : index
    %76 = vector.load %arg12[%c0_36, %c0_37] : memref<32x32xbf16, #tpu.memory_space<vmem>>, vector<32x32xbf16>
    %cst_38 = arith.constant dense<0.000000e+00> : vector<8x32xf32>
    %77 = tpu.matmul %75, %76, %cst_38 {dimension_numbers = #tpu.dot_dimension_numbers<[1], [0], [0], [1], [0, 0, 1, 1], [], []>} : vector<8x32xbf16>, vector<32x32xbf16>, vector<8x32xf32> -> vector<8x32xf32>
    %c0_39 = arith.constant 0 : index
    %c0_40 = arith.constant 0 : index
    %78 = vector.load %arg13[%c0_39, %c0_40] : memref<1x32xf32, #tpu.memory_space<vmem>>, vector<1x32xf32>
    %79 = vector.broadcast %78 : vector<1x32xf32> to vector<8x32xf32>
    %80 = arith.addf %77, %79 : vector<8x32xf32>
    %81 = arith.truncf %80 : vector<8x32xf32> to vector<8x32xbf16>
    %c0_41 = arith.constant 0 : index
    %c0_42 = arith.constant 0 : index
    %82 = vector.load %arg14[%c0_41, %c0_42] : memref<32x64xbf16, #tpu.memory_space<vmem>>, vector<32x64xbf16>
    %cst_43 = arith.constant dense<0.000000e+00> : vector<8x64xf32>
    %83 = tpu.matmul %3, %82, %cst_43 {dimension_numbers = #tpu.dot_dimension_numbers<[1], [0], [0], [1], [0, 0, 1, 1], [], []>} : vector<8x32xbf16>, vector<32x64xbf16>, vector<8x64xf32> -> vector<8x64xf32>
    %c0_44 = arith.constant 0 : index
    %c0_45 = arith.constant 0 : index
    %84 = vector.load %arg15[%c0_44, %c0_45] : memref<1x64xf32, #tpu.memory_space<vmem>>, vector<1x64xf32>
    %85 = vector.broadcast %84 : vector<1x64xf32> to vector<8x64xf32>
    %86 = arith.addf %83, %85 : vector<8x64xf32>
    %87 = arith.truncf %86 : vector<8x64xf32> to vector<8x64xbf16>
    %88 = vector.extract_strided_slice %87 {offsets = [0, 0], sizes = [8, 32], strides = [1, 1]} : vector<8x64xbf16> to vector<8x32xbf16>
    %89 = vector.extract_strided_slice %87 {offsets = [0, 32], sizes = [8, 32], strides = [1, 1]} : vector<8x64xbf16> to vector<8x32xbf16>
    %90 = vector.shape_cast %81 : vector<8x32xbf16> to vector<8x4x8xbf16>
    %91 = vector.shape_cast %88 : vector<8x32xbf16> to vector<8x4x8xbf16>
    %92 = vector.shape_cast %89 : vector<8x32xbf16> to vector<8x4x8xbf16>
    "tpu.trace_start"() <{level = 10 : i32, message = "lhd,shd->hls"}> : () -> ()
    %cst_46 = arith.constant dense<0.000000e+00> : vector<4x8x8xf32>
    %93 = tpu.matmul %90, %91, %cst_46 {dimension_numbers = #tpu.dot_dimension_numbers<[2], [2], [0], [0], [0, 1, 0, 0, 1, 0], [1], [1]>} : vector<8x4x8xbf16>, vector<8x4x8xbf16>, vector<4x8x8xf32> -> vector<4x8x8xf32>
    "tpu.trace_stop"() : () -> ()
    %cst_47 = arith.constant 0.353553385 : f32
    %94 = vector.broadcast %cst_47 : f32 to vector<4x8x8xf32>
    %95 = arith.mulf %93, %94 : vector<4x8x8xf32>
    %96 = vector.shape_cast %10 : vector<1x8xf32> to vector<1x1x8xf32>
    %97 = vector.broadcast %96 : vector<1x1x8xf32> to vector<4x8x8xf32>
    %98 = arith.addf %95, %97 : vector<4x8x8xf32>
    %cst_48 = arith.constant dense<0xFF800000> : vector<4x8xf32>
    %99 = vector.multi_reduction <maximumf>, %98, %cst_48 [2] : vector<4x8x8xf32> to vector<4x8xf32>
    %100 = vector.shape_cast %99 : vector<4x8xf32> to vector<4x8x1xf32>
    %101 = vector.broadcast %100 : vector<4x8x1xf32> to vector<4x8x8xf32>
    %102 = arith.subf %98, %101 : vector<4x8x8xf32>
    %103 = math.exp %102 : vector<4x8x8xf32>
    %cst_49 = arith.constant dense<0.000000e+00> : vector<4x8xf32>
    %104 = vector.multi_reduction <add>, %103, %cst_49 [2] : vector<4x8x8xf32> to vector<4x8xf32>
    %105 = vector.shape_cast %104 : vector<4x8xf32> to vector<4x8x1xf32>
    %106 = tpu.reciprocal %105 {approx = true} : vector<4x8x1xf32> -> vector<4x8x1xf32>
    %107 = vector.broadcast %106 : vector<4x8x1xf32> to vector<4x8x8xf32>
    %108 = arith.mulf %103, %107 : vector<4x8x8xf32>
    %109 = arith.truncf %108 : vector<4x8x8xf32> to vector<4x8x8xbf16>
    "tpu.trace_start"() <{level = 10 : i32, message = "hls,shd->lhd"}> : () -> ()
    %cst_50 = arith.constant dense<0.000000e+00> : vector<4x8x8xf32>
    %110 = tpu.matmul %92, %109, %cst_50 {dimension_numbers = #tpu.dot_dimension_numbers<[0], [2], [2], [1], [0, 1, 0, 2, 1, 1], [1], [0]>} : vector<8x4x8xbf16>, vector<4x8x8xbf16>, vector<4x8x8xf32> -> vector<4x8x8xf32>
    %111 = tpu.transpose %110, [2, 0, 1] : vector<4x8x8xf32> -> vector<8x4x8xf32>
    "tpu.trace_stop"() : () -> ()
    %112 = vector.shape_cast %111 : vector<8x4x8xf32> to vector<8x32xf32>
    %113 = arith.truncf %112 : vector<8x32xf32> to vector<8x32xbf16>
    %c0_51 = arith.constant 0 : index
    %c0_52 = arith.constant 0 : index
    %114 = vector.load %arg16[%c0_51, %c0_52] : memref<32x32xbf16, #tpu.memory_space<vmem>>, vector<32x32xbf16>
    %cst_53 = arith.constant dense<0.000000e+00> : vector<8x32xf32>
    %115 = tpu.matmul %113, %114, %cst_53 {dimension_numbers = #tpu.dot_dimension_numbers<[1], [0], [0], [1], [0, 0, 1, 1], [], []>} : vector<8x32xbf16>, vector<32x32xbf16>, vector<8x32xf32> -> vector<8x32xf32>
    %c0_54 = arith.constant 0 : index
    %c0_55 = arith.constant 0 : index
    %116 = vector.load %arg17[%c0_54, %c0_55] : memref<1x32xf32, #tpu.memory_space<vmem>>, vector<1x32xf32>
    %117 = vector.broadcast %116 : vector<1x32xf32> to vector<8x32xf32>
    %118 = arith.addf %115, %117 : vector<8x32xf32>
    %119 = arith.addf %118, %74 : vector<8x32xf32>
    %c0_56 = arith.constant 0 : index
    %c0_57 = arith.constant 0 : index
    %120 = vector.load %arg18[%c0_56, %c0_57] : memref<1x32xf32, #tpu.memory_space<vmem>>, vector<1x32xf32>
    %c0_58 = arith.constant 0 : index
    %c0_59 = arith.constant 0 : index
    %121 = vector.load %arg19[%c0_58, %c0_59] : memref<1x32xf32, #tpu.memory_space<vmem>>, vector<1x32xf32>
    %cst_60 = arith.constant dense<0.000000e+00> : vector<8xf32>
    %122 = vector.multi_reduction <add>, %119, %cst_60 [1] : vector<8x32xf32> to vector<8xf32>
    %123 = vector.shape_cast %122 : vector<8xf32> to vector<8x1xf32>
    %cst_61 = arith.constant 3.200000e+01 : f32
    %124 = vector.broadcast %cst_61 : f32 to vector<8x1xf32>
    %125 = arith.divf %123, %124 : vector<8x1xf32>
    %126 = vector.broadcast %125 : vector<8x1xf32> to vector<8x32xf32>
    %127 = arith.subf %119, %126 : vector<8x32xf32>
    %128 = arith.mulf %127, %127 : vector<8x32xf32>
    %cst_62 = arith.constant dense<0.000000e+00> : vector<8xf32>
    %129 = vector.multi_reduction <add>, %128, %cst_62 [1] : vector<8x32xf32> to vector<8xf32>
    %130 = vector.shape_cast %129 : vector<8xf32> to vector<8x1xf32>
    %cst_63 = arith.constant 3.200000e+01 : f32
    %131 = vector.broadcast %cst_63 : f32 to vector<8x1xf32>
    %132 = arith.divf %130, %131 : vector<8x1xf32>
    %133 = vector.broadcast %125 : vector<8x1xf32> to vector<8x32xf32>
    %134 = arith.subf %119, %133 : vector<8x32xf32>
    %cst_64 = arith.constant 9.99999974E-6 : f32
    %135 = vector.broadcast %cst_64 : f32 to vector<8x1xf32>
    %136 = arith.addf %132, %135 : vector<8x1xf32>
    %137 = math.rsqrt %136 : vector<8x1xf32>
    %138 = vector.broadcast %137 : vector<8x1xf32> to vector<8x32xf32>
    %139 = arith.mulf %134, %138 : vector<8x32xf32>
    %140 = vector.broadcast %120 : vector<1x32xf32> to vector<8x32xf32>
    %141 = arith.mulf %139, %140 : vector<8x32xf32>
    %142 = vector.broadcast %121 : vector<1x32xf32> to vector<8x32xf32>
    %143 = arith.addf %141, %142 : vector<8x32xf32>
    %144 = arith.truncf %143 : vector<8x32xf32> to vector<8x32xbf16>
    %c0_65 = arith.constant 0 : index
    %c0_66 = arith.constant 0 : index
    %145 = vector.load %arg20[%c0_65, %c0_66] : memref<32x64xbf16, #tpu.memory_space<vmem>>, vector<32x64xbf16>
    %cst_67 = arith.constant dense<0.000000e+00> : vector<8x64xf32>
    %146 = tpu.matmul %144, %145, %cst_67 {dimension_numbers = #tpu.dot_dimension_numbers<[1], [0], [0], [1], [0, 0, 1, 1], [], []>} : vector<8x32xbf16>, vector<32x64xbf16>, vector<8x64xf32> -> vector<8x64xf32>
    %c0_68 = arith.constant 0 : index
    %c0_69 = arith.constant 0 : index
    %147 = vector.load %arg21[%c0_68, %c0_69] : memref<1x64xf32, #tpu.memory_space<vmem>>, vector<1x64xf32>
    %148 = vector.broadcast %147 : vector<1x64xf32> to vector<8x64xf32>
    %149 = arith.addf %146, %148 : vector<8x64xf32>
    %cst_70 = arith.constant 0.000000e+00 : f32
    %150 = vector.broadcast %cst_70 : f32 to vector<8x64xf32>
    %151 = arith.maximumf %149, %150 : vector<8x64xf32>
    %152 = arith.truncf %151 : vector<8x64xf32> to vector<8x64xbf16>
    %c0_71 = arith.constant 0 : index
    %c0_72 = arith.constant 0 : index
    %153 = vector.load %arg22[%c0_71, %c0_72] : memref<64x32xbf16, #tpu.memory_space<vmem>>, vector<64x32xbf16>
    %cst_73 = arith.constant dense<0.000000e+00> : vector<8x32xf32>
    %154 = tpu.matmul %152, %153, %cst_73 {dimension_numbers = #tpu.dot_dimension_numbers<[1], [0], [0], [1], [0, 0, 1, 1], [], []>} : vector<8x64xbf16>, vector<64x32xbf16>, vector<8x32xf32> -> vector<8x32xf32>
    %c0_74 = arith.constant 0 : index
    %c0_75 = arith.constant 0 : index
    %155 = vector.load %arg23[%c0_74, %c0_75] : memref<1x32xf32, #tpu.memory_space<vmem>>, vector<1x32xf32>
    %156 = vector.broadcast %155 : vector<1x32xf32> to vector<8x32xf32>
    %157 = arith.addf %154, %156 : vector<8x32xf32>
    %158 = arith.addf %157, %143 : vector<8x32xf32>
    %c0_76 = arith.constant 0 : index
    %c0_77 = arith.constant 0 : index
    %159 = vector.load %arg24[%c0_76, %c0_77] : memref<1x32xf32, #tpu.memory_space<vmem>>, vector<1x32xf32>
    %c0_78 = arith.constant 0 : index
    %c0_79 = arith.constant 0 : index
    %160 = vector.load %arg25[%c0_78, %c0_79] : memref<1x32xf32, #tpu.memory_space<vmem>>, vector<1x32xf32>
    %cst_80 = arith.constant dense<0.000000e+00> : vector<8xf32>
    %161 = vector.multi_reduction <add>, %158, %cst_80 [1] : vector<8x32xf32> to vector<8xf32>
    %162 = vector.shape_cast %161 : vector<8xf32> to vector<8x1xf32>
    %cst_81 = arith.constant 3.200000e+01 : f32
    %163 = vector.broadcast %cst_81 : f32 to vector<8x1xf32>
    %164 = arith.divf %162, %163 : vector<8x1xf32>
    %165 = vector.broadcast %164 : vector<8x1xf32> to vector<8x32xf32>
    %166 = arith.subf %158, %165 : vector<8x32xf32>
    %167 = arith.mulf %166, %166 : vector<8x32xf32>
    %cst_82 = arith.constant dense<0.000000e+00> : vector<8xf32>
    %168 = vector.multi_reduction <add>, %167, %cst_82 [1] : vector<8x32xf32> to vector<8xf32>
    %169 = vector.shape_cast %168 : vector<8xf32> to vector<8x1xf32>
    %cst_83 = arith.constant 3.200000e+01 : f32
    %170 = vector.broadcast %cst_83 : f32 to vector<8x1xf32>
    %171 = arith.divf %169, %170 : vector<8x1xf32>
    %172 = vector.broadcast %164 : vector<8x1xf32> to vector<8x32xf32>
    %173 = arith.subf %158, %172 : vector<8x32xf32>
    %cst_84 = arith.constant 9.99999974E-6 : f32
    %174 = vector.broadcast %cst_84 : f32 to vector<8x1xf32>
    %175 = arith.addf %171, %174 : vector<8x1xf32>
    %176 = math.rsqrt %175 : vector<8x1xf32>
    %177 = vector.broadcast %176 : vector<8x1xf32> to vector<8x32xf32>
    %178 = arith.mulf %173, %177 : vector<8x32xf32>
    %179 = vector.broadcast %159 : vector<1x32xf32> to vector<8x32xf32>
    %180 = arith.mulf %178, %179 : vector<8x32xf32>
    %181 = vector.broadcast %160 : vector<1x32xf32> to vector<8x32xf32>
    %182 = arith.addf %180, %181 : vector<8x32xf32>
    %183 = arith.truncf %182 : vector<8x32xf32> to vector<8x32xbf16>
    %c0_85 = arith.constant 0 : index
    %c0_86 = arith.constant 0 : index
    %c0_87 = arith.constant 0 : index
    %184 = vector.load %arg26[%c0_85, %c0_86, %c0_87] : memref<1x8x32xbf16, #tpu.memory_space<vmem>>, vector<1x8x32xbf16>
    %185 = vector.shape_cast %184 : vector<1x8x32xbf16> to vector<8x32xbf16>
    %186 = vector.shape_cast %183 : vector<8x32xbf16> to vector<1x8x32xbf16>
    tpu.vector_store %arg26[%c0_85, %c0_86, %c0_87], %186 {strides = array<i32>} : memref<1x8x32xbf16, #tpu.memory_space<vmem>>, vector<1x8x32xbf16>,
    return
  }
  func.func @transform_0(%arg0: i32) -> (i32, i32, i32) {
    %c0_i32 = arith.constant 0 : i32
    %c0_i32_0 = arith.constant 0 : i32
    %c0_i32_1 = arith.constant 0 : i32
    return %arg0, %c0_i32, %c0_i32_0 : i32, i32, i32
  }
  func.func @transform_1(%arg0: i32) -> (i32, i32, i32) {
    %c0_i32 = arith.constant 0 : i32
    %c0_i32_0 = arith.constant 0 : i32
    %c0_i32_1 = arith.constant 0 : i32
    return %arg0, %c0_i32, %c0_i32_0 : i32, i32, i32
  }
  func.func @transform_2(%arg0: i32) -> (i32, i32) {
    %c0_i32 = arith.constant 0 : i32
    %c0_i32_0 = arith.constant 0 : i32
    %c0_i32_1 = arith.constant 0 : i32
    return %c0_i32, %c0_i32_0 : i32, i32
  }
  func.func @transform_3(%arg0: i32) -> (i32, i32, i32) {
    %c0_i32 = arith.constant 0 : i32
    %c0_i32_0 = arith.constant 0 : i32
    %c0_i32_1 = arith.constant 0 : i32
    return %arg0, %c0_i32, %c0_i32_0 : i32, i32, i32
  }
  func.func @transform_4(%arg0: i32) -> (i32, i32, i32) {
    %c0_i32 = arith.constant 0 : i32
    %c0_i32_0 = arith.constant 0 : i32
    %c0_i32_1 = arith.constant 0 : i32
    return %arg0, %c0_i32, %c0_i32_0 : i32, i32, i32
  }
  func.func @transform_5(%arg0: i32) -> (i32, i32) {
    %c0_i32 = arith.constant 0 : i32
    %c0_i32_0 = arith.constant 0 : i32
    %c0_i32_1 = arith.constant 0 : i32
    return %c0_i32, %c0_i32_0 : i32, i32
  }
  func.func @transform_6(%arg0: i32) -> (i32, i32) {
    %c0_i32 = arith.constant 0 : i32
    %c0_i32_0 = arith.constant 0 : i32
    %c0_i32_1 = arith.constant 0 : i32
    return %c0_i32, %c0_i32_0 : i32, i32
  }
  func.func @transform_7(%arg0: i32) -> (i32, i32) {
    %c0_i32 = arith.constant 0 : i32
    %c0_i32_0 = arith.constant 0 : i32
    %c0_i32_1 = arith.constant 0 : i32
    return %c0_i32, %c0_i32_0 : i32, i32
  }
  func.func @transform_8(%arg0: i32) -> (i32, i32) {
    %c0_i32 = arith.constant 0 : i32
    %c0_i32_0 = arith.constant 0 : i32
    %c0_i32_1 = arith.constant 0 : i32
    return %c0_i32, %c0_i32_0 : i32, i32
  }
  func.func @transform_9(%arg0: i32) -> (i32, i32) {
    %c0_i32 = arith.constant 0 : i32
    %c0_i32_0 = arith.constant 0 : i32
    %c0_i32_1 = arith.constant 0 : i32
    return %c0_i32, %c0_i32_0 : i32, i32
  }
  func.func @transform_10(%arg0: i32) -> (i32, i32) {
    %c0_i32 = arith.constant 0 : i32
    %c0_i32_0 = arith.constant 0 : i32
    %c0_i32_1 = arith.constant 0 : i32
    return %c0_i32, %c0_i32_0 : i32, i32
  }
  func.func @transform_11(%arg0: i32) -> (i32, i32) {
    %c0_i32 = arith.constant 0 : i32
    %c0_i32_0 = arith.constant 0 : i32
    %c0_i32_1 = arith.constant 0 : i32
    return %c0_i32, %c0_i32_0 : i32, i32
  }
  func.func @transform_12(%arg0: i32) -> (i32, i32) {
    %c0_i32 = arith.constant 0 : i32
    %c0_i32_0 = arith.constant 0 : i32
    %c0_i32_1 = arith.constant 0 : i32
    return %c0_i32, %c0_i32_0 : i32, i32
  }
  func.func @transform_13(%arg0: i32) -> (i32, i32) {
    %c0_i32 = arith.constant 0 : i32
    %c0_i32_0 = arith.constant 0 : i32
    %c0_i32_1 = arith.constant 0 : i32
    return %c0_i32, %c0_i32_0 : i32, i32
  }
  func.func @transform_14(%arg0: i32) -> (i32, i32) {
    %c0_i32 = arith.constant 0 : i32
    %c0_i32_0 = arith.constant 0 : i32
    %c0_i32_1 = arith.constant 0 : i32
    return %c0_i32, %c0_i32_0 : i32, i32
  }
  func.func @transform_15(%arg0: i32) -> (i32, i32) {
    %c0_i32 = arith.constant 0 : i32
    %c0_i32_0 = arith.constant 0 : i32
    %c0_i32_1 = arith.constant 0 : i32
    return %c0_i32, %c0_i32_0 : i32, i32
  }
  func.func @transform_16(%arg0: i32) -> (i32, i32) {
    %c0_i32 = arith.constant 0 : i32
    %c0_i32_0 = arith.constant 0 : i32
    %c0_i32_1 = arith.constant 0 : i32
    return %c0_i32, %c0_i32_0 : i32, i32
  }
  func.func @transform_17(%arg0: i32) -> (i32, i32) {
    %c0_i32 = arith.constant 0 : i32
    %c0_i32_0 = arith.constant 0 : i32
    %c0_i32_1 = arith.constant 0 : i32
    return %c0_i32, %c0_i32_0 : i32, i32
  }
  func.func @transform_18(%arg0: i32) -> (i32, i32) {
    %c0_i32 = arith.constant 0 : i32
    %c0_i32_0 = arith.constant 0 : i32
    %c0_i32_1 = arith.constant 0 : i32
    return %c0_i32, %c0_i32_0 : i32, i32
  }
  func.func @transform_19(%arg0: i32) -> (i32, i32) {
    %c0_i32 = arith.constant 0 : i32
    %c0_i32_0 = arith.constant 0 : i32
    %c0_i32_1 = arith.constant 0 : i32
    return %c0_i32, %c0_i32_0 : i32, i32
  }
  func.func @transform_20(%arg0: i32) -> (i32, i32) {
    %c0_i32 = arith.constant 0 : i32
    %c0_i32_0 = arith.constant 0 : i32
    %c0_i32_1 = arith.constant 0 : i32
    return %c0_i32, %c0_i32_0 : i32, i32
  }
  func.func @transform_21(%arg0: i32) -> (i32, i32) {
    %c0_i32 = arith.constant 0 : i32
    %c0_i32_0 = arith.constant 0 : i32
    %c0_i32_1 = arith.constant 0 : i32
    return %c0_i32, %c0_i32_0 : i32, i32
  }
  func.func @transform_22(%arg0: i32) -> (i32, i32) {
    %c0_i32 = arith.constant 0 : i32
    %c0_i32_0 = arith.constant 0 : i32
    %c0_i32_1 = arith.constant 0 : i32
    return %c0_i32, %c0_i32_0 : i32, i32
  }
  func.func @transform_23(%arg0: i32) -> (i32, i32) {
    %c0_i32 = arith.constant 0 : i32
    %c0_i32_0 = arith.constant 0 : i32
    %c0_i32_1 = arith.constant 0 : i32
    return %c0_i32, %c0_i32_0 : i32, i32
  }
  func.func @transform_24(%arg0: i32) -> (i32, i32) {
    %c0_i32 = arith.constant 0 : i32
    %c0_i32_0 = arith.constant 0 : i32
    %c0_i32_1 = arith.constant 0 : i32
    return %c0_i32, %c0_i32_0 : i32, i32
  }
  func.func @transform_25(%arg0: i32) -> (i32, i32, i32) {
    %c0_i32 = arith.constant 0 : i32
    %c0_i32_0 = arith.constant 0 : i32
    %c0_i32_1 = arith.constant 0 : i32
    return %arg0, %c0_i32, %c0_i32_0 : i32, i32, i32
  }
}

module attributes {stable_mosaic.version = 11 : i64} {
  func.func @_ln_gen_kernel(%arg0: memref<16x32xbf16, #tpu.memory_space<vmem>>, %arg1: memref<1x32xf32, #tpu.memory_space<vmem>>, %arg2: memref<1x32xf32, #tpu.memory_space<vmem>>, %arg3: memref<32x128xbf16, #tpu.memory_space<vmem>>, %arg4: memref<1x128xf32, #tpu.memory_space<vmem>>, %arg5: memref<16x128xf32, #tpu.memory_space<vmem>>) attributes {dimension_semantics = [], scalar_prefetch = 0 : i64, scratch_operands = 0 : i64, tpu.core_type = #tpu.core_type<tc>} {
    %c0 = arith.constant 0 : index
    %c0_0 = arith.constant 0 : index
    %0 = vector.load %arg0[%c0, %c0_0] : memref<16x32xbf16, #tpu.memory_space<vmem>>, vector<16x32xbf16>
    %1 = arith.extf %0 : vector<16x32xbf16> to vector<16x32xf32>
    %c0_1 = arith.constant 0 : index
    %c0_2 = arith.constant 0 : index
    %2 = vector.load %arg1[%c0_1, %c0_2] : memref<1x32xf32, #tpu.memory_space<vmem>>, vector<1x32xf32>
    %c0_3 = arith.constant 0 : index
    %c0_4 = arith.constant 0 : index
    %3 = vector.load %arg2[%c0_3, %c0_4] : memref<1x32xf32, #tpu.memory_space<vmem>>, vector<1x32xf32>
    %cst = arith.constant dense<0.000000e+00> : vector<16xf32>
    %4 = vector.multi_reduction <add>, %1, %cst [1] : vector<16x32xf32> to vector<16xf32>
    %5 = vector.shape_cast %4 : vector<16xf32> to vector<16x1xf32>
    %cst_5 = arith.constant 3.200000e+01 : f32
    %6 = vector.broadcast %cst_5 : f32 to vector<16x1xf32>
    %7 = arith.divf %5, %6 : vector<16x1xf32>
    %8 = vector.broadcast %7 : vector<16x1xf32> to vector<16x32xf32>
    %9 = arith.subf %1, %8 : vector<16x32xf32>
    %10 = arith.mulf %9, %9 : vector<16x32xf32>
    %cst_6 = arith.constant dense<0.000000e+00> : vector<16xf32>
    %11 = vector.multi_reduction <add>, %10, %cst_6 [1] : vector<16x32xf32> to vector<16xf32>
    %12 = vector.shape_cast %11 : vector<16xf32> to vector<16x1xf32>
    %cst_7 = arith.constant 3.200000e+01 : f32
    %13 = vector.broadcast %cst_7 : f32 to vector<16x1xf32>
    %14 = arith.divf %12, %13 : vector<16x1xf32>
    %15 = vector.broadcast %7 : vector<16x1xf32> to vector<16x32xf32>
    %16 = arith.subf %1, %15 : vector<16x32xf32>
    %cst_8 = arith.constant 9.99999974E-6 : f32
    %17 = vector.broadcast %cst_8 : f32 to vector<16x1xf32>
    %18 = arith.addf %14, %17 : vector<16x1xf32>
    %19 = math.rsqrt %18 : vector<16x1xf32>
    %20 = vector.broadcast %19 : vector<16x1xf32> to vector<16x32xf32>
    %21 = arith.mulf %16, %20 : vector<16x32xf32>
    %22 = vector.broadcast %2 : vector<1x32xf32> to vector<16x32xf32>
    %23 = arith.mulf %21, %22 : vector<16x32xf32>
    %24 = vector.broadcast %3 : vector<1x32xf32> to vector<16x32xf32>
    %25 = arith.addf %23, %24 : vector<16x32xf32>
    %26 = arith.truncf %25 : vector<16x32xf32> to vector<16x32xbf16>
    %c0_9 = arith.constant 0 : index
    %c0_10 = arith.constant 0 : index
    %27 = vector.load %arg3[%c0_9, %c0_10] : memref<32x128xbf16, #tpu.memory_space<vmem>>, vector<32x128xbf16>
    %cst_11 = arith.constant dense<0.000000e+00> : vector<16x128xf32>
    %28 = tpu.matmul %26, %27, %cst_11 {dimension_numbers = #tpu.dot_dimension_numbers<[1], [0], [0], [1], [0, 0, 1, 1], [], []>} : vector<16x32xbf16>, vector<32x128xbf16>, vector<16x128xf32> -> vector<16x128xf32>
    %c0_12 = arith.constant 0 : index
    %c0_13 = arith.constant 0 : index
    %29 = vector.load %arg4[%c0_12, %c0_13] : memref<1x128xf32, #tpu.memory_space<vmem>>, vector<1x128xf32>
    %30 = vector.broadcast %29 : vector<1x128xf32> to vector<16x128xf32>
    %31 = arith.addf %28, %30 : vector<16x128xf32>
    %c0_14 = arith.constant 0 : index
    %c0_15 = arith.constant 0 : index
    %32 = vector.load %arg5[%c0_14, %c0_15] : memref<16x128xf32, #tpu.memory_space<vmem>>, vector<16x128xf32>
    tpu.vector_store %arg5[%c0_14, %c0_15], %31 {strides = array<i32>} : memref<16x128xf32, #tpu.memory_space<vmem>>, vector<16x128xf32>,
    return
  }
}

</mosaic_0001>

<bundles_post_ra>
// kernel: seq2seq_transformer_forward.8
= control target key start
LH: loop header
LB: loop body
LE: loop exit
PB: predicated region body
PF: predicated region fallthrough
CT: control target
= control target key end

     0   :  { %vm20_vm0 = vcmask 261120   ;;  %vm72_vm1 = vcmask 257024   ;;  %s132_s0 = inlined_call_operand.vmem [shape: bf16[16,32], index: 0, kind: input, shape index: {}]   ;;  %s133_s1 = inlined_call_operand.vmem [shape: f32[1,32], index: 1, kind: input, shape index: {}]   ;;  %s134_s2 = inlined_call_operand.vmem [shape: f32[1,32], index: 2, kind: input, shape index: {}]   ;;  %s135_s3 = inlined_call_operand.vmem [shape: bf16[16,32], index: 3, kind: output, shape index: {}]  }
   0x1   :  { %v86_v0 = vld [vmem:[%s132_s0] sm:$0xff]  }
   0x2   :  { %v87_v1 = vunpack.c.l.bf16 %v86_v0  ;;  %v88_v2 = vunpack.c.h.bf16 %v86_v0  ;;  %v79_v22 = vld [vmem:[%s133_s1] ss:$0 sm:$0xff] }
   0x3   :  { %v80_v24 = vld [vmem:[%s134_s2] ss:$0 sm:$0xff] }
   0x4   :  { %v21_v3 = vsel %vm20_vm0, %v87_v1, 0.0  ;;  %v24_v4 = vsel %vm20_vm0, %v88_v2, 0.0 }
   0x5   :  { %22 = vadd.xlane.f32.xlu0 %v21_v3 }
   0x9   :  { %25 = vadd.xlane.f32.xlu0 %v24_v4 }
  0x92   :  { %v23_v5 = vpop.xlane.xlu0 %22 }
  0x93   :  { %v28_v6 = vmul.f32 0.03125, %v23_v5 }
  0x95   :  { %v30_v7 = vsub.f32 %v87_v1, %v28_v6 }
  0x96   :  { %v26_v8 = vpop.xlane.xlu0 %25 }
  0x97   :  { %v29_v9 = vmul.f32 0.03125, %v26_v8  ;;  %v32_v10 = vmul.f32 %v30_v7, %v30_v7 }
  0x99   :  { %v31_v11 = vsub.f32 %v88_v2, %v29_v9  ;;  %v34_v12 = vsel %vm20_vm0, %v32_v10, 0.0 }
  0x9a   :  { %35 = vadd.xlane.f32.xlu1 %v34_v12 }
  0x9b   :  { %v33_v13 = vmul.f32 %v31_v11, %v31_v11 }
  0x9d   :  { %v37_v14 = vsel %vm20_vm0, %v33_v13, 0.0 }
  0x9e   :  { %38 = vadd.xlane.f32.xlu1 %v37_v14 }
 0x127   :  { %v36_v15 = vpop.xlane.xlu1 %35 }
 0x128   :  { %v40_v16 = vmul.f32 0.03125, %v36_v15 }
 0x12a   :  { %v42_v17 = vadd.f32 1e-05, %v40_v16 }
 0x12b   :  { %v39_v18 = vpop.xlane.xlu1 %38 }
 0x12c   :  { %89 = vrsqrt.f32 %v42_v17  ;;  %v41_v19 = vmul.f32 0.03125, %v39_v18 }
 0x12e   :  { %v43_v20 = vadd.f32 1e-05, %v41_v19 }
 0x130   :  { %91 = vrsqrt.f32 %v43_v20 }
 0x136   :  { %v90_v21 = vpop.eup %89 }
 0x137   :  { %v46_v23 = vmul.f32 %v90_v21, %v30_v7 }
 0x139   :  { %v54_v25 = vmul.f32 %v79_v22, %v46_v23 }
 0x13a   :  { %v92_v26 = vpop.eup %91 }
 0x13b   :  { %v62_v27 = vadd.f32 %v80_v24, %v54_v25  ;;  %v47_v28 = vmul.f32 %v92_v26, %v31_v11 }
 0x13d   :  { %v83_v29 = vpack.c.bf16 %v62_v27, %v62_v27  ;;  %v55_v30 = vmul.f32 %v79_v22, %v47_v28 }
 0x13f   :  { %73 = vst.msk [vmem:[%s135_s3] sm:$0xf] %vm72_vm1, %v83_v29  ;;  %v63_v31 = vadd.f32 %v80_v24, %v55_v30 }
 0x141   :  { %v84_v32 = vpack.c.bf16 %v63_v31, %v63_v31 }
 0x143   :  { %74 = vst.msk [vmem:[%s135_s3 + $0x4] sm:$0xf] %vm72_vm1, %v84_v32 }

// kernel: seq2seq_transformer_forward.11
= control target key start
LH: loop header
LB: loop body
LE: loop exit
PB: predicated region body
PF: predicated region fallthrough
CT: control target
= control target key end

     0   :  { %vm27_vm0 = vcmask 261120   ;;  %v174_v16 = vmov 0.0   ;;  %vm175_vm1 = vmmov 0   ;;  %s235_s0 = inlined_call_operand.vmem [shape: bf16[16,32], index: 0, kind: input, shape index: {}]   ;;  %s236_s3 = inlined_call_operand.vmem [shape: bf16[32,128], index: 3, kind: input, shape index: {}]   ;;  %s237_s1 = inlined_call_operand.vmem [shape: f32[1,32], index: 1, kind: input, shape index: {}]   ;;  %s238_s2 = inlined_call_operand.vmem [shape: f32[1,32], index: 2, kind: input, shape index: {}]   ;;  %s239_s4 = inlined_call_operand.vmem [shape: f32[1,128], index: 4, kind: input, shape index: {}]   ;;  %s240_s5 = inlined_call_operand.vmem [shape: f32[16,128], index: 5, kind: output, shape index: {}]  }
   0x1   :  { %v152_v0 = vld [vmem:[%s235_s0] sm:$0xff]   ;;  %158 = vmatprep.subr.bf16.mxu0 %v174_v16  ;;  %v169_v17 = vld [vmem:[%s236_s3 + $0x8] sm:$0xff]   ;;  %162 = vmatprep.mubr.msk.bf16.mxu0 %vm175_vm1, %v174_v16 }
   0x2   :  { %v153_v1 = vunpack.c.l.bf16 %v152_v0  ;;  %v154_v2 = vunpack.c.h.bf16 %v152_v0  ;;  %v168_v15 = vld [vmem:[%s236_s3] sm:$0xff]  }
   0x3   :  { %159 = vmatpush3.bf16.msra.mxu0 %v168_v15  ;;  %v145_v26 = vld [vmem:[%s237_s1] ss:$0 sm:$0xff] }
   0x4   :  { %v28_v3 = vsel %vm27_vm0, %v153_v1, 0.0  ;;  %v31_v4 = vsel %vm27_vm0, %v154_v2, 0.0  ;;  %160 = vmatprep.subr.bf16.mxu0 %v174_v16  ;;  %v146_v30 = vld [vmem:[%s238_s2] ss:$0 sm:$0xff] }
   0x5   :  { %29 = vadd.xlane.f32.xlu0 %v28_v3  ;;  %v147_v35 = vld [vmem:[%s239_s4] ss:$0 sm:$0xff] }
   0x7   :  { %161 = vmatpush3.bf16.msra.mxu0 %v169_v17 }
   0x9   :  { %32 = vadd.xlane.f32.xlu0 %v31_v4 }
  0x92   :  { %v30_v5 = vpop.xlane.xlu0 %29 }
  0x93   :  { %v35_v6 = vmul.f32 0.03125, %v30_v5 }
  0x95   :  { %v37_v7 = vsub.f32 %v153_v1, %v35_v6 }
  0x96   :  { %v33_v8 = vpop.xlane.xlu0 %32 }
  0x97   :  { %v36_v9 = vmul.f32 0.03125, %v33_v8  ;;  %v39_v10 = vmul.f32 %v37_v7, %v37_v7 }
  0x99   :  { %v38_v11 = vsub.f32 %v154_v2, %v36_v9  ;;  %v41_v12 = vsel %vm27_vm0, %v39_v10, 0.0 }
  0x9a   :  { %42 = vadd.xlane.f32.xlu1 %v41_v12 }
  0x9b   :  { %v40_v13 = vmul.f32 %v38_v11, %v38_v11 }
  0x9d   :  { %v44_v14 = vsel %vm27_vm0, %v40_v13, 0.0 }
  0x9e   :  { %45 = vadd.xlane.f32.xlu1 %v44_v14 }
 0x127   :  { %v43_v18 = vpop.xlane.xlu1 %42 }
 0x128   :  { %v47_v19 = vmul.f32 0.03125, %v43_v18 }
 0x12a   :  { %v49_v20 = vadd.f32 1e-05, %v47_v19 }
 0x12b   :  { %v46_v21 = vpop.xlane.xlu1 %45 }
 0x12c   :  { %170 = vrsqrt.f32 %v49_v20  ;;  %v48_v22 = vmul.f32 0.03125, %v46_v21 }
 0x12e   :  { %v50_v23 = vadd.f32 1e-05, %v48_v22 }
 0x130   :  { %172 = vrsqrt.f32 %v50_v23 }
 0x136   :  { %v171_v24 = vpop.eup %170 }
 0x137   :  { %v53_v25 = vmul.f32 %v171_v24, %v37_v7 }
 0x139   :  { %v61_v29 = vmul.f32 %v145_v26, %v53_v25 }
 0x13a   :  { %v173_v27 = vpop.eup %172 }
 0x13b   :  { %v54_v28 = vmul.f32 %v173_v27, %v38_v11  ;;  %v69_v32 = vadd.f32 %v146_v30, %v61_v29 }
 0x13d   :  { %v62_v31 = vmul.f32 %v145_v26, %v54_v28 }
 0x13f   :  { %v70_v33 = vadd.f32 %v146_v30, %v62_v31 }
 0x141   :  { %v71_v34 = vpack.c.bf16 %v70_v33, %v69_v32 }
 0x143   :  { %163 = vmatmul.mubr.msk.bf16.vlgmr.msra.gmra.mrb[0].mxu0 %vm27_vm0, %v71_v34 }
 0x216   :  { %v132_v36 = vpop.f32.mrb[0].mxu0 }
 0x217   :  { %v133_v37 = vadd.f32 %v147_v35, %v132_v36  ;;  %v164_v38 = vpop.f32.mrb[1].mxu0 }
 0x218   :  { %v135_v39 = vpop.f32.mrb[2].mxu0 }
 0x219   :  { %139 = vst [vmem:[%s240_s5] sm:$0xff] %v133_v37  ;;  %v136_v40 = vadd.f32 %v147_v35, %v135_v39  ;;  %v165_v41 = vpop.f32.mrb[3].mxu0 }
 0x21b   :  { %140 = vst [vmem:[%s240_s5 + $0x8] sm:$0xff] %v136_v40 }

// kernel: seq2seq_transformer_forward.6
= control target key start
LH: loop header
LB: loop body
LE: loop exit
PB: predicated region body
PF: predicated region fallthrough
CT: control target
= control target key end

     0   :  { %s2102_s18 = smov 0   ;;  %s2288_s0 = inlined_call_operand.vmem [shape: bf16[2,8,32], index: 0, kind: input, shape index: {}]   ;;  %s2289_s1 = inlined_call_operand.vmem [shape: f32[8,8], index: 1, kind: input, shape index: {}]   ;;  %s2290_s2 = inlined_call_operand.vmem [shape: f32[2,1,8], index: 2, kind: input, shape index: {}]   ;;  %s2291_s3 = inlined_call_operand.vmem [shape: bf16[32,96], index: 3, kind: input, shape index: {}]   ;;  %s2292_s4 = inlined_call_operand.vmem [shape: f32[1,96], index: 4, kind: input, shape index: {}]   ;;  %s2293_s5 = inlined_call_operand.vmem [shape: bf16[32,32], index: 5, kind: input, shape index: {}]   ;;  %s2294_s6 = inlined_call_operand.vmem [shape: f32[1,32], index: 6, kind: input, shape index: {}]   ;;  %s2295_s7 = inlined_call_operand.vmem [shape: f32[1,32], index: 7, kind: input, shape index: {}]   ;;  %s2296_s8 = inlined_call_operand.vmem [shape: f32[1,32], index: 8, kind: input, shape index: {}]   ;;  %s2297_s9 = inlined_call_operand.vmem [shape: bf16[32,64], index: 9, kind: input, shape index: {}]   ;;  %s2298_s10 = inlined_call_operand.vmem [shape: f32[1,64], index: 10, kind: input, shape index: {}]   ;;  %s2299_s11 = inlined_call_operand.vmem [shape: bf16[64,32], index: 11, kind: input, shape index: {}]   ;;  %s2300_s12 = inlined_call_operand.vmem [shape: f32[1,32], index: 12, kind: input, shape index: {}]   ;;  %s2301_s13 = inlined_call_operand.vmem [shape: f32[1,32], index: 13, kind: input, shape index: {}]   ;;  %s2302_s14 = inlined_call_operand.vmem [shape: f32[1,32], index: 14, kind: input, shape index: {}]   ;;  %s2303_s15 = inlined_call_operand.vmem [shape: bf16[2,8,32], index: 15, kind: output, shape index: {}]  }
   0x1 LB: > { %s1795_s19 = sadd.s32 4294967295, %s2008_s18   ;;  %p1799_p0 = scmp.ge.s32.totalorder %s2008_s18, 1  ;;  %s2008_s18 = sphi %s2102_s18, %s25_s18  }
   0x2   : > { %p444_p1 = scmp.lt.s32.totalorder %s2008_s18, 3 }
   0x4   : > { %p445_p2 = pnand %p1799_p0, %p444_p1 }
   0x5   : > { %v1972_v0 = vld [vmem:[%s2291_s3] sm:$0xff] (!%p445_p2)   ;;  %v2010_v1 = vmov (!%p445_p2), 0.0   ;;  %v1973_v2 = vld [vmem:[%s2291_s3 + $0x8] sm:$0xff] (!%p445_p2)   ;;  %vm2011_vm0 = vmmov (!%p445_p2), 0   ;;  %p493_p3 = scmp.lt.s32.totalorder (!%p445_p2), %s1795_s19, 1  ;;  %vm538_vm1 = vcmask (!%p445_p2), 261120  }
   0x6   : > { %448 = sbr.rel (%p445_p2) target bundleno = 2960 (0xb90), region = 80  ;;  %1867 = vmatprep.subr.bf16.mxu0 (!%p445_p2), %v2010_v1  ;;  %1875 = vmatprep.subr.bf16.mxu1 (!%p445_p2), %v2010_v1  ;;  %v1803_v4 = vld [vmem:[%s2292_s4] ss:$0 sm:$0xff] (!%p445_p2)  ;;  %s2012_s30 = smov (!%p445_p2), 104   ;;  %vm670_vm2 = vcmask (!%p445_p2), 1043456   ;;  %vm666_vm3 = vcmask (!%p445_p2), 64512  }
   0x7   : > { %1868 = vmatpush3.bf16.msra.mxu0 (!%p445_p2), %v1972_v0  ;;  %1871 = vmatprep.mubr.msk.bf16.mxu0 (!%p445_p2), %vm2011_vm0, %v2010_v1  ;;  %s2013_s16 = smov (!%p445_p2), 120   ;;  %s2014_s17 = smov (!%p445_p2), 96   ;;  %v506_v26 = vld [vmem:[%s2289_s1] sm:$0xff] (!%p445_p2)  ;;  %vm1445_vm4 = vcmask (!%p445_p2), 130048   ;;  %vm1447_vm5 = vcmask (!%p445_p2), 195584   ;;  %vm1656_vm6 = vcmask (!%p445_p2), 523264  }
   0x8   : > { %1869 = vmatprep.subr.bf16.mxu0 (!%p445_p2), %v2010_v1  ;;  %1877 = vmatprep.mubr.msk.bf16.mxu1 (!%p445_p2), %vm2011_vm0, %v2010_v1  ;;  %s2015_s20 = smov (!%p445_p2), 112   ;;  %s2021_s21 = smov (!%p445_p2), 24   ;;  %vm1731_vm7 = vcmask (!%p445_p2), 257024  }
   0xb   : > { %1870 = vmatpush3.bf16.msra.mxu0 (!%p445_p2), %v1973_v2 }
   0xc   : > { %1899 = vmatprep.subr.bf16.mxu0 (!%p445_p2), %v2010_v1 }
   0xd   : > { %s2305_s19 = smov (!%p493_p3, %s1795_s19), 1 }
   0xe   : > { %s1800_s24 = sshll.u32 %s2305_s19, 2  ;;  %s499_s23 = scalar_lea.vmem %s2290_s2, %s2305_s19 }
   0xf   : > { %s496_s27 = scalar_lea.vmem %s2288_s0, %s1800_s24  ;;  %v1802_v27 = vld [vmem:[%s499_s23] ss:$0 sm:$0xff] }
  0x10   : > { %v2132_v3 = vld [vmem:[%s496_s27] sm:$0xf]  ;;  %v514_v28 = vadd.f32 %v1802_v27, %v506_v26  ;;  %s2016_s27 = smov 64  }
  0x11   : > { %1872 = vmatmul.mubr.msk.bf16.vlgmr.msra.gmra.mrb[0].mxu0 %vm538_vm1, %v2132_v3 }
  0x12   : > { %1901 = vmatprep.mubr.msk.bf16.mxu0 %vm2011_vm0, %v2010_v1 }
  0xe4   : > { %v576_v5 = vpop.f32.mrb[0].mxu0 }
  0xe5   : > { %v577_v6 = vadd.f32 %v1803_v4, %v576_v5  ;;  %v1873_v7 = vpop.f32.mrb[1].mxu0 }
  0xe6   : > { %v579_v8 = vpop.f32.mrb[2].mxu0 }
  0xe7   : > { %v2141_v9 = vpack.c.bf16 %v577_v6, %v577_v6  ;;  %v1874_v10 = vpop.f32.mrb[3].mxu0 }
  0xe9   : > { %588 = vrot.lane.b32.xlu1 %v2141_v9, %s2012_s30  ;;  %584 = vrot.lane.b32.xlu0 %v2141_v9, %s2013_s16 }
  0xed   : > { %590 = vrot.lane.b32.xlu1 %v2141_v9, %s2014_s17  ;;  %586 = vrot.lane.b32.xlu0 %v2141_v9, %s2015_s20  ;;  %s2020_s20 = smov 8  }
 0x15b   : > { %v2147_v11 = vpop.permute.xlu0 %584  ;;  %v2150_v12 = vpop.permute.xlu1 %588 }
 0x15c   : > { %592 = vrot.lane.b32.xlu0 %v2147_v11, %s2014_s17 }
 0x15f   : > { %v2152_v13 = vpop.permute.xlu0 %586  ;;  %v591_v14 = vpop.permute.xlu1 %590 }
 0x160   : > { %596 = vrot.lane.b32.xlu0 %v2150_v12, %s2014_s17  ;;  %594 = vrot.lane.b32.xlu1 %v2152_v13, %s2014_s17  ;;  %s2019_s17 = smov 16  }
 0x183   : > { %602 = vxpose.xlu1.c.b16.start.end [1/1] (short) (narrow) %v591_v14, 16 }
 0x1ce   : > { %v593_v15 = vpop.permute.xlu0 %592 }
 0x1cf   : > { %618 = vxpose.xlu0.c.b16.start.end [1/1] (short) (narrow) %v593_v15, 16 }
 0x1d2   : > { %v595_v16 = vpop.permute.xlu1 %594  ;;  %v597_v17 = vpop.permute.xlu0 %596 }
 0x1d3   : > { %634 = vxpose.xlu0.c.b16.start.end [1/1] (short) (narrow) %v595_v16, 16  ;;  %650 = vxpose.xlu1.c.b16.start.end [1/1] (short) (narrow) %v597_v17, 16 }
 0x1e9   : > { %v610_v18 = vpop.trf.xlu1 }
 0x1ea   : > { %v672_v19 = vsel %vm670_vm2, %v610_v18, 0 }
 0x1eb   : > { %1876 = vmatpush3.bf16.msra.mxu1 %v672_v19 }
 0x1ec   : > { %1881 = vmatprep.subr.bf16.mxu1 %v2010_v1 }
 0x1ee   : > { %1878 = vmatmul.mubr.msk.bf16.vlgmr.msra.gmra.mrb[0].mxu1 %vm666_vm3, %v2141_v9 }
 0x1ef   : > { %1883 = vmatprep.mubr.msk.bf16.mxu1 %vm2011_vm0, %v2010_v1 }
 0x235   : > { %v626_v20 = vpop.trf.xlu0 }
 0x236   : > { %v718_v21 = vsel %vm670_vm2, %v626_v20, 0 }
 0x237   : > { %1882 = vmatpush3.bf16.msra.mxu1 %v718_v21 }
 0x238   : > { %1887 = vmatprep.subr.bf16.mxu1 %v2010_v1 }
 0x239   : > { %v642_v22 = vpop.trf.xlu0  ;;  %v658_v24 = vpop.trf.xlu1 }
 0x23a   : > { %1884 = vmatmul.mubr.msk.bf16.vlgmr.msra.gmra.mrb[4].mxu1 %vm666_vm3, %v2147_v11  ;;  %v764_v23 = vsel %vm670_vm2, %v642_v22, 0  ;;  %v810_v25 = vsel %vm670_vm2, %v658_v24, 0 }
 0x23b   : > { %1888 = vmatpush3.bf16.msra.mxu1 %v764_v23  ;;  %1889 = vmatprep.mubr.msk.bf16.mxu1 %vm2011_vm0, %v2010_v1 }
 0x23c   : > { %1893 = vmatprep.subr.bf16.mxu1 %v2010_v1 }
 0x242   : > { %1890 = vmatmul.mubr.msk.bf16.vlgmr.msra.gmra.mrb[8].mxu1 %vm666_vm3, %v2152_v13 }
 0x243   : > { %1894 = vmatpush3.bf16.msra.mxu1 %v810_v25  ;;  %1895 = vmatprep.mubr.msk.bf16.mxu1 %vm2011_vm0, %v2010_v1 }
 0x244   : > { %1905 = vmatprep.subr.bf16.mxu1 %v2010_v1 }
 0x24a   : > { %1896 = vmatmul.mubr.msk.bf16.vlgmr.msra.gmra.mrb[12].mxu1 %vm666_vm3, %v2150_v12 }
 0x24b   : > { %1907 = vmatprep.mubr.msk.bf16.mxu1 %vm2011_vm0, %v2010_v1 }
 0x2c1   : > { %v708_v29 = vpop.f32.mrb[0].mxu1 }
 0x2c2   : > { %v852_v30 = vmul.f32 0.35355338, %v708_v29  ;;  %v1879_v31 = vpop.f32.mrb[1].mxu1 }
 0x2c3   : > { %v711_v32 = vpop.f32.mrb[2].mxu1 }
 0x2c4   : > { %v1880_v33 = vpop.f32.mrb[3].mxu1  ;;  %v856_v34 = vadd.f32 %v852_v30, %v514_v28 }
 0x2c6   : > { %v860_v35 = vsel %vm666_vm3, %v856_v34, -inf }
 0x2c7   : > { %861 = vmax.xlane.f32.xlu0 %v860_v35 }
 0x30d   : > { %v754_v36 = vpop.f32.mrb[4].mxu1 }
 0x30e   : > { %v853_v37 = vmul.f32 0.35355338, %v754_v36  ;;  %v1885_v38 = vpop.f32.mrb[5].mxu1 }
 0x30f   : > { %v757_v39 = vpop.f32.mrb[6].mxu1 }
 0x310   : > { %v1886_v40 = vpop.f32.mrb[7].mxu1  ;;  %v857_v41 = vadd.f32 %v853_v37, %v514_v28 }
 0x312   : > { %v863_v42 = vsel %vm666_vm3, %v857_v41, -inf }
 0x313   : > { %864 = vmax.xlane.f32.xlu1 %v863_v42 }
 0x315   : > { %v800_v43 = vpop.f32.mrb[8].mxu1 }
 0x316   : > { %v854_v44 = vmul.f32 0.35355338, %v800_v43  ;;  %v1891_v45 = vpop.f32.mrb[9].mxu1 }
 0x317   : > { %v803_v46 = vpop.f32.mrb[10].mxu1 }
 0x318   : > { %v1892_v47 = vpop.f32.mrb[11].mxu1  ;;  %v858_v48 = vadd.f32 %v854_v44, %v514_v28 }
 0x31a   : > { %v866_v49 = vsel %vm666_vm3, %v858_v48, -inf }
 0x31b   : > { %867 = vmax.xlane.f32.xlu0 %v866_v49 }
 0x31d   : > { %v846_v50 = vpop.f32.mrb[12].mxu1 }
 0x31e   : > { %v855_v51 = vmul.f32 0.35355338, %v846_v50  ;;  %v1897_v52 = vpop.f32.mrb[13].mxu1 }
 0x31f   : > { %v849_v53 = vpop.f32.mrb[14].mxu1 }
 0x320   : > { %v1898_v54 = vpop.f32.mrb[15].mxu1  ;;  %v859_v55 = vadd.f32 %v855_v51, %v514_v28 }
 0x322   : > { %v869_v56 = vsel %vm666_vm3, %v859_v55, -inf }
 0x323   : > { %870 = vmax.xlane.f32.xlu1 %v869_v56 }
 0x331   : > { %908 = vrot.lane.b32.xlu0 %v2141_v9, %s2016_s27 }
 0x334   : > { %910 = vrot.lane.b32.xlu1 %v2147_v11, %s2016_s27 }
 0x354   : > { %v862_v57 = vpop.xlane.xlu0 %861 }
 0x355   : > { %v872_v58 = vsub.f32 %v856_v34, %v862_v57 }
 0x357   : > { %v876_v59 = vmul.f32 1.442695, %v872_v58 }
 0x359   : > { %1982 = vpow2.f32 %v876_v59 }
 0x363   : > { %v1983_v60 = vpop.eup %1982 }
 0x364   : > { %v884_v61 = vsel %vm666_vm3, %v1983_v60, 0.0 }
 0x365   : > { %885 = vadd.xlane.f32.xlu1 %v884_v61 }
 0x376   : > { %914 = vrot.lane.b32.xlu1 %v2150_v12, %s2016_s27 }
 0x3a0   : > { %v865_v62 = vpop.xlane.xlu1 %864 }
 0x3a1   : > { %v873_v63 = vsub.f32 %v857_v41, %v865_v62  ;;  %v1301_v62 = vlaneseq }
 0x3a3   : > { %v878_v0 = vmul.f32 1.442695, %v873_v63  ;;  %v2018_v63 = vmov 1934713408  }
 0x3a5   : > { %1984 = vpow2.f32 %v878_v0  ;;  %v1331_v0 = vunpack.c.l.s4 %v2018_v63 }
 0x3a8   : > { %v868_v2 = vpop.xlane.xlu0 %867 }
 0x3a9   : > { %v874_v4 = vsub.f32 %v858_v48, %v868_v2 }
 0x3ab   : > { %v880_v5 = vmul.f32 1.442695, %v874_v4  ;;  %v1302_v4 = vshrl.u32 %v1301_v62, 7 }
 0x3ad   : > { %1986 = vpow2.f32 %v880_v5 }
 0x3af   : > { %v1985_v6 = vpop.eup %1984 }
 0x3b0   : > { %v887_v7 = vsel %vm666_vm3, %v1985_v6, 0.0  ;;  %v871_v10 = vpop.xlane.xlu1 %870 }
 0x3b1   : > { %888 = vadd.xlane.f32.xlu0 %v887_v7  ;;  %v875_v11 = vsub.f32 %v859_v55, %v871_v10  ;;  %v1332_v7 = vunpack.c.0.s8 %v1331_v0 }
 0x3b3   : > { %v882_v12 = vmul.f32 1.442695, %v875_v11 }
 0x3b4   : > { %v911_v15 = vpop.permute.xlu1 %910 }
 0x3b5   : > { %1988 = vpow2.f32 %v882_v12 }
 0x3b7   : > { %v1987_v8 = vpop.eup %1986 }
 0x3b8   : > { %v890_v9 = vsel %vm666_vm3, %v1987_v8, 0.0 }
 0x3b9   : > { %891 = vadd.xlane.f32.xlu1 %v890_v9 }
 0x3bf   : > { %v1989_v14 = vpop.eup %1988 }
 0x3c0   : > { %v893_v16 = vsel %vm666_vm3, %v1989_v14, 0.0 }
 0x3c7   : > { %912 = vrot.lane.b32.xlu0 %v2152_v13, %s2016_s27  ;;  %v909_v13 = vpop.permute.xlu0 %908  ;;  %s503_s27 = scalar_lea.vmem %s2303_s15, %s1800_s24 }
 0x3e6   : > { %894 = vadd.xlane.f32.xlu0 %v893_v16  ;;  %936 = vxpose.xlu1.c.b16.start.end [1/1] (short) (narrow) %v911_v15, 16  ;;  %v1335_v15 = vsub.s32 %v1332_v7, %v1302_v4 }
 0x3f2   : > { %v886_v17 = vpop.xlane.xlu1 %885 }
 0x3f3   : > { %1990 = vrcp.f32 %v886_v17 }
 0x3f6   : > { %v915_v18 = vpop.permute.xlu1 %914 }
 0x3f7   : > { %968 = vxpose.xlu1.c.b16.start.end [1/1] (short) (narrow) %v915_v18, 16 }
 0x3fd   : > { %v1991_v19 = vpop.eup %1990 }
 0x3fe   : > { %v900_v20 = vmul.f32 %v1991_v19, %v1983_v60  ;;  %v2017_v60 = vmov 1983009808  }
 0x3ff   : > { %v1299_v61 = vunpack.c.l.s4 %v2017_v60 }
 0x400   : > { %v904_v21 = vpack.c.bf16 %v900_v20, %v900_v20 }
 0x401   : > { %v1300_v2 = vunpack.c.0.s8 %v1299_v61 }
 0x402   : > { %v988_v22 = vsel %vm666_vm3, %v904_v21, 0 }
 0x403   : > { %1900 = vmatpush3.bf16.xpose.msra.mxu0 %v988_v22 }
 0x404   : > { %1911 = vmatprep.subr.bf16.mxu0 %v2010_v1 }
 0x413   : > { %920 = vxpose.xlu0.c.b16.start.end [1/1] (short) (narrow) %v909_v13, 16 }
 0x43e   : > { %v889_v23 = vpop.xlane.xlu0 %888 }
 0x43f   : > { %1992 = vrcp.f32 %v889_v23  ;;  %v1974_v23 = vld [vmem:[%s2293_s5] sm:$0xff]  }
 0x442   : > { %v913_v24 = vpop.permute.xlu0 %912 }
 0x443   : > { %952 = vxpose.xlu0.c.b16.start.end [1/1] (short) (narrow) %v913_v24, 16 }
 0x446   : > { %v892_v29 = vpop.xlane.xlu1 %891 }
 0x447   : > { %1994 = vrcp.f32 %v892_v29 }
 0x449   : > { %v1993_v25 = vpop.eup %1992 }
 0x44a   : > { %v901_v26 = vmul.f32 %v1993_v25, %v1985_v6 }
 0x44c   : > { %v905_v27 = vpack.c.bf16 %v901_v26, %v901_v26  ;;  %v944_v30 = vpop.trf.xlu1 }
 0x44e   : > { %v1034_v28 = vsel %vm666_vm3, %v905_v27, 0 }
 0x44f   : > { %1906 = vmatpush3.bf16.xpose.msra.mxu1 %v1034_v28 }
 0x450   : > { %1917 = vmatprep.subr.bf16.mxu1 %v2010_v1 }
 0x451   : > { %v1995_v31 = vpop.eup %1994 }
 0x452   : > { %v902_v32 = vmul.f32 %v1995_v31, %v1987_v8  ;;  %v1303_v8 = vsub.s32 %v1300_v2, %v1302_v4 }
 0x454   : > { %v906_v34 = vpack.c.bf16 %v902_v32, %v902_v32  ;;  %v1975_v32 = vld [vmem:[%s2293_s5 + $0x8] sm:$0xff]  }
 0x456   : > { %1908 = vmatmul.mubr.msk.bf16.vlgmr.msra.gmra.mrb[16].mxu1 %vm666_vm3, %v944_v30  ;;  %v1080_v36 = vsel %vm666_vm3, %v906_v34, 0 }
 0x457   : > { %1919 = vmatprep.mubr.msk.bf16.mxu1 %vm2011_vm0, %v2010_v1 }
 0x45d   : > { %v976_v41 = vpop.trf.xlu1 }
 0x473   : > { %v895_v33 = vpop.xlane.xlu0 %894 }
 0x474   : > { %1996 = vrcp.f32 %v895_v33 }
 0x479   : > { %v928_v35 = vpop.trf.xlu0 }
 0x47a   : > { %1902 = vmatmul.mubr.msk.bf16.vlgmr.msra.gmra.mrb[4].mxu0 %vm666_vm3, %v928_v35 }
 0x47b   : > { %1912 = vmatpush3.bf16.xpose.msra.mxu0 %v1080_v36  ;;  %1913 = vmatprep.mubr.msk.bf16.mxu0 %vm2011_vm0, %v2010_v1 }
 0x47c   : > { %1923 = vmatprep.subr.bf16.mxu0 %v2010_v1 }
 0x47e   : > { %v1997_v37 = vpop.eup %1996 }
 0x47f   : > { %v903_v38 = vmul.f32 %v1997_v37, %v1989_v14 }
 0x481   : > { %v907_v39 = vpack.c.bf16 %v903_v38, %v903_v38 }
 0x483   : > { %v1126_v40 = vsel %vm666_vm3, %v907_v39, 0 }
 0x484   : > { %1918 = vmatpush3.bf16.xpose.msra.mxu1 %v1126_v40 }
 0x485   : > { %1931 = vmatprep.subr.bf16.mxu1 %v2010_v1 }
 0x48b   : > { %1920 = vmatmul.mubr.msk.bf16.vlgmr.msra.gmra.mrb[20].mxu1 %vm666_vm3, %v976_v41 }
 0x48c   : > { %1935 = vmatprep.mubr.msk.bf16.mxu1 %vm2011_vm0, %v2010_v1 }
 0x4a9   : > { %v960_v42 = vpop.trf.xlu0 }
 0x4aa   : > { %1914 = vmatmul.mubr.msk.bf16.vlgmr.msra.gmra.mrb[8].mxu0 %vm666_vm3, %v960_v42 }
 0x4ab   : > { %1927 = vmatprep.mubr.msk.bf16.mxu0 %vm2011_vm0, %v2010_v1  ;;  %1924 = vmatpush3.bf16.msra.mxu0 %v1974_v23  ;;  %v1823_v23 = vld [vmem:[%s2298_s10] ss:$0 sm:$0xff] }
 0x4ac   : > { %1925 = vmatprep.subr.bf16.mxu0 %v2010_v1 }
 0x4af   : > { %1926 = vmatpush3.bf16.msra.mxu0 %v1975_v32 }
 0x4b0   : > { %1939 = vmatprep.subr.bf16.mxu0 %v2010_v1 }
 0x529   : > { %v1070_v43 = vpop.f32.mrb[16].mxu1 }
 0x52a   : > { %v1909_v44 = vpop.f32.mrb[17].mxu1  ;;  %1200 = vxpose.xlu1.b32.start.end [1/1] (short) (narrow) %v1070_v43, 8 }
 0x52b   : > { %v1073_v45 = vpop.f32.mrb[18].mxu1 }
 0x52c   : > { %v1910_v46 = vpop.f32.mrb[19].mxu1 }
 0x54d   : > { %v1024_v47 = vpop.f32.mrb[4].mxu0 }
 0x54e   : > { %v1903_v48 = vpop.f32.mrb[5].mxu0  ;;  %1168 = vxpose.xlu0.b32.start.end [1/1] (short) (narrow) %v1024_v47, 8 }
 0x54f   : > { %v1027_v49 = vpop.f32.mrb[6].mxu0 }
 0x550   : > { %v1904_v50 = vpop.f32.mrb[7].mxu0 }
 0x55e   : > { %v1162_v51 = vpop.f32.mrb[20].mxu1 }
 0x55f   : > { %v1921_v52 = vpop.f32.mrb[21].mxu1 }
 0x560   : > { %v1165_v53 = vpop.f32.mrb[22].mxu1 }
 0x561   : > { %v1922_v54 = vpop.f32.mrb[23].mxu1 }
 0x57d   : > { %v1116_v55 = vpop.f32.mrb[8].mxu0 }
 0x57e   : > { %1232 = vxpose.xlu0.b32.start.end [1/1] (short) (narrow) %v1116_v55, 8  ;;  %v1915_v56 = vpop.f32.mrb[9].mxu0 }
 0x57f   : > { %v1119_v57 = vpop.f32.mrb[10].mxu0  ;;  %v1817_v56 = vld [vmem:[%s2294_s6] ss:$0 sm:$0xff] }
 0x580   : > { %v1916_v58 = vpop.f32.mrb[11].mxu0  ;;  %v1516_v57 = vunpack.c.l.bf16 %v2132_v3  ;;  %v1976_v3 = vld [vmem:[%s2297_s9] sm:$0xff]  }
 0x581   : > { %1932 = vmatpush3.bf16.msra.mxu1 %v1976_v3 }
 0x582   : > { %1264 = vxpose.xlu0.b32.start.end [1/1] (short) (narrow) %v1162_v51, 8  ;;  %1933 = vmatprep.subr.bf16.mxu1 %v2010_v1 }
 0x5aa   : > { %v1216_v6 = vpop.trf.xlu1 }
 0x5ce   : > { %v1184_v59 = vpop.trf.xlu0 }
 0x5fe   : > { %v1248_v5 = vpop.trf.xlu0 }
 0x5ff   : > { %v1296_v9 = vcombine.low %v1184_v59, %v1248_v5  ;;  %v1297_v10 = vcombine.high %v1184_v59, %v1248_v5 }
 0x601   : > { %v1304_v16 = vrot.slane %v1296_v9, %v1303_v8  ;;  %v1311_v17 = vrot.slane %v1297_v10, %v1303_v8  ;;  %v1978_v9 = vld [vmem:[%s2299_s11] sm:$0xff]   ;;  %v1979_v10 = vld [vmem:[%s2299_s11 + $0x8] sm:$0xff]  }
 0x602   : > { %v1280_v11 = vpop.trf.xlu0 }
 0x603   : > { %v1312_v12 = vcombine.low %v1216_v6, %v1280_v11  ;;  %v1313_v14 = vcombine.high %v1216_v6, %v1280_v11 }
 0x605   : > { %v1320_v18 = vrot.slane %v1312_v12, %v1303_v8  ;;  %v1327_v19 = vrot.slane %v1313_v14, %v1303_v8 }
 0x607   : > { %v1328_v20 = vcombine.low %v1304_v16, %v1320_v18  ;;  %v1329_v21 = vcombine.high %v1304_v16, %v1320_v18  ;;  %v1344_v22 = vcombine.low %v1311_v17, %v1327_v19  ;;  %v1345_v13 = vcombine.high %v1311_v17, %v1327_v19  ;;  %v1821_v16 = vld [vmem:[%s2295_s7] ss:$0 sm:$0xff] }
 0x608   : > { %v1822_v18 = vld [vmem:[%s2296_s8] ss:$0 sm:$0xff] }
 0x609   : > { %v1336_v24 = vrot.slane %v1328_v20, %v1335_v15  ;;  %v1343_v25 = vrot.slane %v1329_v21, %v1335_v15  ;;  %v1352_v26 = vrot.slane %v1344_v22, %v1335_v15  ;;  %v1359_v27 = vrot.slane %v1345_v13, %v1335_v15  ;;  %v1980_v22 = vld [vmem:[%s2299_s11 + $0x10] sm:$0xff]   ;;  %v1981_v13 = vld [vmem:[%s2299_s11 + $0x18] sm:$0xff]  }
 0x60b   : > { %v1364_v28 = vcombine.low %v1336_v24, %v1343_v25  ;;  %v1815_v29 = vcombine.high %v1336_v24, %v1343_v25  ;;  %v1380_v30 = vcombine.low %v1352_v26, %v1359_v27  ;;  %v1816_v31 = vcombine.high %v1352_v26, %v1359_v27 }
 0x60d   : > { %v1371_v33 = vrot.slane %v1364_v28, %v1303_v8  ;;  %v1379_v34 = vrot.slane %v1815_v29, %v1303_v8  ;;  %v1387_v35 = vrot.slane %v1380_v30, %v1303_v8  ;;  %v1395_v36 = vrot.slane %v1816_v31, %v1303_v8  ;;  %v1977_v8 = vld [vmem:[%s2297_s9 + $0x8] sm:$0xff]  }
 0x60e   : > { %1934 = vmatpush3.bf16.msra.mxu1 %v1977_v8 }
 0x60f   : > { %v1397_v37 = vcombine.high %v1371_v33, %v1379_v34  ;;  %v1413_v38 = vcombine.high %v1387_v35, %v1395_v36  ;;  %v1396_v39 = vcombine.low %v1371_v33, %v1379_v34  ;;  %v1412_v40 = vcombine.low %v1387_v35, %v1395_v36 }
 0x611   : > { %v1411_v41 = vrot.slane %v1397_v37, %v1335_v15  ;;  %v1427_v42 = vrot.slane %v1413_v38, %v1335_v15  ;;  %v1404_v43 = vrot.slane %v1396_v39, %v1335_v15  ;;  %v1420_v44 = vrot.slane %v1412_v40, %v1335_v15 }
 0x613   : > { %v1430_v45 = vcombine.low %v1411_v41, %v1427_v42  ;;  %v1429_v46 = vcombine.high %v1404_v43, %v1420_v44  ;;  %v1428_v47 = vcombine.low %v1404_v43, %v1420_v44  ;;  %v1431_v48 = vcombine.high %v1411_v41, %v1427_v42 }
 0x615   : > { %1437 = vrot.lane.b32.xlu0 %v1430_v45, %s2019_s17  ;;  %1433 = vrot.lane.b32.xlu1 %v1429_v46, %s2020_s20 }
 0x619   : > { %1441 = vrot.lane.b32.xlu1 %v1431_v48, %s2021_s21 }
 0x687   : > { %v1434_v49 = vpop.permute.xlu1 %1433  ;;  %v1438_v50 = vpop.permute.xlu0 %1437 }
 0x688   : > { %v1444_v51 = vsel %vm666_vm3, %v1428_v47, %v1434_v49  ;;  %v1833_v47 = vld [vmem:[%s2301_s13] ss:$0 sm:$0xff] }
 0x689   : > { %v1446_v53 = vsel %vm1445_vm4, %v1444_v51, %v1438_v50  ;;  %v1834_v49 = vld [vmem:[%s2302_s14] ss:$0 sm:$0xff] }
 0x68b   : > { %v1442_v52 = vpop.permute.xlu1 %1441 }
 0x68c   : > { %v1448_v54 = vsel %vm1447_vm5, %v1446_v53, %v1442_v52 }
 0x68d   : > { %v1449_v55 = vpack.c.bf16 %v1448_v54, %v1448_v54 }
 0x68f   : > { %1928 = vmatmul.mubr.msk.bf16.vlgmr.msra.gmra.mrb[12].mxu0 %vm538_vm1, %v1449_v55 }
 0x690   : > { %1947 = vmatprep.mubr.msk.bf16.mxu0 %vm2011_vm0, %v2010_v1  ;;  %1940 = vmatpush3.bf16.msra.mxu0 %v1978_v9 }
 0x691   : > { %1941 = vmatprep.subr.bf16.mxu0 %v2010_v1 }
 0x694   : > { %1942 = vmatpush3.bf16.msra.mxu0 %v1979_v10 }
 0x695   : > { %1943 = vmatprep.subr.bf16.mxu0 %v2010_v1 }
 0x698   : > { %1944 = vmatpush3.bf16.msra.mxu0 %v1980_v22 }
 0x699   : > { %1945 = vmatprep.subr.bf16.mxu0 %v2010_v1  ;;  %v1827_v1 = vld [vmem:[%s2300_s12] ss:$0 sm:$0xff] }
 0x69c   : > { %1946 = vmatpush3.bf16.msra.mxu0 %v1981_v13 }
 0x762   : > { %v1510_v58 = vpop.f32.mrb[12].mxu0 }
 0x763   : > { %v1511_v59 = vadd.f32 %v1817_v56, %v1510_v58  ;;  %v1929_v60 = vpop.f32.mrb[13].mxu0 }
 0x764   : > { %v1513_v61 = vpop.f32.mrb[14].mxu0 }
 0x765   : > { %v1930_v62 = vpop.f32.mrb[15].mxu0  ;;  %v1517_v63 = vadd.f32 %v1516_v57, %v1511_v59 }
 0x767   : > { %v1520_v0 = vsel %vm538_vm1, %v1517_v63, 0.0 }
 0x768   : > { %1521 = vadd.xlane.f32.xlu1 %v1520_v0 }
 0x7f5   : > { %v1522_v2 = vpop.xlane.xlu1 %1521 }
 0x7f6   : > { %v1524_v4 = vmul.f32 0.03125, %v1522_v2 }
 0x7f8   : > { %v1525_v5 = vsub.f32 %v1517_v63, %v1524_v4 }
 0x7fa   : > { %v1526_v6 = vmul.f32 %v1525_v5, %v1525_v5 }
 0x7fc   : > { %v1527_v7 = vsel %vm538_vm1, %v1526_v6, 0.0 }
 0x7fd   : > { %1528 = vadd.xlane.f32.xlu0 %v1527_v7 }
 0x88a   : > { %v1529_v11 = vpop.xlane.xlu0 %1528 }
 0x88b   : > { %v1530_v12 = vmul.f32 0.03125, %v1529_v11 }
 0x88d   : > { %v1531_v14 = vadd.f32 1e-05, %v1530_v12 }
 0x88f   : > { %1998 = vrsqrt.f32 %v1531_v14 }
 0x899   : > { %v1999_v15 = vpop.eup %1998 }
 0x89a   : > { %v1533_v17 = vmul.f32 %v1999_v15, %v1525_v5 }
 0x89c   : > { %v1540_v19 = vmul.f32 %v1821_v16, %v1533_v17 }
 0x89e   : > { %v1547_v20 = vadd.f32 %v1822_v18, %v1540_v19 }
 0x8a0   : > { %v1548_v21 = vpack.c.bf16 %v1547_v20, %v1547_v20 }
 0x8a2   : > { %1936 = vmatmul.mubr.msk.bf16.vlgmr.msra.gmra.mrb[24].mxu1 %vm538_vm1, %v1548_v21 }
 0x975   : > { %v1609_v24 = vpop.f32.mrb[24].mxu1 }
 0x976   : > { %v1610_v25 = vadd.f32 %v1823_v23, %v1609_v24  ;;  %v1937_v26 = vpop.f32.mrb[25].mxu1 }
 0x977   : > { %v1612_v27 = vpop.f32.mrb[26].mxu1 }
 0x978   : > { %v1615_v28 = vmax.f32 %v1610_v25, 0.0  ;;  %v1938_v29 = vpop.f32.mrb[27].mxu1 }
 0x97a   : > { %v1616_v30 = vpack.c.bf16 %v1615_v28, %v1615_v28 }
 0x97c   : > { %1948 = vmatmul.mubr.msk.bf16.vlgmr.msra.gmra.mrb[16].mxu0 %vm1656_vm6, %v1616_v30 }
 0xa4f   : > { %v1694_v31 = vpop.f32.mrb[16].mxu0 }
 0xa50   : > { %v1695_v32 = vadd.f32 %v1827_v1, %v1694_v31  ;;  %v1949_v33 = vpop.f32.mrb[17].mxu0 }
 0xa51   : > { %v1697_v34 = vpop.f32.mrb[18].mxu0 }
 0xa52   : > { %v1950_v35 = vpop.f32.mrb[19].mxu0  ;;  %v1700_v36 = vadd.f32 %v1695_v32, %v1547_v20 }
 0xa54   : > { %v1703_v37 = vsel %vm538_vm1, %v1700_v36, 0.0 }
 0xa55   : > { %1704 = vadd.xlane.f32.xlu1 %v1703_v37 }
 0xae2   : > { %v1705_v38 = vpop.xlane.xlu1 %1704 }
 0xae3   : > { %v1706_v39 = vmul.f32 0.03125, %v1705_v38 }
 0xae5   : > { %v1707_v40 = vsub.f32 %v1700_v36, %v1706_v39 }
 0xae7   : > { %v1708_v41 = vmul.f32 %v1707_v40, %v1707_v40 }
 0xae9   : > { %v1709_v42 = vsel %vm538_vm1, %v1708_v41, 0.0 }
 0xaea   : > { %1710 = vadd.xlane.f32.xlu0 %v1709_v42 }
 0xb77   : > { %v1711_v43 = vpop.xlane.xlu0 %1710 }
 0xb78   : > { %v1712_v44 = vmul.f32 0.03125, %v1711_v43 }
 0xb7a   : > { %v1713_v45 = vadd.f32 1e-05, %v1712_v44 }
 0xb7c   : > { %2000 = vrsqrt.f32 %v1713_v45 }
 0xb86   : > { %v2001_v46 = vpop.eup %2000 }
 0xb87   : > { %v1715_v48 = vmul.f32 %v2001_v46, %v1707_v40 }
 0xb89   : > { %v1722_v50 = vmul.f32 %v1833_v47, %v1715_v48 }
 0xb8b   : > { %v1729_v51 = vadd.f32 %v1834_v49, %v1722_v50 }
 0xb8d   : > { %v1730_v52 = vpack.c.bf16 %v1729_v51, %v1729_v51 }
 0xb8f   : > { %1732 = vst.msk [vmem:[%s503_s27] sm:$0xf] %vm1731_vm7, %v1730_v52 }
 0xb90 PF: > { %s25_s18 = sadd.s32 1, %s2008_s18  }
 0xb91   : > { %p22_p4 = scmp.ge.s32.totalorder %s25_s18, 4  }
 0xb93   :  { %24 = sbr.rel (!%p22_p4) target bundleno = 1 (0x1), region = 113 }

// kernel: seq2seq_transformer_forward.10
= control target key start
LH: loop header
LB: loop body
LE: loop exit
PB: predicated region body
PF: predicated region fallthrough
CT: control target
= control target key end

     0   :  { %s4311_s0 = inlined_call_operand.vmem [shape: bf16[2,8,32], index: 0, kind: input, shape index: {}]   ;;  %s4312_s1 = inlined_call_operand.vmem [shape: bf16[2,8,32], index: 1, kind: input, shape index: {}]   ;;  %s4313_s2 = inlined_call_operand.vmem [shape: f32[8,8], index: 2, kind: input, shape index: {}]   ;;  %s4314_s3 = inlined_call_operand.vmem [shape: f32[2,1,8], index: 3, kind: input, shape index: {}]   ;;  %s4315_s4 = inlined_call_operand.vmem [shape: f32[2,1,8], index: 4, kind: input, shape index: {}]   ;;  %s4316_s5 = inlined_call_operand.vmem [shape: bf16[32,96], index: 5, kind: input, shape index: {}]   ;;  %s4317_s6 = inlined_call_operand.vmem [shape: f32[1,96], index: 6, kind: input, shape index: {}]   ;;  %s4318_s7 = inlined_call_operand.vmem [shape: bf16[32,32], index: 7, kind: input, shape index: {}]   ;;  %s4319_s8 = inlined_call_operand.vmem [shape: f32[1,32], index: 8, kind: input, shape index: {}]   ;;  %s4320_s9 = inlined_call_operand.vmem [shape: f32[1,32], index: 9, kind: input, shape index: {}]   ;;  %s4321_s10 = inlined_call_operand.vmem [shape: f32[1,32], index: 10, kind: input, shape index: {}]   ;;  %s4322_s11 = inlined_call_operand.vmem [shape: bf16[32,32], index: 11, kind: input, shape index: {}]   ;;  %s4323_s12 = inlined_call_operand.vmem [shape: f32[1,32], index: 12, kind: input, shape index: {}]   ;;  %s4324_s13 = inlined_call_operand.vmem [shape: bf16[32,64], index: 13, kind: input, shape index: {}]   ;;  %s4325_s14 = inlined_call_operand.vmem [shape: f32[1,64], index: 14, kind: input, shape index: {}]   ;;  %s4326_s15 = inlined_call_operand.vmem [shape: bf16[32,32], index: 15, kind: input, shape index: {}]   ;;  %s4327_s16 = inlined_call_operand.vmem [shape: f32[1,32], index: 16, kind: input, shape index: {}]   ;;  %s4328_s17 = inlined_call_operand.vmem [shape: f32[1,32], index: 17, kind: input, shape index: {}]   ;;  %s4329_s18 = inlined_call_operand.vmem [shape: f32[1,32], index: 18, kind: input, shape index: {}]   ;;  %s4330_s19 = inlined_call_operand.vmem [shape: bf16[32,64], index: 19, kind: input, shape index: {}]   ;;  %s4331_s20 = inlined_call_operand.vmem [shape: f32[1,64], index: 20, kind: input, shape index: {}]   ;;  %s4332_s21 = inlined_call_operand.vmem [shape: bf16[64,32], index: 21, kind: input, shape index: {}]   ;;  %s4333_s22 = inlined_call_operand.vmem [shape: f32[1,32], index: 22, kind: input, shape index: {}]   ;;  %s4334_s23 = inlined_call_operand.hbm [shape: f32[1,32], index: 23, kind: input, shape index: {}]   ;;  %s4335_s24 = inlined_call_operand.hbm [shape: f32[1,32], index: 24, kind: input, shape index: {}]   ;;  %s4336_s25 = inlined_call_operand.vmem [shape: bf16[2,8,32], index: 25, kind: output, shape index: {}]  }
   0x1   :  { %4348 = sst [smem:[#allocation8_spill]] %s4311_s0 }
   0x2   :  { %4349 = sst [smem:[#allocation9_spill]] %s4312_s1 }
   0x3   :  { %4350 = sst [smem:[#allocation10_spill]] %s4313_s2 }
   0x4   :  { %4351 = sst [smem:[#allocation11_spill]] %s4314_s3 }
   0x5   :  { %4352 = sst [smem:[#allocation12_spill]] %s4315_s4 }
   0x6   :  { %4353 = sst [smem:[#allocation13_spill]] %s4316_s5 }
   0x7   :  { %4354 = sst [smem:[#allocation14_spill]] %s4317_s6 }
   0x8   :  { %4355 = sst [smem:[#allocation15_spill]] %s4318_s7 }
   0x9   :  { %4356 = sst [smem:[#allocation16_spill]] %s4319_s8 }
   0xa   :  { %4357 = sst [smem:[#allocation17_spill]] %s4320_s9 }
   0xb   :  { %30 = vsyncpa [#allocation3], 0 }
   0xc   :  { %31 = vsyncpa [#allocation5], 0  ;;  %s3860_s29 = smov 0  }
   0xd LB: > { %s3866_s2 = sadd.s32 4294967295, %s3714_s29   ;;  %p3267_p0 = scmp.ge.s32.totalorder %s3714_s29, 1  ;;  %s3714_s29 = sphi %s3860_s29, %s37_s29  }
   0xe   : > { %p613_p1 = scmp.lt.s32.totalorder %s3714_s29, 3  ;;  %p4339_p2 = scmp.eq.s32.totalorder %s3866_s2, 0 }
   0xf   : > { %s3716_s30 = smov [#allocation2]   ;;  %s3717_s3 = smov [#allocation4]  }
  0x10   : > { %p3871_p3 = pnand %p3267_p0, %p613_p1  ;;  %s683_s7 = sshll.u32 %s3716_s30, 4  ;;  %s684_s7 = int_to_ptr.vmem [resolvable:$true] %s683_s7 }
  0x11   : > { %s694_s26 = sshll.u32 %s3717_s3, 4  ;;  %s3644_s4 = scalar_lea.hbm %s4334_s23, 16  ;;  %s3883_s26 = int_to_ptr.vmem [resolvable:$true] %s694_s26 }
  0x12   : > { %s4358_s6 = scalar_select %p3871_p3, 1, 0 }
  0x13   : > { %p3556_p4 = pneg %p3871_p3  ;;  %p3645_p6 = scmp.ne.s32.totalorder %s4334_s23, %s3644_s4 }
  0x14   : > { %p3651_p10 = scmp.lt.u32.totalorder %s3644_s4, %s4334_s23 }
  0x15   : > { %p3879_p5 = pnand %p4339_p2, %p3556_p4 }
  0x17   : > { %p3646_p7 = pneg %p3879_p5 }
  0x19   : > { %p3647_p8 = pnand %p3646_p7, %p3645_p6 }
  0x1b   : > { %p3648_p9 = pneg %p3647_p8 }
  0x1d   : > { %p3653_p11 = pnand %p3651_p10, %p3648_p9 }
  0x1f   : > { %3656 = shalt.err (!%p3653_p11)
}
  0x20   : > { %s3657_s30 = scalar_lea.vmem %s684_s7, 16  ;;  %s3664_s3 = scalar_lea.vmem %s684_s7, 32 }
  0x21   : > { %p3658_p12 = scmp.ne.s32.totalorder %s684_s7, %s3657_s30  ;;  %p3665_p1 = scmp.lt.s32.totalorder %s684_s7, %s684_s7 }
  0x22   : > { %p3666_p4 = scmp.lt.s32.totalorder %s3664_s3, %s3657_s30 }
  0x23   : > { %p3660_p13 = pnand %p3658_p12, %p3646_p7 }
  0x24   : > { %p3667_p2 = por %p3666_p4, %p3665_p1 }
  0x25   : > { %p3661_p0 = pneg %p3660_p13 }
  0x27   : > { %p3668_p3 = pnand %p3667_p2, %p3661_p0 }
  0x29   : > { %3671 = shalt.err (!%p3668_p3)
}
  0x2a   : > { %3559 = dma.hbm_to_vmem [thread:$0]  (!%p3879_p5), %s4334_s23, 16, %s684_s7, [#allocation3]  }
  0x2b   : > { %s3672_s9 = scalar_lea.hbm %s4335_s24, 16 }
  0x2c   : > { %p3673_p6 = scmp.ne.s32.totalorder %s4335_s24, %s3672_s9  ;;  %p3679_p3 = scmp.lt.u32.totalorder %s3672_s9, %s4335_s24 }
  0x2e   : > { %p3675_p8 = pnand %p3673_p6, %p3646_p7 }
  0x30   : > { %p3676_p2 = pneg %p3675_p8 }
  0x32   : > { %p3681_p9 = pnand %p3679_p3, %p3676_p2 }
  0x34   : > { %3684 = shalt.err (!%p3681_p9)
}
  0x35   : > { %s3685_s7 = scalar_lea.vmem %s3883_s26, 16  ;;  %s3692_s8 = scalar_lea.vmem %s3883_s26, 32 }
  0x36   : > { %p3686_p10 = scmp.ne.s32.totalorder %s3883_s26, %s3685_s7  ;;  %p3693_p13 = scmp.lt.s32.totalorder %s3883_s26, %s3883_s26 }
  0x37   : > { %p3694_p0 = scmp.lt.s32.totalorder %s3692_s8, %s3685_s7 }
  0x38   : > { %p3688_p11 = pnand %p3686_p10, %p3646_p7 }
  0x39   : > { %p3695_p1 = por %p3694_p0, %p3693_p13 }
  0x3a   : > { %p3689_p12 = pneg %p3688_p11 }
  0x3c   : > { %p3696_p4 = pnand %p3695_p1, %p3689_p12 }
  0x3e   : > { %3699 = shalt.err (!%p3696_p4)
}
  0x3f   : > { %3562 = dma.hbm_to_vmem [thread:$0]  (!%p3879_p5), %s4335_s24, 16, %s3883_s26, [#allocation5]  }
  0x40   : > { %p4360_p6 = scmp.ne.s32.totalorder %s4358_s6, 0 }
  0x41   : > { %p4361_p7 = scmp.eq.s32.totalorder (!%p4360_p6), %s3866_s2, 0 }
  0x42   : > { %733 = sbr.rel (%p4360_p6) target bundleno = 5033 (0x13a9), region = 120 }
  0x49   : > { %3705 = dma.done.wait (%p4361_p7), [#allocation3], 16   ;;  %p4362_p8 = pmov %p4361_p7 }
  0x4a   : > { %p4363_p2 = pmov %p4361_p7 }
  0x4b   : > { %3707 = vsyncadd (%p4362_p8), [#allocation3], 4294967280 }
  0x4c   : > { %3709 = dma.done.wait (%p4363_p2), [#allocation5], 16   ;;  %p4364_p3 = pmov %p4363_p2 }
  0x4d   : > { %p813_p9 = scmp.lt.s32.totalorder %s3866_s2, 1  ;;  %v3718_v0 = vmov 0.0   ;;  %vm3719_vm0 = vmmov 0   ;;  %s4365_s28 = sld [smem:[#allocation13_spill]]  ;;  %vm867_vm1 = vcmask 261120   ;;  %vm999_vm2 = vcmask 1043456  }
  0x4e   : > { %3711 = vsyncadd (%p4364_p3), [#allocation5], 4294967280  ;;  %3392 = vmatprep.subr.bf16.mxu0 %v3718_v0  ;;  %3396 = vmatprep.mubr.msk.bf16.mxu0 %vm3719_vm0, %v3718_v0  ;;  %s4366_s0 = sld [smem:[#allocation8_spill]]  ;;  %s4367_s4 = sld [smem:[#allocation14_spill]]  ;;  %vm995_vm3 = vcmask 64512   ;;  %vm1774_vm4 = vcmask 130048  }
  0x4f   : > { %s4381_s2 = smov (!%p813_p9, %s3866_s2), 1  ;;  %3406 = vmatprep.subr.bf16.mxu1 %v3718_v0  ;;  %3408 = vmatprep.mubr.msk.bf16.mxu1 %vm3719_vm0, %v3718_v0  ;;  %s4346_s26 = smov 104   ;;  %vm1776_vm5 = vcmask 195584   ;;  %vm3083_vm6 = vcmask 523264   ;;  %vm3158_vm7 = vcmask 257024  }
  0x50   : > { %s3954_s6 = sshll.u32 %s4381_s2, 2  ;;  %s3721_s1 = smov 120  }
  0x51   : > { %s4344_s9 = smov 96   ;;  %s3723_s5 = smov 112  }
  0x52   : > { %s4368_s3 = sld [smem:[#allocation11_spill]]  ;;  %s4371_s27 = sld [smem:[#allocation16_spill]] }
  0x53   : > { %v3590_v1 = vld [vmem:[%s4365_s28] sm:$0xff]   ;;  %v3591_v2 = vld [vmem:[%s4365_s28 + $0x8] sm:$0xff]   ;;  %s4373_s8 = smov 104  }
  0x54   : > { %s816_s30 = scalar_lea.vmem %s4366_s0, %s3954_s6  ;;  %3393 = vmatpush3.bf16.msra.mxu0 %v3590_v1  ;;  %v3278_v4 = vld [vmem:[%s4367_s4] ss:$0 sm:$0xff]  ;;  %s4369_s4 = sld [smem:[#allocation10_spill]] }
  0x55   : > { %3394 = vmatprep.subr.bf16.mxu0 %v3718_v0  ;;  %v3967_v3 = vld [vmem:[%s816_s30] sm:$0xf]  ;;  %s3724_s0 = smov 64   ;;  %s4341_s30 = smov 24  }
  0x58   : > { %3395 = vmatpush3.bf16.msra.mxu0 %v3591_v2  ;;  %s823_s7 = scalar_lea.vmem %s4368_s3, %s4381_s2  ;;  %s4378_s3 = smov 8  }
  0x59   : > { %3400 = vmatprep.subr.bf16.mxu0 %v3718_v0  ;;  %v3277_v27 = vld [vmem:[%s823_s7] ss:$0 sm:$0xff]  ;;  %s4370_s7 = sld [smem:[#allocation15_spill]] }
  0x5a   : > { %v834_v26 = vld [vmem:[%s4369_s4] sm:$0xff]  ;;  %s4343_s4 = smov 16  }
  0x5b   : > { %3397 = vmatmul.mubr.msk.bf16.vlgmr.msra.gmra.mrb[0].mxu0 %vm867_vm1, %v3967_v3  ;;  %v842_v28 = vadd.f32 %v3277_v27, %v834_v26 }
  0x5c   : > { %3402 = vmatprep.mubr.msk.bf16.mxu0 %vm3719_vm0, %v3718_v0 }
 0x12e   : > { %v905_v5 = vpop.f32.mrb[0].mxu0 }
 0x12f   : > { %v906_v6 = vadd.f32 %v3278_v4, %v905_v5  ;;  %v3398_v7 = vpop.f32.mrb[1].mxu0 }
 0x130   : > { %v908_v8 = vpop.f32.mrb[2].mxu0 }
 0x131   : > { %v3977_v9 = vpack.c.bf16 %v906_v6, %v906_v6  ;;  %v3399_v10 = vpop.f32.mrb[3].mxu0 }
 0x133   : > { %917 = vrot.lane.b32.xlu1 %v3977_v9, %s4346_s26  ;;  %913 = vrot.lane.b32.xlu0 %v3977_v9, %s3721_s1 }
 0x137   : > { %919 = vrot.lane.b32.xlu1 %v3977_v9, %s4344_s9  ;;  %915 = vrot.lane.b32.xlu0 %v3977_v9, %s3723_s5 }
 0x1a5   : > { %v3987_v11 = vpop.permute.xlu0 %913  ;;  %v3991_v12 = vpop.permute.xlu1 %917 }
 0x1a6   : > { %921 = vrot.lane.b32.xlu0 %v3987_v11, %s4344_s9 }
 0x1a9   : > { %v3993_v13 = vpop.permute.xlu0 %915  ;;  %v920_v14 = vpop.permute.xlu1 %919 }
 0x1aa   : > { %925 = vrot.lane.b32.xlu0 %v3991_v12, %s4344_s9  ;;  %923 = vrot.lane.b32.xlu1 %v3993_v13, %s4344_s9 }
 0x1cd   : > { %931 = vxpose.xlu1.c.b16.start.end [1/1] (short) (narrow) %v920_v14, 16 }
 0x218   : > { %v922_v15 = vpop.permute.xlu0 %921 }
 0x219   : > { %947 = vxpose.xlu0.c.b16.start.end [1/1] (short) (narrow) %v922_v15, 16 }
 0x21c   : > { %v924_v16 = vpop.permute.xlu1 %923  ;;  %v926_v17 = vpop.permute.xlu0 %925 }
 0x21d   : > { %963 = vxpose.xlu0.c.b16.start.end [1/1] (short) (narrow) %v924_v16, 16  ;;  %979 = vxpose.xlu1.c.b16.start.end [1/1] (short) (narrow) %v926_v17, 16 }
 0x233   : > { %v939_v18 = vpop.trf.xlu1 }
 0x234   : > { %v1001_v19 = vsel %vm999_vm2, %v939_v18, 0 }
 0x235   : > { %3401 = vmatpush3.bf16.msra.mxu0 %v1001_v19 }
 0x236   : > { %3412 = vmatprep.subr.bf16.mxu0 %v3718_v0 }
 0x238   : > { %3403 = vmatmul.mubr.msk.bf16.vlgmr.msra.gmra.mrb[4].mxu0 %vm995_vm3, %v3977_v9 }
 0x239   : > { %3414 = vmatprep.mubr.msk.bf16.mxu0 %vm3719_vm0, %v3718_v0 }
 0x27f   : > { %v955_v20 = vpop.trf.xlu0 }
 0x280   : > { %v1047_v21 = vsel %vm999_vm2, %v955_v20, 0 }
 0x281   : > { %3407 = vmatpush3.bf16.msra.mxu1 %v1047_v21 }
 0x282   : > { %3418 = vmatprep.subr.bf16.mxu1 %v3718_v0 }
 0x283   : > { %v971_v22 = vpop.trf.xlu0  ;;  %v987_v23 = vpop.trf.xlu1 }
 0x284   : > { %v1093_v24 = vsel %vm999_vm2, %v971_v22, 0  ;;  %3409 = vmatmul.mubr.msk.bf16.vlgmr.msra.gmra.mrb[0].mxu1 %vm995_vm3, %v3987_v11  ;;  %v1139_v25 = vsel %vm999_vm2, %v987_v23, 0 }
 0x285   : > { %3413 = vmatpush3.bf16.msra.mxu0 %v1093_v24  ;;  %3419 = vmatpush3.bf16.msra.mxu1 %v1139_v25 }
 0x286   : > { %3420 = vmatprep.mubr.msk.bf16.mxu1 %vm3719_vm0, %v3718_v0  ;;  %3424 = vmatprep.subr.bf16.mxu0 %v3718_v0 }
 0x287   : > { %3430 = vmatprep.subr.bf16.mxu1 %v3718_v0 }
 0x288   : > { %3415 = vmatmul.mubr.msk.bf16.vlgmr.msra.gmra.mrb[8].mxu0 %vm995_vm3, %v3993_v13 }
 0x289   : > { %3426 = vmatprep.mubr.msk.bf16.mxu0 %vm3719_vm0, %v3718_v0 }
 0x28c   : > { %3421 = vmatmul.mubr.msk.bf16.vlgmr.msra.gmra.mrb[4].mxu1 %vm995_vm3, %v3991_v12 }
 0x28d   : > { %3432 = vmatprep.mubr.msk.bf16.mxu1 %vm3719_vm0, %v3718_v0 }
 0x30b   : > { %v1037_v29 = vpop.f32.mrb[4].mxu0 }
 0x30c   : > { %v1181_v30 = vmul.f32 0.35355338, %v1037_v29  ;;  %v3404_v31 = vpop.f32.mrb[5].mxu0 }
 0x30d   : > { %v1040_v32 = vpop.f32.mrb[6].mxu0 }
 0x30e   : > { %v3405_v33 = vpop.f32.mrb[7].mxu0  ;;  %v1185_v34 = vadd.f32 %v1181_v30, %v842_v28 }
 0x310   : > { %v1189_v35 = vsel %vm995_vm3, %v1185_v34, -inf }
 0x311   : > { %1190 = vmax.xlane.f32.xlu0 %v1189_v35 }
 0x357   : > { %v1083_v36 = vpop.f32.mrb[0].mxu1 }
 0x358   : > { %v1182_v37 = vmul.f32 0.35355338, %v1083_v36  ;;  %v3410_v38 = vpop.f32.mrb[1].mxu1 }
 0x359   : > { %v1086_v39 = vpop.f32.mrb[2].mxu1 }
 0x35a   : > { %v3411_v40 = vpop.f32.mrb[3].mxu1  ;;  %v1186_v41 = vadd.f32 %v1182_v37, %v842_v28 }
 0x35b   : > { %v1129_v42 = vpop.f32.mrb[8].mxu0 }
 0x35c   : > { %v1183_v43 = vmul.f32 0.35355338, %v1129_v42  ;;  %v3416_v44 = vpop.f32.mrb[9].mxu0  ;;  %v1192_v45 = vsel %vm995_vm3, %v1186_v41, -inf }
 0x35d   : > { %1193 = vmax.xlane.f32.xlu1 %v1192_v45  ;;  %v1132_v46 = vpop.f32.mrb[10].mxu0 }
 0x35e   : > { %v3417_v47 = vpop.f32.mrb[11].mxu0  ;;  %v1187_v48 = vadd.f32 %v1183_v43, %v842_v28 }
 0x35f   : > { %v1175_v49 = vpop.f32.mrb[4].mxu1 }
 0x360   : > { %v1184_v50 = vmul.f32 0.35355338, %v1175_v49  ;;  %v3422_v51 = vpop.f32.mrb[5].mxu1  ;;  %v1195_v52 = vsel %vm995_vm3, %v1187_v48, -inf }
 0x361   : > { %v1178_v53 = vpop.f32.mrb[6].mxu1  ;;  %1196 = vmax.xlane.f32.xlu0 %v1195_v52 }
 0x362   : > { %v3423_v54 = vpop.f32.mrb[7].mxu1  ;;  %v1188_v55 = vadd.f32 %v1184_v50, %v842_v28 }
 0x364   : > { %v1198_v56 = vsel %vm995_vm3, %v1188_v55, -inf }
 0x365   : > { %1199 = vmax.xlane.f32.xlu1 %v1198_v56 }
 0x376   : > { %1239 = vrot.lane.b32.xlu1 %v3987_v11, %s3724_s0 }
 0x377   : > { %1237 = vrot.lane.b32.xlu0 %v3977_v9, %s3724_s0 }
 0x39e   : > { %v1191_v57 = vpop.xlane.xlu0 %1190 }
 0x39f   : > { %v1201_v58 = vsub.f32 %v1185_v34, %v1191_v57 }
 0x3a1   : > { %v1205_v59 = vmul.f32 1.442695, %v1201_v58 }
 0x3a3   : > { %3606 = vpow2.f32 %v1205_v59 }
 0x3ad   : > { %v3607_v60 = vpop.eup %3606 }
 0x3ae   : > { %v1213_v61 = vsel %vm995_vm3, %v3607_v60, 0.0 }
 0x3af   : > { %1214 = vadd.xlane.f32.xlu1 %v1213_v61 }
 0x3c0   : > { %1243 = vrot.lane.b32.xlu1 %v3991_v12, %s3724_s0 }
 0x3ea   : > { %v1194_v62 = vpop.xlane.xlu1 %1193 }
 0x3eb   : > { %v1202_v63 = vsub.f32 %v1186_v41, %v1194_v62  ;;  %v1630_v62 = vlaneseq }
 0x3ed   : > { %v1207_v1 = vmul.f32 1.442695, %v1202_v63  ;;  %v3726_v63 = vmov 1934713408  }
 0x3ee   : > { %v1197_v2 = vpop.xlane.xlu0 %1196 }
 0x3ef   : > { %3608 = vpow2.f32 %v1207_v1  ;;  %v1203_v4 = vsub.f32 %v1187_v48, %v1197_v2  ;;  %v1660_v1 = vunpack.c.l.s4 %v3726_v63 }
 0x3f1   : > { %v1209_v5 = vmul.f32 1.442695, %v1203_v4  ;;  %v1631_v4 = vshrl.u32 %v1630_v62, 7 }
 0x3f2   : > { %v1200_v10 = vpop.xlane.xlu1 %1199 }
 0x3f3   : > { %3610 = vpow2.f32 %v1209_v5  ;;  %v1204_v11 = vsub.f32 %v1188_v55, %v1200_v10 }
 0x3f5   : > { %v1211_v12 = vmul.f32 1.442695, %v1204_v11 }
 0x3f6   : > { %v1240_v14 = vpop.permute.xlu1 %1239 }
 0x3f7   : > { %3612 = vpow2.f32 %v1211_v12 }
 0x3f9   : > { %v3609_v6 = vpop.eup %3608 }
 0x3fa   : > { %v1216_v7 = vsel %vm995_vm3, %v3609_v6, 0.0 }
 0x3fb   : > { %1217 = vadd.xlane.f32.xlu0 %v1216_v7  ;;  %v1661_v7 = vunpack.c.0.s8 %v1660_v1 }
 0x3fd   : > { %v3611_v8 = vpop.eup %3610 }
 0x3fe   : > { %v1219_v9 = vsel %vm995_vm3, %v3611_v8, 0.0 }
 0x3ff   : > { %1220 = vadd.xlane.f32.xlu1 %v1219_v9 }
 0x401   : > { %v3613_v15 = vpop.eup %3612 }
 0x402   : > { %v1222_v16 = vsel %vm995_vm3, %v3613_v15, 0.0 }
 0x411   : > { %1241 = vrot.lane.b32.xlu0 %v3993_v13, %s3724_s0  ;;  %v1238_v13 = vpop.permute.xlu0 %1237  ;;  %s4342_s0 = smov 8  }
 0x42c   : > { %1265 = vxpose.xlu1.c.b16.start.end [1/1] (short) (narrow) %v1240_v14, 16 }
 0x430   : > { %1223 = vadd.xlane.f32.xlu0 %v1222_v16 }
 0x43c   : > { %v1215_v17 = vpop.xlane.xlu1 %1214 }
 0x43d   : > { %3614 = vrcp.f32 %v1215_v17 }
 0x440   : > { %v1244_v18 = vpop.permute.xlu1 %1243 }
 0x441   : > { %1297 = vxpose.xlu1.c.b16.start.end [1/1] (short) (narrow) %v1244_v18, 16 }
 0x447   : > { %v3615_v19 = vpop.eup %3614 }
 0x448   : > { %v1229_v20 = vmul.f32 %v3615_v19, %v3607_v60  ;;  %v3725_v60 = vmov 1983009808  }
 0x449   : > { %v1628_v61 = vunpack.c.l.s4 %v3725_v60 }
 0x44a   : > { %v1233_v21 = vpack.c.bf16 %v1229_v20, %v1229_v20 }
 0x44b   : > { %v1629_v2 = vunpack.c.0.s8 %v1628_v61 }
 0x44c   : > { %v1317_v22 = vsel %vm995_vm3, %v1233_v21, 0 }
 0x44d   : > { %3425 = vmatpush3.bf16.xpose.msra.mxu0 %v1317_v22 }
 0x44e   : > { %3436 = vmatprep.subr.bf16.mxu0 %v3718_v0 }
 0x45d   : > { %1249 = vxpose.xlu0.c.b16.start.end [1/1] (short) (narrow) %v1238_v13, 16 }
 0x488   : > { %v1218_v23 = vpop.xlane.xlu0 %1217 }
 0x489   : > { %3616 = vrcp.f32 %v1218_v23  ;;  %v3592_v23 = vld [vmem:[%s4370_s7] sm:$0xff]  }
 0x48c   : > { %v1242_v24 = vpop.permute.xlu0 %1241  ;;  %v1221_v29 = vpop.xlane.xlu1 %1220 }
 0x48d   : > { %1281 = vxpose.xlu0.c.b16.start.end [1/1] (short) (narrow) %v1242_v24, 16  ;;  %3618 = vrcp.f32 %v1221_v29 }
 0x492   : > { %v1273_v30 = vpop.trf.xlu1 }
 0x493   : > { %v3617_v25 = vpop.eup %3616 }
 0x494   : > { %v1230_v26 = vmul.f32 %v3617_v25, %v3609_v6 }
 0x496   : > { %v1234_v27 = vpack.c.bf16 %v1230_v26, %v1230_v26 }
 0x497   : > { %v3619_v31 = vpop.eup %3618 }
 0x498   : > { %v1363_v28 = vsel %vm995_vm3, %v1234_v27, 0  ;;  %v1231_v32 = vmul.f32 %v3619_v31, %v3611_v8  ;;  %v4062_v8 = vsub.s32 %v1629_v2, %v1631_v4  ;;  %v3594_v2 = vld [vmem:[%s4324_s13] sm:$0xff]  }
 0x499   : > { %3431 = vmatpush3.bf16.xpose.msra.mxu1 %v1363_v28 }
 0x49a   : > { %3442 = vmatprep.subr.bf16.mxu1 %v3718_v0  ;;  %v1235_v34 = vpack.c.bf16 %v1231_v32, %v1231_v32  ;;  %v3593_v32 = vld [vmem:[%s4370_s7 + $0x8] sm:$0xff]  }
 0x49c   : > { %v1409_v36 = vsel %vm995_vm3, %v1235_v34, 0 }
 0x4a0   : > { %3433 = vmatmul.mubr.msk.bf16.vlgmr.msra.gmra.mrb[8].mxu1 %vm995_vm3, %v1273_v30 }
 0x4a1   : > { %3444 = vmatprep.mubr.msk.bf16.mxu1 %vm3719_vm0, %v3718_v0 }
 0x4a7   : > { %v1305_v41 = vpop.trf.xlu1 }
 0x4bd   : > { %v1224_v33 = vpop.xlane.xlu0 %1223 }
 0x4be   : > { %3620 = vrcp.f32 %v1224_v33 }
 0x4c3   : > { %v1257_v35 = vpop.trf.xlu0 }
 0x4c4   : > { %3427 = vmatmul.mubr.msk.bf16.vlgmr.msra.gmra.mrb[12].mxu0 %vm995_vm3, %v1257_v35 }
 0x4c5   : > { %3437 = vmatpush3.bf16.xpose.msra.mxu0 %v1409_v36  ;;  %3438 = vmatprep.mubr.msk.bf16.mxu0 %vm3719_vm0, %v3718_v0 }
 0x4c6   : > { %3448 = vmatprep.subr.bf16.mxu0 %v3718_v0 }
 0x4c8   : > { %v3621_v37 = vpop.eup %3620 }
 0x4c9   : > { %v1232_v38 = vmul.f32 %v3621_v37, %v3613_v15  ;;  %v4064_v15 = vsub.s32 %v1661_v7, %v1631_v4  ;;  %v3595_v4 = vld [vmem:[%s4324_s13 + $0x8] sm:$0xff]  }
 0x4cb   : > { %v1236_v39 = vpack.c.bf16 %v1232_v38, %v1232_v38 }
 0x4cd   : > { %v1455_v40 = vsel %vm995_vm3, %v1236_v39, 0 }
 0x4ce   : > { %3443 = vmatpush3.bf16.xpose.msra.mxu1 %v1455_v40 }
 0x4cf   : > { %3456 = vmatprep.subr.bf16.mxu1 %v3718_v0 }
 0x4d5   : > { %3445 = vmatmul.mubr.msk.bf16.vlgmr.msra.gmra.mrb[12].mxu1 %vm995_vm3, %v1305_v41 }
 0x4d6   : > { %3460 = vmatprep.mubr.msk.bf16.mxu1 %vm3719_vm0, %v3718_v0 }
 0x4f3   : > { %v1289_v42 = vpop.trf.xlu0 }
 0x4f4   : > { %3439 = vmatmul.mubr.msk.bf16.vlgmr.msra.gmra.mrb[16].mxu0 %vm995_vm3, %v1289_v42 }
 0x4f5   : > { %3452 = vmatprep.mubr.msk.bf16.mxu0 %vm3719_vm0, %v3718_v0  ;;  %3449 = vmatpush3.bf16.msra.mxu0 %v3592_v23 }
 0x4f6   : > { %3450 = vmatprep.subr.bf16.mxu0 %v3718_v0 }
 0x4f9   : > { %3451 = vmatpush3.bf16.msra.mxu0 %v3593_v32 }
 0x4fa   : > { %3464 = vmatprep.subr.bf16.mxu0 %v3718_v0 }
 0x573   : > { %v1399_v43 = vpop.f32.mrb[8].mxu1 }
 0x574   : > { %v3434_v44 = vpop.f32.mrb[9].mxu1  ;;  %1529 = vxpose.xlu1.b32.start.end [1/1] (short) (narrow) %v1399_v43, 8 }
 0x575   : > { %v1402_v45 = vpop.f32.mrb[10].mxu1 }
 0x576   : > { %v3435_v46 = vpop.f32.mrb[11].mxu1 }
 0x597   : > { %v1353_v47 = vpop.f32.mrb[12].mxu0 }
 0x598   : > { %v3428_v48 = vpop.f32.mrb[13].mxu0  ;;  %1497 = vxpose.xlu0.b32.start.end [1/1] (short) (narrow) %v1353_v47, 8 }
 0x599   : > { %v1356_v49 = vpop.f32.mrb[14].mxu0 }
 0x59a   : > { %v3429_v50 = vpop.f32.mrb[15].mxu0 }
 0x5a8   : > { %v1491_v51 = vpop.f32.mrb[12].mxu1 }
 0x5a9   : > { %v3446_v52 = vpop.f32.mrb[13].mxu1 }
 0x5aa   : > { %v1494_v53 = vpop.f32.mrb[14].mxu1 }
 0x5ab   : > { %v3447_v54 = vpop.f32.mrb[15].mxu1 }
 0x5c7   : > { %v1445_v55 = vpop.f32.mrb[16].mxu0 }
 0x5c8   : > { %1561 = vxpose.xlu0.b32.start.end [1/1] (short) (narrow) %v1445_v55, 8  ;;  %v3440_v56 = vpop.f32.mrb[17].mxu0 }
 0x5c9   : > { %v1448_v57 = vpop.f32.mrb[18].mxu0  ;;  %v3292_v56 = vld [vmem:[%s4371_s27] ss:$0 sm:$0xff]  ;;  %s4372_s27 = sld [smem:[#allocation9_spill]] }
 0x5ca   : > { %v3441_v58 = vpop.f32.mrb[19].mxu0  ;;  %v1845_v57 = vunpack.c.l.bf16 %v3967_v3 }
 0x5cc   : > { %1593 = vxpose.xlu0.b32.start.end [1/1] (short) (narrow) %v1491_v51, 8 }
 0x5cf   : > { %s820_s26 = scalar_lea.vmem %s4372_s27, %s3954_s6 }
 0x5d0   : > { %v833_v3 = vld [vmem:[%s820_s26] sm:$0xf] }
 0x5f4   : > { %v1545_v6 = vpop.trf.xlu1 }
 0x618   : > { %v1513_v59 = vpop.trf.xlu0 }
 0x648   : > { %v1577_v5 = vpop.trf.xlu0 }
 0x649   : > { %v1625_v9 = vcombine.low %v1513_v59, %v1577_v5  ;;  %v1626_v10 = vcombine.high %v1513_v59, %v1577_v5 }
 0x64b   : > { %v1633_v16 = vrot.slane %v1625_v9, %v4062_v8  ;;  %v1640_v17 = vrot.slane %v1626_v10, %v4062_v8 }
 0x64c   : > { %v1609_v11 = vpop.trf.xlu0 }
 0x64d   : > { %v1641_v12 = vcombine.low %v1545_v6, %v1609_v11  ;;  %v1642_v14 = vcombine.high %v1545_v6, %v1609_v11  ;;  %v3596_v11 = vld [vmem:[%s4322_s11] sm:$0xff]  }
 0x64e   : > { %3457 = vmatpush3.bf16.msra.mxu1 %v3596_v11 }
 0x64f   : > { %v1649_v18 = vrot.slane %v1641_v12, %v4062_v8  ;;  %v1656_v19 = vrot.slane %v1642_v14, %v4062_v8  ;;  %v3597_v12 = vld [vmem:[%s4322_s11 + $0x8] sm:$0xff]   ;;  %3458 = vmatprep.subr.bf16.mxu1 %v3718_v0  ;;  %v3302_v14 = vld [vmem:[%s4325_s14] ss:$0 sm:$0xff] }
 0x651   : > { %v1657_v20 = vcombine.low %v1633_v16, %v1649_v18  ;;  %v1658_v21 = vcombine.high %v1633_v16, %v1649_v18  ;;  %v1673_v22 = vcombine.low %v1640_v17, %v1656_v19  ;;  %v1674_v13 = vcombine.high %v1640_v17, %v1656_v19 }
 0x652   : > { %3459 = vmatpush3.bf16.msra.mxu1 %v3597_v12 }
 0x653   : > { %v1665_v24 = vrot.slane %v1657_v20, %v4064_v15  ;;  %v1672_v25 = vrot.slane %v1658_v21, %v4064_v15  ;;  %v1681_v26 = vrot.slane %v1673_v22, %v4064_v15  ;;  %v1688_v27 = vrot.slane %v1674_v13, %v4064_v15  ;;  %3472 = vmatprep.subr.bf16.mxu1 %v3718_v0 }
 0x655   : > { %v1693_v28 = vcombine.low %v1665_v24, %v1672_v25  ;;  %v3290_v29 = vcombine.high %v1665_v24, %v1672_v25  ;;  %v1709_v30 = vcombine.low %v1681_v26, %v1688_v27  ;;  %v3291_v31 = vcombine.high %v1681_v26, %v1688_v27  ;;  %v3297_v27 = vld [vmem:[%s4321_s10] ss:$0 sm:$0xff] }
 0x657   : > { %v1700_v33 = vrot.slane %v1693_v28, %v4062_v8  ;;  %v1708_v34 = vrot.slane %v3290_v29, %v4062_v8  ;;  %v1716_v35 = vrot.slane %v1709_v30, %v4062_v8  ;;  %v1724_v36 = vrot.slane %v3291_v31, %v4062_v8 }
 0x659   : > { %v1726_v37 = vcombine.high %v1700_v33, %v1708_v34  ;;  %v1742_v38 = vcombine.high %v1716_v35, %v1724_v36  ;;  %v1725_v39 = vcombine.low %v1700_v33, %v1708_v34  ;;  %v1741_v40 = vcombine.low %v1716_v35, %v1724_v36  ;;  %v3298_v34 = vld [vmem:[%s4323_s12] ss:$0 sm:$0xff] }
 0x65b   : > { %v1740_v41 = vrot.slane %v1726_v37, %v4064_v15  ;;  %v1756_v42 = vrot.slane %v1742_v38, %v4064_v15  ;;  %v1733_v43 = vrot.slane %v1725_v39, %v4064_v15  ;;  %v1749_v44 = vrot.slane %v1741_v40, %v4064_v15 }
 0x65d   : > { %v1759_v45 = vcombine.low %v1740_v41, %v1756_v42  ;;  %v1758_v46 = vcombine.high %v1733_v43, %v1749_v44  ;;  %v1757_v47 = vcombine.low %v1733_v43, %v1749_v44  ;;  %v1760_v48 = vcombine.high %v1740_v41, %v1756_v42 }
 0x65f   : > { %1766 = vrot.lane.b32.xlu0 %v1759_v45, %s4343_s4  ;;  %1762 = vrot.lane.b32.xlu1 %v1758_v46, %s4342_s0  ;;  %s4374_s4 = sld [smem:[#allocation17_spill]] }
 0x663   : > { %1770 = vrot.lane.b32.xlu1 %v1760_v48, %s4341_s30  ;;  %s4377_s30 = smov 16  }
 0x665   : > { %v3296_v25 = vld [vmem:[%s4374_s4] ss:$0 sm:$0xff] }
 0x6d1   : > { %v1763_v49 = vpop.permute.xlu1 %1762  ;;  %v1767_v50 = vpop.permute.xlu0 %1766 }
 0x6d2   : > { %v1773_v51 = vsel %vm995_vm3, %v1757_v47, %v1763_v49 }
 0x6d3   : > { %v1775_v53 = vsel %vm1774_vm4, %v1773_v51, %v1767_v50 }
 0x6d5   : > { %v1771_v52 = vpop.permute.xlu1 %1770 }
 0x6d6   : > { %v1777_v54 = vsel %vm1776_vm5, %v1775_v53, %v1771_v52 }
 0x6d7   : > { %v1778_v55 = vpack.c.bf16 %v1777_v54, %v1777_v54 }
 0x6d9   : > { %3453 = vmatmul.mubr.msk.bf16.vlgmr.msra.gmra.mrb[20].mxu0 %vm867_vm1, %v1778_v55 }
 0x6da   : > { %3468 = vmatprep.mubr.msk.bf16.mxu0 %vm3719_vm0, %v3718_v0  ;;  %3465 = vmatpush3.bf16.msra.mxu0 %v3594_v2 }
 0x6db   : > { %3466 = vmatprep.subr.bf16.mxu0 %v3718_v0 }
 0x6de   : > { %3467 = vmatpush3.bf16.msra.mxu0 %v3595_v4 }
 0x6df   : > { %3478 = vmatprep.subr.bf16.mxu0 %v3718_v0 }
 0x6e1   : > { %3469 = vmatmul.mubr.msk.bf16.vlgmr.msra.gmra.mrb[24].mxu0 %vm867_vm1, %v833_v3 }
 0x6e2   : > { %3480 = vmatprep.mubr.msk.bf16.mxu0 %vm3719_vm0, %v3718_v0 }
 0x7ac   : > { %v1839_v58 = vpop.f32.mrb[20].mxu0 }
 0x7ad   : > { %v1840_v59 = vadd.f32 %v3292_v56, %v1839_v58  ;;  %v3454_v60 = vpop.f32.mrb[21].mxu0 }
 0x7ae   : > { %v1842_v61 = vpop.f32.mrb[22].mxu0 }
 0x7af   : > { %v3455_v62 = vpop.f32.mrb[23].mxu0  ;;  %v1846_v63 = vadd.f32 %v1845_v57, %v1840_v59 }
 0x7b1   : > { %v1849_v1 = vsel %vm867_vm1, %v1846_v63, 0.0 }
 0x7b2   : > { %1850 = vadd.xlane.f32.xlu1 %v1849_v1 }
 0x7b4   : > { %v2005_v16 = vpop.f32.mrb[24].mxu0 }
 0x7b5   : > { %v2006_v17 = vadd.f32 %v3302_v14, %v2005_v16  ;;  %v3470_v18 = vpop.f32.mrb[25].mxu0 }
 0x7b6   : > { %v2008_v19 = vpop.f32.mrb[26].mxu0 }
 0x7b7   : > { %v4131_v20 = vpack.c.bf16 %v2006_v17, %v2006_v17  ;;  %v3471_v21 = vpop.f32.mrb[27].mxu0 }
 0x7c3   : > { %2020 = vrot.lane.b32.xlu1 %v4131_v20, %s3721_s1 }
 0x7c7   : > { %2026 = vrot.lane.b32.xlu1 %v4131_v20, %s4373_s8 }
 0x83f   : > { %v1851_v5 = vpop.xlane.xlu1 %1850 }
 0x840   : > { %v1853_v6 = vmul.f32 0.03125, %v1851_v5 }
 0x842   : > { %v1854_v7 = vsub.f32 %v1846_v63, %v1853_v6 }
 0x843   : > { %v4166_v41 = vpop.permute.xlu1 %2020 }
 0x844   : > { %v1855_v9 = vmul.f32 %v1854_v7, %v1854_v7 }
 0x846   : > { %v1856_v10 = vsel %vm867_vm1, %v1855_v9, 0.0 }
 0x847   : > { %1857 = vadd.xlane.f32.xlu0 %v1856_v10  ;;  %v4169_v42 = vpop.permute.xlu1 %2026 }
 0x85d   : > { %2023 = vrot.lane.b32.xlu0 %v4131_v20, %s3723_s5 }
 0x87b   : > { %2029 = vxpose.xlu0.c.b16.start.end [1/1] (short) (narrow) %v4131_v20, 16 }
 0x8d4   : > { %v1858_v22 = vpop.xlane.xlu0 %1857 }
 0x8d5   : > { %v1859_v13 = vmul.f32 0.03125, %v1858_v22 }
 0x8d7   : > { %v1860_v23 = vadd.f32 1e-05, %v1859_v13 }
 0x8d8   : > { %v4153_v31 = vpop.permute.xlu0 %2023 }
 0x8d9   : > { %3622 = vrsqrt.f32 %v1860_v23 }
 0x8e1   : > { %v2037_v32 = vpop.trf.xlu0 }
 0x8e2   : > { %v2097_v33 = vsel %vm999_vm2, %v2037_v32, 0 }
 0x8e3   : > { %v3623_v24 = vpop.eup %3622 }
 0x8e4   : > { %v1862_v26 = vmul.f32 %v3623_v24, %v1854_v7 }
 0x8e6   : > { %v1869_v28 = vmul.f32 %v3296_v25, %v1862_v26 }
 0x8e8   : > { %v4146_v29 = vadd.f32 %v3297_v27, %v1869_v28 }
 0x8ea   : > { %v1877_v30 = vpack.c.bf16 %v4146_v29, %v4146_v29 }
 0x8ec   : > { %3461 = vmatmul.mubr.msk.bf16.vlgmr.msra.gmra.mrb[16].mxu1 %vm867_vm1, %v1877_v30 }
 0x8ed   : > { %3474 = vmatprep.mubr.msk.bf16.mxu1 %vm3719_vm0, %v3718_v0  ;;  %3473 = vmatpush3.bf16.msra.mxu1 %v2097_v33 }
 0x8ee   : > { %3484 = vmatprep.subr.bf16.mxu1 %v3718_v0 }
 0x9bf   : > { %v1938_v35 = vpop.f32.mrb[16].mxu1 }
 0x9c0   : > { %v1939_v36 = vadd.f32 %v3298_v34, %v1938_v35  ;;  %v3462_v37 = vpop.f32.mrb[17].mxu1 }
 0x9c1   : > { %v1941_v38 = vpop.f32.mrb[18].mxu1 }
 0x9c2   : > { %v1944_v39 = vpack.c.bf16 %v1939_v36, %v1939_v36  ;;  %v3463_v40 = vpop.f32.mrb[19].mxu1 }
 0x9c4   : > { %2015 = vrot.lane.b32.xlu0 %v1944_v39, %s3723_s5  ;;  %3475 = vmatmul.mubr.msk.bf16.vlgmr.msra.gmra.mrb[20].mxu1 %vm995_vm3, %v1944_v39 }
 0x9c5   : > { %2013 = vrot.lane.b32.xlu1 %v1944_v39, %s3721_s1  ;;  %3486 = vmatprep.mubr.msk.bf16.mxu1 %vm3719_vm0, %v3718_v0  ;;  %s4379_s1 = smov 24  }
 0x9c9   : > { %2017 = vrot.lane.b32.xlu1 %v1944_v39, %s4373_s8  ;;  %s4375_s8 = sld [smem:[#allocation12_spill]] }
 0x9cf   : > { %s826_s27 = scalar_lea.vmem %s4375_s8, %s4381_s2  ;;  %s4376_s2 = smov 96  }
 0x9d0   : > { %v3310_v53 = vld [vmem:[%s826_s27] ss:$0 sm:$0xff]  ;;  %s830_s27 = scalar_lea.vmem %s4336_s25, %s3954_s6 }
 0x9e2   : > { %2061 = vxpose.xlu0.c.b16.start.end [1/1] (short) (narrow) %v4153_v31, 16 }
 0x9e6   : > { %2077 = vxpose.xlu0.c.b16.start.end [1/1] (short) (narrow) %v4169_v42, 16 }
 0x9ec   : > { %2045 = vxpose.xlu1.c.b16.start.end [1/1] (short) (narrow) %v4166_v41, 16 }
 0xa36   : > { %v2016_v43 = vpop.permute.xlu0 %2015 }
 0xa37   : > { %v2014_v44 = vpop.permute.xlu1 %2013 }
 0xa3b   : > { %v2018_v47 = vpop.permute.xlu1 %2017 }
 0xa48   : > { %v2069_v45 = vpop.trf.xlu0 }
 0xa49   : > { %v2189_v46 = vsel %vm999_vm2, %v2069_v45, 0 }
 0xa4a   : > { %3485 = vmatpush3.bf16.msra.mxu1 %v2189_v46 }
 0xa4b   : > { %3496 = vmatprep.subr.bf16.mxu1 %v3718_v0 }
 0xa4c   : > { %v2085_v49 = vpop.trf.xlu0 }
 0xa4d   : > { %3487 = vmatmul.mubr.msk.bf16.vlgmr.msra.gmra.mrb[24].mxu1 %vm995_vm3, %v2016_v43  ;;  %v2235_v51 = vsel %vm999_vm2, %v2085_v49, 0 }
 0xa4e   : > { %3498 = vmatprep.mubr.msk.bf16.mxu1 %vm3719_vm0, %v3718_v0 }
 0xa52   : > { %v2053_v48 = vpop.trf.xlu1 }
 0xa53   : > { %v2143_v50 = vsel %vm999_vm2, %v2053_v48, 0 }
 0xa54   : > { %3479 = vmatpush3.bf16.msra.mxu0 %v2143_v50 }
 0xa55   : > { %3490 = vmatprep.subr.bf16.mxu0 %v3718_v0 }
 0xa57   : > { %3481 = vmatmul.mubr.msk.bf16.vlgmr.msra.gmra.mrb[28].mxu0 %vm995_vm3, %v2014_v44 }
 0xa58   : > { %3491 = vmatpush3.bf16.msra.mxu0 %v2235_v51  ;;  %3492 = vmatprep.mubr.msk.bf16.mxu0 %vm3719_vm0, %v3718_v0 }
 0xa59   : > { %3502 = vmatprep.subr.bf16.mxu0 %v3718_v0 }
 0xa5f   : > { %3493 = vmatmul.mubr.msk.bf16.vlgmr.msra.gmra.mrb[32].mxu0 %vm995_vm3, %v2018_v47 }
 0xa60   : > { %3504 = vmatprep.mubr.msk.bf16.mxu0 %vm3719_vm0, %v3718_v0 }
 0xa97   : > { %v2133_v52 = vpop.f32.mrb[20].mxu1 }
 0xa98   : > { %v2277_v54 = vmul.f32 0.35355338, %v2133_v52  ;;  %v3476_v55 = vpop.f32.mrb[21].mxu1 }
 0xa99   : > { %v2136_v56 = vpop.f32.mrb[22].mxu1 }
 0xa9a   : > { %v3477_v57 = vpop.f32.mrb[23].mxu1  ;;  %v2287_v58 = vadd.f32 %v3310_v53, %v2277_v54 }
 0xa9c   : > { %v2291_v59 = vsel %vm995_vm3, %v2287_v58, -inf }
 0xa9d   : > { %2292 = vmax.xlane.f32.xlu1 %v2291_v59 }
 0xb20   : > { %v2225_v60 = vpop.f32.mrb[24].mxu1 }
 0xb21   : > { %v2279_v61 = vmul.f32 0.35355338, %v2225_v60  ;;  %v3488_v62 = vpop.f32.mrb[25].mxu1 }
 0xb22   : > { %v2228_v63 = vpop.f32.mrb[26].mxu1 }
 0xb23   : > { %v3489_v1 = vpop.f32.mrb[27].mxu1  ;;  %v2289_v2 = vadd.f32 %v3310_v53, %v2279_v61 }
 0xb25   : > { %v2297_v4 = vsel %vm995_vm3, %v2289_v2, -inf }
 0xb26   : > { %2298 = vmax.xlane.f32.xlu1 %v2297_v4 }
 0xb2a   : > { %v2179_v3 = vpop.f32.mrb[28].mxu0  ;;  %v2293_v22 = vpop.xlane.xlu1 %2292 }
 0xb2b   : > { %v2278_v5 = vmul.f32 0.35355338, %v2179_v3  ;;  %v3482_v6 = vpop.f32.mrb[29].mxu0  ;;  %v2303_v13 = vsub.f32 %v2287_v58, %v2293_v22 }
 0xb2c   : > { %v2182_v7 = vpop.f32.mrb[30].mxu0 }
 0xb2d   : > { %v3483_v9 = vpop.f32.mrb[31].mxu0  ;;  %v2288_v10 = vadd.f32 %v3310_v53, %v2278_v5  ;;  %v2307_v23 = vmul.f32 1.442695, %v2303_v13 }
 0xb2f   : > { %v2294_v11 = vsel %vm995_vm3, %v2288_v10, -inf  ;;  %3624 = vpow2.f32 %v2307_v23 }
 0xb30   : > { %2295 = vmax.xlane.f32.xlu0 %v2294_v11 }
 0xb32   : > { %v2271_v12 = vpop.f32.mrb[32].mxu0 }
 0xb33   : > { %v2280_v14 = vmul.f32 0.35355338, %v2271_v12  ;;  %v3494_v16 = vpop.f32.mrb[33].mxu0 }
 0xb34   : > { %v2274_v17 = vpop.f32.mrb[34].mxu0 }
 0xb35   : > { %v3495_v18 = vpop.f32.mrb[35].mxu0  ;;  %v2290_v19 = vadd.f32 %v3310_v53, %v2280_v14 }
 0xb37   : > { %2339 = vrot.lane.b32.xlu1 %v4131_v20, %s4376_s2  ;;  %v2300_v21 = vsel %vm995_vm3, %v2290_v19, -inf }
 0xb38   : > { %2301 = vmax.xlane.f32.xlu0 %v2300_v21 }
 0xb39   : > { %v3625_v24 = vpop.eup %3624 }
 0xb3a   : > { %v2315_v25 = vsel %vm995_vm3, %v3625_v24, 0.0 }
 0xb4e   : > { %2341 = vrot.lane.b32.xlu0 %v4166_v41, %s4376_s2 }
 0xb5b   : > { %2316 = vadd.xlane.f32.xlu1 %v2315_v25 }
 0xb6c   : > { %2343 = vrot.lane.b32.xlu1 %v4153_v31, %s4376_s2 }
 0xbb3   : > { %v2299_v26 = vpop.xlane.xlu1 %2298 }
 0xbb4   : > { %v2305_v27 = vsub.f32 %v2289_v2, %v2299_v26 }
 0xbb6   : > { %v2311_v20 = vmul.f32 1.442695, %v2305_v27 }
 0xbb7   : > { %v2340_v37 = vpop.permute.xlu1 %2339 }
 0xbb8   : > { %3626 = vpow2.f32 %v2311_v20 }
 0xbbd   : > { %v2296_v28 = vpop.xlane.xlu0 %2295 }
 0xbbe   : > { %v2304_v30 = vsub.f32 %v2288_v10, %v2296_v28 }
 0xbc0   : > { %v2309_v32 = vmul.f32 1.442695, %v2304_v30 }
 0xbc2   : > { %v3627_v33 = vpop.eup %3626  ;;  %3628 = vpow2.f32 %v2309_v32 }
 0xbc3   : > { %v2321_v34 = vsel %vm995_vm3, %v3627_v33, 0.0 }
 0xbc4   : > { %2322 = vadd.xlane.f32.xlu1 %v2321_v34 }
 0xbc5   : > { %v2302_v38 = vpop.xlane.xlu0 %2301 }
 0xbc6   : > { %v2306_v39 = vsub.f32 %v2290_v19, %v2302_v38 }
 0xbc8   : > { %v2313_v40 = vmul.f32 1.442695, %v2306_v39 }
 0xbc9   : > { %v2342_v48 = vpop.permute.xlu0 %2341 }
 0xbcc   : > { %v3629_v35 = vpop.eup %3628 }
 0xbcd   : > { %v2318_v36 = vsel %vm995_vm3, %v3629_v35, 0.0 }
 0xbce   : > { %2319 = vadd.xlane.f32.xlu0 %v2318_v36 }
 0xbe4   : > { %2345 = vrot.lane.b32.xlu0 %v4169_v42, %s4376_s2 }
 0xbe8   : > { %v2317_v31 = vpop.xlane.xlu1 %2316 }
 0xbe9   : > { %3630 = vrcp.f32 %v2317_v31  ;;  %v3598_v31 = vld [vmem:[%s4326_s15] sm:$0xff]  }
 0xbea   : > { %3632 = vpow2.f32 %v2313_v40 }
 0xbec   : > { %v2344_v43 = vpop.permute.xlu1 %2343 }
 0xbf1   : > { %2351 = vxpose.xlu1.c.b16.start.end [1/1] (short) (narrow) %v2340_v37, 16 }
 0xbf3   : > { %v3631_v41 = vpop.eup %3630 }
 0xbf4   : > { %v2331_v44 = vmul.f32 %v3631_v41, %v3625_v24  ;;  %v3633_v47 = vpop.eup %3632 }
 0xbf5   : > { %2383 = vxpose.xlu1.c.b16.start.end [1/1] (short) (narrow) %v2344_v43, 16  ;;  %v2324_v42 = vsel %vm995_vm3, %v3633_v47, 0.0 }
 0xbf6   : > { %v2335_v45 = vpack.c.bf16 %v2331_v44, %v2331_v44 }
 0xbf8   : > { %v2419_v46 = vsel %vm995_vm3, %v2335_v45, 0 }
 0xbf9   : > { %3497 = vmatpush3.bf16.xpose.msra.mxu1 %v2419_v46 }
 0xbfa   : > { %3508 = vmatprep.subr.bf16.mxu1 %v3718_v0 }
 0xc03   : > { %2325 = vadd.xlane.f32.xlu0 %v2324_v42 }
 0xc30   : > { %2367 = vxpose.xlu0.c.b16.start.end [1/1] (short) (narrow) %v2342_v48, 16 }
 0xc51   : > { %v2323_v49 = vpop.xlane.xlu1 %2322 }
 0xc52   : > { %3634 = vrcp.f32 %v2323_v49 }
 0xc57   : > { %v2359_v50 = vpop.trf.xlu1 }
 0xc58   : > { %3499 = vmatmul.mubr.msk.bf16.vlgmr.msra.gmra.mrb[28].mxu1 %vm995_vm3, %v2359_v50 }
 0xc59   : > { %3510 = vmatprep.mubr.msk.bf16.mxu1 %vm3719_vm0, %v3718_v0 }
 0xc5b   : > { %v2320_v51 = vpop.xlane.xlu0 %2319  ;;  %v2391_v58 = vpop.trf.xlu1 }
 0xc5c   : > { %v3635_v52 = vpop.eup %3634  ;;  %3636 = vrcp.f32 %v2320_v51 }
 0xc5d   : > { %v2333_v53 = vmul.f32 %v3635_v52, %v3627_v33 }
 0xc5f   : > { %v2346_v54 = vpop.permute.xlu0 %2345  ;;  %v2337_v55 = vpack.c.bf16 %v2333_v53, %v2333_v53 }
 0xc60   : > { %2399 = vxpose.xlu0.c.b16.start.end [1/1] (short) (narrow) %v2346_v54, 16 }
 0xc61   : > { %v2511_v56 = vsel %vm995_vm3, %v2337_v55, 0 }
 0xc62   : > { %3509 = vmatpush3.bf16.xpose.msra.mxu1 %v2511_v56 }
 0xc63   : > { %3520 = vmatprep.subr.bf16.mxu1 %v3718_v0 }
 0xc66   : > { %v3637_v57 = vpop.eup %3636 }
 0xc67   : > { %v2332_v59 = vmul.f32 %v3637_v57, %v3629_v35 }
 0xc69   : > { %v2336_v60 = vpack.c.bf16 %v2332_v59, %v2332_v59  ;;  %3511 = vmatmul.mubr.msk.bf16.vlgmr.msra.gmra.mrb[32].mxu1 %vm995_vm3, %v2391_v58 }
 0xc6a   : > { %3524 = vmatprep.mubr.msk.bf16.mxu1 %vm3719_vm0, %v3718_v0  ;;  %3521 = vmatpush3.bf16.msra.mxu1 %v3598_v31 }
 0xc6b   : > { %v2465_v61 = vsel %vm995_vm3, %v2336_v60, 0  ;;  %3522 = vmatprep.subr.bf16.mxu1 %v3718_v0 }
 0xc6c   : > { %3503 = vmatpush3.bf16.xpose.msra.mxu0 %v2465_v61 }
 0xc6d   : > { %3514 = vmatprep.subr.bf16.mxu0 %v3718_v0 }
 0xc90   : > { %v2326_v62 = vpop.xlane.xlu0 %2325 }
 0xc91   : > { %3638 = vrcp.f32 %v2326_v62 }
 0xc96   : > { %v2375_v63 = vpop.trf.xlu0 }
 0xc97   : > { %3505 = vmatmul.mubr.msk.bf16.vlgmr.msra.gmra.mrb[36].mxu0 %vm995_vm3, %v2375_v63 }
 0xc98   : > { %3516 = vmatprep.mubr.msk.bf16.mxu0 %vm3719_vm0, %v3718_v0 }
 0xc9b   : > { %v3639_v1 = vpop.eup %3638 }
 0xc9c   : > { %v2334_v2 = vmul.f32 %v3639_v1, %v3633_v47  ;;  %v3599_v47 = vld [vmem:[%s4326_s15 + $0x8] sm:$0xff]  }
 0xc9d   : > { %3523 = vmatpush3.bf16.msra.mxu1 %v3599_v47 }
 0xc9e   : > { %v2338_v4 = vpack.c.bf16 %v2334_v2, %v2334_v2  ;;  %3536 = vmatprep.subr.bf16.mxu1 %v3718_v0 }
 0xca0   : > { %v2557_v3 = vsel %vm995_vm3, %v2338_v4, 0 }
 0xca1   : > { %3515 = vmatpush3.bf16.xpose.msra.mxu0 %v2557_v3 }
 0xca2   : > { %3528 = vmatprep.subr.bf16.mxu0 %v3718_v0 }
 0xcc6   : > { %v2407_v5 = vpop.trf.xlu0 }
 0xcc7   : > { %3517 = vmatmul.mubr.msk.bf16.vlgmr.msra.gmra.mrb[40].mxu0 %vm995_vm3, %v2407_v5 }
 0xcc8   : > { %3532 = vmatprep.mubr.msk.bf16.mxu0 %vm3719_vm0, %v3718_v0 }
 0xd2b   : > { %v2455_v6 = vpop.f32.mrb[28].mxu1 }
 0xd2c   : > { %v3500_v7 = vpop.f32.mrb[29].mxu1  ;;  %2599 = vxpose.xlu1.b32.start.end [1/1] (short) (narrow) %v2455_v6, 8 }
 0xd2d   : > { %v2458_v9 = vpop.f32.mrb[30].mxu1 }
 0xd2e   : > { %v3501_v10 = vpop.f32.mrb[31].mxu1 }
 0xd2f   : > { %v3317_v10 = vld [vmem:[%s4327_s16] ss:$0 sm:$0xff] }
 0xd3c   : > { %v2547_v11 = vpop.f32.mrb[32].mxu1 }
 0xd3d   : > { %v3512_v12 = vpop.f32.mrb[33].mxu1 }
 0xd3e   : > { %v2550_v14 = vpop.f32.mrb[34].mxu1 }
 0xd3f   : > { %v3513_v16 = vpop.f32.mrb[35].mxu1 }
 0xd6a   : > { %v2501_v17 = vpop.f32.mrb[36].mxu0 }
 0xd6b   : > { %v3506_v18 = vpop.f32.mrb[37].mxu0  ;;  %2631 = vxpose.xlu0.b32.start.end [1/1] (short) (narrow) %v2501_v17, 8 }
 0xd6c   : > { %v2504_v19 = vpop.f32.mrb[38].mxu0 }
 0xd6d   : > { %v3507_v21 = vpop.f32.mrb[39].mxu0 }
 0xd6f   : > { %2663 = vxpose.xlu0.b32.start.end [1/1] (short) (narrow) %v2547_v11, 8 }
 0xd9a   : > { %v2593_v22 = vpop.f32.mrb[40].mxu0 }
 0xd9b   : > { %2695 = vxpose.xlu1.b32.start.end [1/1] (short) (narrow) %v2593_v22, 8  ;;  %v3518_v13 = vpop.f32.mrb[41].mxu0 }
 0xd9c   : > { %v2596_v23 = vpop.f32.mrb[42].mxu0 }
 0xd9d   : > { %v3519_v24 = vpop.f32.mrb[43].mxu0 }
 0xdac   : > { %v2615_v26 = vpop.trf.xlu1 }
 0xdeb   : > { %v2647_v25 = vpop.trf.xlu0 }
 0xdef   : > { %v2679_v27 = vpop.trf.xlu0 }
 0xdf0   : > { %v2727_v20 = vcombine.low %v2615_v26, %v2679_v27  ;;  %v2728_v28 = vcombine.high %v2615_v26, %v2679_v27  ;;  %v3602_v26 = vld [vmem:[%s4332_s21] sm:$0xff]   ;;  %v3603_v27 = vld [vmem:[%s4332_s21 + $0x8] sm:$0xff]  }
 0xdf2   : > { %v2735_v34 = vrot.slane %v2727_v20, %v4062_v8  ;;  %v2742_v35 = vrot.slane %v2728_v28, %v4062_v8 }
 0xe1b   : > { %v2711_v30 = vpop.trf.xlu1 }
 0xe1c   : > { %v2743_v32 = vcombine.low %v2647_v25, %v2711_v30  ;;  %v2744_v33 = vcombine.high %v2647_v25, %v2711_v30  ;;  %v3600_v25 = vld [vmem:[%s4330_s19] sm:$0xff]  }
 0xe1d   : > { %3529 = vmatpush3.bf16.msra.mxu0 %v3600_v25 }
 0xe1e   : > { %v2751_v36 = vrot.slane %v2743_v32, %v4062_v8  ;;  %v2758_v37 = vrot.slane %v2744_v33, %v4062_v8  ;;  %3530 = vmatprep.subr.bf16.mxu0 %v3718_v0  ;;  %v3321_v33 = vld [vmem:[%s4328_s17] ss:$0 sm:$0xff] }
 0xe20   : > { %v2759_v38 = vcombine.low %v2735_v34, %v2751_v36  ;;  %v2760_v39 = vcombine.high %v2735_v34, %v2751_v36  ;;  %v2775_v40 = vcombine.low %v2742_v35, %v2758_v37  ;;  %v2776_v41 = vcombine.high %v2742_v35, %v2758_v37  ;;  %v3322_v35 = vld [vmem:[%s4329_s18] ss:$0 sm:$0xff] }
 0xe22   : > { %v2767_v43 = vrot.slane %v2759_v38, %v4064_v15  ;;  %v2774_v44 = vrot.slane %v2760_v39, %v4064_v15  ;;  %v2783_v45 = vrot.slane %v2775_v40, %v4064_v15  ;;  %v2790_v46 = vrot.slane %v2776_v41, %v4064_v15  ;;  %v3604_v38 = vld [vmem:[%s4332_s21 + $0x10] sm:$0xff]   ;;  %v3605_v39 = vld [vmem:[%s4332_s21 + $0x18] sm:$0xff]   ;;  %v3323_v40 = vld [vmem:[%s4331_s20] ss:$0 sm:$0xff] }
 0xe24   : > { %v2795_v42 = vcombine.low %v2767_v43, %v2774_v44  ;;  %v3315_v48 = vcombine.high %v2767_v43, %v2774_v44  ;;  %v2811_v49 = vcombine.low %v2783_v45, %v2790_v46  ;;  %v3316_v50 = vcombine.high %v2783_v45, %v2790_v46 }
 0xe26   : > { %v2802_v51 = vrot.slane %v2795_v42, %v4062_v8  ;;  %v2810_v52 = vrot.slane %v3315_v48, %v4062_v8  ;;  %v2818_v53 = vrot.slane %v2811_v49, %v4062_v8  ;;  %v2826_v54 = vrot.slane %v3316_v50, %v4062_v8 }
 0xe28   : > { %v2828_v55 = vcombine.high %v2802_v51, %v2810_v52  ;;  %v2844_v56 = vcombine.high %v2818_v53, %v2826_v54  ;;  %v2827_v57 = vcombine.low %v2802_v51, %v2810_v52  ;;  %v2843_v58 = vcombine.low %v2818_v53, %v2826_v54 }
 0xe2a   : > { %v2842_v59 = vrot.slane %v2828_v55, %v4064_v15  ;;  %v2858_v60 = vrot.slane %v2844_v56, %v4064_v15  ;;  %v2835_v61 = vrot.slane %v2827_v57, %v4064_v15  ;;  %v2851_v62 = vrot.slane %v2843_v58, %v4064_v15 }
 0xe2c   : > { %v2861_v63 = vcombine.low %v2842_v59, %v2858_v60  ;;  %v2860_v1 = vcombine.high %v2835_v61, %v2851_v62  ;;  %v2859_v2 = vcombine.low %v2835_v61, %v2851_v62  ;;  %v2862_v8 = vcombine.high %v2842_v59, %v2858_v60 }
 0xe2e   : > { %2868 = vrot.lane.b32.xlu1 %v2861_v63, %s4377_s30  ;;  %2864 = vrot.lane.b32.xlu0 %v2860_v1, %s4378_s3  ;;  %v3333_v1 = vld [vmem:[#allocation2] ss:$0 sm:$0xff] }
 0xe32   : > { %2872 = vrot.lane.b32.xlu1 %v2862_v8, %s4379_s1  ;;  %v3334_v8 = vld [vmem:[#allocation4] ss:$0 sm:$0xff] }
 0xea0   : > { %v2869_v4 = vpop.permute.xlu1 %2868  ;;  %v2865_v3 = vpop.permute.xlu0 %2864 }
 0xea1   : > { %v2875_v5 = vsel %vm995_vm3, %v2859_v2, %v2865_v3 }
 0xea2   : > { %v2876_v7 = vsel %vm1774_vm4, %v2875_v5, %v2869_v4 }
 0xea4   : > { %v2873_v6 = vpop.permute.xlu1 %2872 }
 0xea5   : > { %v2877_v9 = vsel %vm1776_vm5, %v2876_v7, %v2873_v6 }
 0xea6   : > { %v2878_v15 = vpack.c.bf16 %v2877_v9, %v2877_v9 }
 0xea8   : > { %3525 = vmatmul.mubr.msk.bf16.vlgmr.msra.gmra.mrb[36].mxu1 %vm867_vm1, %v2878_v15 }
 0xea9   : > { %3544 = vmatprep.mubr.msk.bf16.mxu1 %vm3719_vm0, %v3718_v0  ;;  %3537 = vmatpush3.bf16.msra.mxu1 %v3602_v26 }
 0xeaa   : > { %3538 = vmatprep.subr.bf16.mxu1 %v3718_v0 }
 0xead   : > { %3539 = vmatpush3.bf16.msra.mxu1 %v3603_v27 }
 0xeae   : > { %3540 = vmatprep.subr.bf16.mxu1 %v3718_v0 }
 0xeb1   : > { %3541 = vmatpush3.bf16.msra.mxu1 %v3604_v38 }
 0xeb2   : > { %3542 = vmatprep.subr.bf16.mxu1 %v3718_v0  ;;  %v3327_v0 = vld [vmem:[%s4333_s22] ss:$0 sm:$0xff] }
 0xeb5   : > { %3543 = vmatpush3.bf16.msra.mxu1 %v3605_v39 }
 0xf7b   : > { %v2939_v11 = vpop.f32.mrb[36].mxu1 }
 0xf7c   : > { %v2940_v12 = vadd.f32 %v3317_v10, %v2939_v11  ;;  %v3526_v14 = vpop.f32.mrb[37].mxu1 }
 0xf7d   : > { %v2942_v16 = vpop.f32.mrb[38].mxu1 }
 0xf7e   : > { %v3527_v17 = vpop.f32.mrb[39].mxu1  ;;  %v2945_v18 = vadd.f32 %v2940_v12, %v4146_v29  ;;  %v3601_v29 = vld [vmem:[%s4330_s19 + $0x8] sm:$0xff]  }
 0xf7f   : > { %3531 = vmatpush3.bf16.msra.mxu0 %v3601_v29 }
 0xf80   : > { %v2948_v19 = vsel %vm867_vm1, %v2945_v18, 0.0 }
 0xf81   : > { %2949 = vadd.xlane.f32.xlu1 %v2948_v19 }
0x100e   : > { %v2950_v21 = vpop.xlane.xlu1 %2949 }
0x100f   : > { %v2951_v22 = vmul.f32 0.03125, %v2950_v21 }
0x1011   : > { %v2952_v13 = vsub.f32 %v2945_v18, %v2951_v22 }
0x1013   : > { %v2953_v23 = vmul.f32 %v2952_v13, %v2952_v13 }
0x1015   : > { %v2954_v24 = vsel %vm867_vm1, %v2953_v23, 0.0 }
0x1016   : > { %2955 = vadd.xlane.f32.xlu0 %v2954_v24 }
0x10a3   : > { %v2956_v20 = vpop.xlane.xlu0 %2955 }
0x10a4   : > { %v2957_v28 = vmul.f32 0.03125, %v2956_v20 }
0x10a6   : > { %v2958_v30 = vadd.f32 1e-05, %v2957_v28 }
0x10a8   : > { %3640 = vrsqrt.f32 %v2958_v30 }
0x10b2   : > { %v3641_v32 = vpop.eup %3640 }
0x10b3   : > { %v2960_v34 = vmul.f32 %v3641_v32, %v2952_v13 }
0x10b5   : > { %v2967_v36 = vmul.f32 %v3321_v33, %v2960_v34 }
0x10b7   : > { %v2974_v37 = vadd.f32 %v3322_v35, %v2967_v36 }
0x10b9   : > { %v2975_v31 = vpack.c.bf16 %v2974_v37, %v2974_v37 }
0x10bb   : > { %3533 = vmatmul.mubr.msk.bf16.vlgmr.msra.gmra.mrb[44].mxu0 %vm867_vm1, %v2975_v31 }
0x118e   : > { %v3036_v41 = vpop.f32.mrb[44].mxu0 }
0x118f   : > { %v3037_v43 = vadd.f32 %v3323_v40, %v3036_v41  ;;  %v3534_v44 = vpop.f32.mrb[45].mxu0 }
0x1190   : > { %v3039_v45 = vpop.f32.mrb[46].mxu0 }
0x1191   : > { %v3042_v46 = vmax.f32 %v3037_v43, 0.0  ;;  %v3535_v47 = vpop.f32.mrb[47].mxu0 }
0x1193   : > { %v3043_v42 = vpack.c.bf16 %v3042_v46, %v3042_v46 }
0x1195   : > { %3545 = vmatmul.mubr.msk.bf16.vlgmr.msra.gmra.mrb[40].mxu1 %vm3083_vm6, %v3043_v42 }
0x1268   : > { %v3121_v48 = vpop.f32.mrb[40].mxu1 }
0x1269   : > { %v3122_v49 = vadd.f32 %v3327_v0, %v3121_v48  ;;  %v3546_v50 = vpop.f32.mrb[41].mxu1 }
0x126a   : > { %v3124_v51 = vpop.f32.mrb[42].mxu1 }
0x126b   : > { %v3547_v52 = vpop.f32.mrb[43].mxu1  ;;  %v3127_v53 = vadd.f32 %v3122_v49, %v2974_v37 }
0x126d   : > { %v3130_v54 = vsel %vm867_vm1, %v3127_v53, 0.0 }
0x126e   : > { %3131 = vadd.xlane.f32.xlu0 %v3130_v54 }
0x12fb   : > { %v3132_v55 = vpop.xlane.xlu0 %3131 }
0x12fc   : > { %v3133_v56 = vmul.f32 0.03125, %v3132_v55 }
0x12fe   : > { %v3134_v57 = vsub.f32 %v3127_v53, %v3133_v56 }
0x1300   : > { %v3135_v58 = vmul.f32 %v3134_v57, %v3134_v57 }
0x1302   : > { %v3136_v59 = vsel %vm867_vm1, %v3135_v58, 0.0 }
0x1303   : > { %3137 = vadd.xlane.f32.xlu1 %v3136_v59 }
0x1390   : > { %v3138_v60 = vpop.xlane.xlu1 %3137 }
0x1391   : > { %v3139_v61 = vmul.f32 0.03125, %v3138_v60 }
0x1393   : > { %v3140_v62 = vadd.f32 1e-05, %v3139_v61 }
0x1395   : > { %3642 = vrsqrt.f32 %v3140_v62 }
0x139f   : > { %v3643_v63 = vpop.eup %3642 }
0x13a0   : > { %v3142_v2 = vmul.f32 %v3643_v63, %v3134_v57 }
0x13a2   : > { %v3149_v4 = vmul.f32 %v3333_v1, %v3142_v2 }
0x13a4   : > { %v3156_v3 = vadd.f32 %v3334_v8, %v3149_v4 }
0x13a6   : > { %v3157_v5 = vpack.c.bf16 %v3156_v3, %v3156_v3 }
0x13a8   : > { %3159 = vst.msk [vmem:[%s830_s27] sm:$0xf] %vm3158_vm7, %v3157_v5 }
0x13a9 PF: > { %s37_s29 = sadd.s32 1, %s3714_s29  }
0x13aa   : > { %p34_p5 = scmp.ge.s32.totalorder %s37_s29, 4  }
0x13ac   :  { %36 = sbr.rel (!%p34_p5) target bundleno = 13 (0xd), region = 168 }
0x13b3   :  { %3179 = vsyncpa [#allocation3], 1 }
0x13b4   :  { %3181 = vsyncpa [#allocation3 + $0x1], 1 }
0x13b5   :  { %3182 = vsyncpa [#allocation5], 1 }

// kernel: seq2seq_transformer_forward.9
= control target key start
LH: loop header
LB: loop body
LE: loop exit
PB: predicated region body
PF: predicated region fallthrough
CT: control target
= control target key end

     0   :  { %s3721_s29 = smov 0   ;;  %s4101_s0 = inlined_call_operand.vmem [shape: bf16[2,8,32], index: 0, kind: input, shape index: {}]   ;;  %s4102_s1 = inlined_call_operand.vmem [shape: bf16[2,8,32], index: 1, kind: input, shape index: {}]   ;;  %s4103_s2 = inlined_call_operand.vmem [shape: f32[8,8], index: 2, kind: input, shape index: {}]   ;;  %s4104_s3 = inlined_call_operand.vmem [shape: f32[2,1,8], index: 3, kind: input, shape index: {}]   ;;  %s4105_s4 = inlined_call_operand.vmem [shape: f32[2,1,8], index: 4, kind: input, shape index: {}]   ;;  %s4106_s5 = inlined_call_operand.vmem [shape: bf16[32,96], index: 5, kind: input, shape index: {}]   ;;  %s4107_s6 = inlined_call_operand.vmem [shape: f32[1,96], index: 6, kind: input, shape index: {}]   ;;  %s4108_s7 = inlined_call_operand.vmem [shape: bf16[32,32], index: 7, kind: input, shape index: {}]   ;;  %s4109_s8 = inlined_call_operand.vmem [shape: f32[1,32], index: 8, kind: input, shape index: {}]   ;;  %s4110_s9 = inlined_call_operand.vmem [shape: f32[1,32], index: 9, kind: input, shape index: {}]   ;;  %s4111_s10 = inlined_call_operand.vmem [shape: f32[1,32], index: 10, kind: input, shape index: {}]   ;;  %s4112_s11 = inlined_call_operand.vmem [shape: bf16[32,32], index: 11, kind: input, shape index: {}]   ;;  %s4113_s12 = inlined_call_operand.vmem [shape: f32[1,32], index: 12, kind: input, shape index: {}]   ;;  %s4114_s13 = inlined_call_operand.vmem [shape: bf16[32,64], index: 13, kind: input, shape index: {}]   ;;  %s4115_s14 = inlined_call_operand.vmem [shape: f32[1,64], index: 14, kind: input, shape index: {}]   ;;  %s4116_s15 = inlined_call_operand.vmem [shape: bf16[32,32], index: 15, kind: input, shape index: {}]   ;;  %s4117_s16 = inlined_call_operand.vmem [shape: f32[1,32], index: 16, kind: input, shape index: {}]   ;;  %s4118_s17 = inlined_call_operand.vmem [shape: f32[1,32], index: 17, kind: input, shape index: {}]   ;;  %s4119_s18 = inlined_call_operand.vmem [shape: f32[1,32], index: 18, kind: input, shape index: {}]   ;;  %s4120_s19 = inlined_call_operand.vmem [shape: bf16[32,64], index: 19, kind: input, shape index: {}]   ;;  %s4121_s20 = inlined_call_operand.vmem [shape: f32[1,64], index: 20, kind: input, shape index: {}]   ;;  %s4122_s21 = inlined_call_operand.vmem [shape: bf16[64,32], index: 21, kind: input, shape index: {}]   ;;  %s4123_s22 = inlined_call_operand.vmem [shape: f32[1,32], index: 22, kind: input, shape index: {}]   ;;  %s4124_s23 = inlined_call_operand.vmem [shape: f32[1,32], index: 23, kind: input, shape index: {}]   ;;  %s4125_s24 = inlined_call_operand.vmem [shape: f32[1,32], index: 24, kind: input, shape index: {}]   ;;  %s4126_s25 = inlined_call_operand.vmem [shape: bf16[2,8,32], index: 25, kind: output, shape index: {}]  }
   0x1   :  { %4136 = sst [smem:[#allocation2_spill]] %s4101_s0 }
   0x2   :  { %4137 = sst [smem:[#allocation3_spill]] %s4102_s1 }
   0x3   :  { %4138 = sst [smem:[#allocation4_spill]] %s4103_s2 }
   0x4   :  { %4139 = sst [smem:[#allocation5_spill]] %s4104_s3 }
   0x5   :  { %4140 = sst [smem:[#allocation6_spill]] %s4105_s4 }
   0x6   :  { %4141 = sst [smem:[#allocation7_spill]] %s4106_s5 }
   0x7   :  { %4142 = sst [smem:[#allocation8_spill]] %s4107_s6 }
   0x8   :  { %4143 = sst [smem:[#allocation9_spill]] %s4108_s7 }
   0x9   :  { %4144 = sst [smem:[#allocation10_spill]] %s4109_s8 }
   0xa   :  { %4145 = sst [smem:[#allocation11_spill]] %s4110_s9 }
   0xb LB: > { %s3217_s2 = sadd.s32 4294967295, %s3577_s29   ;;  %p3221_p0 = scmp.ge.s32.totalorder %s3577_s29, 1  ;;  %s3577_s29 = sphi %s3721_s29, %s35_s29  }
   0xc   : > { %p711_p1 = scmp.lt.s32.totalorder %s3577_s29, 3 }
   0xe   : > { %p712_p2 = pnand %p3221_p0, %p711_p1 }
   0xf   : > { %s4146_s7 = sld [smem:[#allocation7_spill]] (!%p712_p2)  ;;  %v3579_v1 = vmov (!%p712_p2), 0.0   ;;  %vm3580_vm0 = vmmov (!%p712_p2), 0   ;;  %p787_p3 = scmp.lt.s32.totalorder (!%p712_p2), %s3217_s2, 1  ;;  %vm841_vm1 = vcmask (!%p712_p2), 261120   ;;  %vm973_vm2 = vcmask (!%p712_p2), 1043456  }
  0x10   : > { %715 = sbr.rel (%p712_p2) target bundleno = 4971 (0x136b), region = 120  ;;  %3340 = vmatprep.subr.bf16.mxu0 (!%p712_p2), %v3579_v1  ;;  %3354 = vmatprep.subr.bf16.mxu1 (!%p712_p2), %v3579_v1  ;;  %s4147_s4 = sld [smem:[#allocation2_spill]] (!%p712_p2)  ;;  %vm969_vm3 = vcmask (!%p712_p2), 64512   ;;  %vm1748_vm4 = vcmask (!%p712_p2), 130048   ;;  %vm1750_vm5 = vcmask (!%p712_p2), 195584   ;;  %vm3057_vm6 = vcmask (!%p712_p2), 523264  }
  0x11   : > { %3344 = vmatprep.mubr.msk.bf16.mxu0 (!%p712_p2), %vm3580_vm0, %v3579_v1  ;;  %3356 = vmatprep.mubr.msk.bf16.mxu1 (!%p712_p2), %vm3580_vm0, %v3579_v1  ;;  %s4148_s0 = sld [smem:[#allocation8_spill]] (!%p712_p2)  ;;  %s4134_s6 = smov (!%p712_p2), 104   ;;  %vm3132_vm7 = vcmask (!%p712_p2), 257024  }
  0x12   : > { %s3582_s30 = smov (!%p712_p2), 120   ;;  %s4132_s3 = smov (!%p712_p2), 96  }
  0x13   : > { %s3584_s26 = smov (!%p712_p2), 112   ;;  %s3585_s8 = smov (!%p712_p2), 64  }
  0x14   : > { %s4129_s27 = smov (!%p712_p2), 24   ;;  %s4152_s5 = sld [smem:[#allocation10_spill]] (!%p712_p2) }
  0x15   : > { %v3517_v0 = vld [vmem:[%s4146_s7] sm:$0xff] (!%p712_p2)   ;;  %v3518_v2 = vld [vmem:[%s4146_s7 + $0x8] sm:$0xff] (!%p712_p2)   ;;  %s4154_s9 = smov (!%p712_p2), 104  }
  0x16   : > { %3341 = vmatpush3.bf16.msra.mxu0 (!%p712_p2), %v3517_v0 }
  0x17   : > { %3342 = vmatprep.subr.bf16.mxu0 %v3579_v1  ;;  %s4162_s2 = smov (!%p787_p3, %s3217_s2), 1  ;;  %v3226_v4 = vld [vmem:[%s4148_s0] ss:$0 sm:$0xff]  ;;  %s4150_s0 = sld [smem:[#allocation4_spill]] }
  0x18   : > { %s3745_s1 = sshll.u32 %s4162_s2, 2 }
  0x19   : > { %s790_s28 = scalar_lea.vmem %s4147_s4, %s3745_s1  ;;  %s4149_s4 = sld [smem:[#allocation5_spill]] }
  0x1a   : > { %3343 = vmatpush3.bf16.msra.mxu0 %v3518_v2  ;;  %v3752_v3 = vld [vmem:[%s790_s28] sm:$0xf] }
  0x1b   : > { %3348 = vmatprep.subr.bf16.mxu0 %v3579_v1 }
  0x1d   : > { %3345 = vmatmul.mubr.msk.bf16.vlgmr.msra.gmra.mrb[0].mxu0 %vm841_vm1, %v3752_v3  ;;  %v808_v26 = vld [vmem:[%s4150_s0] sm:$0xff]  ;;  %s4131_s0 = smov 16  }
  0x1e   : > { %3350 = vmatprep.mubr.msk.bf16.mxu0 %vm3580_vm0, %v3579_v1 }
  0x1f   : > { %s797_s28 = scalar_lea.vmem %s4149_s4, %s4162_s2  ;;  %s4159_s4 = smov 8  }
  0x20   : > { %v3225_v27 = vld [vmem:[%s797_s28] ss:$0 sm:$0xff]  ;;  %s4151_s28 = sld [smem:[#allocation9_spill]] }
  0x21   : > { %v816_v28 = vadd.f32 %v3225_v27, %v808_v26 }
  0xf0   : > { %v879_v5 = vpop.f32.mrb[0].mxu0 }
  0xf1   : > { %v880_v6 = vadd.f32 %v3226_v4, %v879_v5  ;;  %v3346_v7 = vpop.f32.mrb[1].mxu0 }
  0xf2   : > { %v882_v8 = vpop.f32.mrb[2].mxu0 }
  0xf3   : > { %v3761_v9 = vpack.c.bf16 %v880_v6, %v880_v6  ;;  %v3347_v10 = vpop.f32.mrb[3].mxu0 }
  0xf5   : > { %891 = vrot.lane.b32.xlu1 %v3761_v9, %s4134_s6  ;;  %887 = vrot.lane.b32.xlu0 %v3761_v9, %s3582_s30 }
  0xf9   : > { %893 = vrot.lane.b32.xlu1 %v3761_v9, %s4132_s3  ;;  %889 = vrot.lane.b32.xlu0 %v3761_v9, %s3584_s26 }
 0x167   : > { %v3771_v11 = vpop.permute.xlu0 %887  ;;  %v3775_v12 = vpop.permute.xlu1 %891 }
 0x168   : > { %895 = vrot.lane.b32.xlu0 %v3771_v11, %s4132_s3 }
 0x16b   : > { %v3777_v13 = vpop.permute.xlu0 %889  ;;  %v894_v14 = vpop.permute.xlu1 %893 }
 0x16c   : > { %899 = vrot.lane.b32.xlu0 %v3775_v12, %s4132_s3  ;;  %897 = vrot.lane.b32.xlu1 %v3777_v13, %s4132_s3 }
 0x18f   : > { %905 = vxpose.xlu1.c.b16.start.end [1/1] (short) (narrow) %v894_v14, 16 }
 0x1da   : > { %v896_v15 = vpop.permute.xlu0 %895 }
 0x1db   : > { %921 = vxpose.xlu0.c.b16.start.end [1/1] (short) (narrow) %v896_v15, 16 }
 0x1de   : > { %v898_v16 = vpop.permute.xlu1 %897  ;;  %v900_v17 = vpop.permute.xlu0 %899 }
 0x1df   : > { %937 = vxpose.xlu0.c.b16.start.end [1/1] (short) (narrow) %v898_v16, 16  ;;  %953 = vxpose.xlu1.c.b16.start.end [1/1] (short) (narrow) %v900_v17, 16 }
 0x1f5   : > { %v913_v18 = vpop.trf.xlu1 }
 0x1f6   : > { %v975_v19 = vsel %vm973_vm2, %v913_v18, 0 }
 0x1f7   : > { %3349 = vmatpush3.bf16.msra.mxu0 %v975_v19 }
 0x1f8   : > { %3360 = vmatprep.subr.bf16.mxu0 %v3579_v1 }
 0x1fa   : > { %3351 = vmatmul.mubr.msk.bf16.vlgmr.msra.gmra.mrb[4].mxu0 %vm969_vm3, %v3761_v9 }
 0x1fb   : > { %3362 = vmatprep.mubr.msk.bf16.mxu0 %vm3580_vm0, %v3579_v1 }
 0x241   : > { %v929_v20 = vpop.trf.xlu0 }
 0x242   : > { %v1021_v21 = vsel %vm973_vm2, %v929_v20, 0 }
 0x243   : > { %3355 = vmatpush3.bf16.msra.mxu1 %v1021_v21 }
 0x244   : > { %3366 = vmatprep.subr.bf16.mxu1 %v3579_v1 }
 0x245   : > { %v945_v22 = vpop.trf.xlu0  ;;  %v961_v23 = vpop.trf.xlu1 }
 0x246   : > { %v1067_v24 = vsel %vm973_vm2, %v945_v22, 0  ;;  %3357 = vmatmul.mubr.msk.bf16.vlgmr.msra.gmra.mrb[0].mxu1 %vm969_vm3, %v3771_v11  ;;  %v1113_v25 = vsel %vm973_vm2, %v961_v23, 0 }
 0x247   : > { %3361 = vmatpush3.bf16.msra.mxu0 %v1067_v24  ;;  %3367 = vmatpush3.bf16.msra.mxu1 %v1113_v25 }
 0x248   : > { %3368 = vmatprep.mubr.msk.bf16.mxu1 %vm3580_vm0, %v3579_v1  ;;  %3372 = vmatprep.subr.bf16.mxu0 %v3579_v1 }
 0x249   : > { %3378 = vmatprep.subr.bf16.mxu1 %v3579_v1 }
 0x24a   : > { %3363 = vmatmul.mubr.msk.bf16.vlgmr.msra.gmra.mrb[8].mxu0 %vm969_vm3, %v3777_v13 }
 0x24b   : > { %3374 = vmatprep.mubr.msk.bf16.mxu0 %vm3580_vm0, %v3579_v1 }
 0x24e   : > { %3369 = vmatmul.mubr.msk.bf16.vlgmr.msra.gmra.mrb[4].mxu1 %vm969_vm3, %v3775_v12 }
 0x24f   : > { %3380 = vmatprep.mubr.msk.bf16.mxu1 %vm3580_vm0, %v3579_v1 }
 0x2cd   : > { %v1011_v29 = vpop.f32.mrb[4].mxu0 }
 0x2ce   : > { %v1155_v30 = vmul.f32 0.35355338, %v1011_v29  ;;  %v3352_v31 = vpop.f32.mrb[5].mxu0 }
 0x2cf   : > { %v1014_v32 = vpop.f32.mrb[6].mxu0 }
 0x2d0   : > { %v3353_v33 = vpop.f32.mrb[7].mxu0  ;;  %v1159_v34 = vadd.f32 %v1155_v30, %v816_v28 }
 0x2d2   : > { %v1163_v35 = vsel %vm969_vm3, %v1159_v34, -inf }
 0x2d3   : > { %1164 = vmax.xlane.f32.xlu0 %v1163_v35 }
 0x319   : > { %v1057_v36 = vpop.f32.mrb[0].mxu1 }
 0x31a   : > { %v1156_v37 = vmul.f32 0.35355338, %v1057_v36  ;;  %v3358_v38 = vpop.f32.mrb[1].mxu1 }
 0x31b   : > { %v1060_v39 = vpop.f32.mrb[2].mxu1 }
 0x31c   : > { %v3359_v40 = vpop.f32.mrb[3].mxu1  ;;  %v1160_v41 = vadd.f32 %v1156_v37, %v816_v28 }
 0x31d   : > { %v1103_v42 = vpop.f32.mrb[8].mxu0 }
 0x31e   : > { %v1157_v43 = vmul.f32 0.35355338, %v1103_v42  ;;  %v3364_v44 = vpop.f32.mrb[9].mxu0  ;;  %v1166_v45 = vsel %vm969_vm3, %v1160_v41, -inf }
 0x31f   : > { %1167 = vmax.xlane.f32.xlu1 %v1166_v45  ;;  %v1106_v46 = vpop.f32.mrb[10].mxu0 }
 0x320   : > { %v3365_v47 = vpop.f32.mrb[11].mxu0  ;;  %v1161_v48 = vadd.f32 %v1157_v43, %v816_v28 }
 0x321   : > { %v1149_v49 = vpop.f32.mrb[4].mxu1 }
 0x322   : > { %v1158_v50 = vmul.f32 0.35355338, %v1149_v49  ;;  %v3370_v51 = vpop.f32.mrb[5].mxu1  ;;  %v1169_v52 = vsel %vm969_vm3, %v1161_v48, -inf }
 0x323   : > { %v1152_v53 = vpop.f32.mrb[6].mxu1  ;;  %1170 = vmax.xlane.f32.xlu0 %v1169_v52 }
 0x324   : > { %v3371_v54 = vpop.f32.mrb[7].mxu1  ;;  %v1162_v55 = vadd.f32 %v1158_v50, %v816_v28 }
 0x326   : > { %v1172_v56 = vsel %vm969_vm3, %v1162_v55, -inf }
 0x327   : > { %1173 = vmax.xlane.f32.xlu1 %v1172_v56 }
 0x338   : > { %1213 = vrot.lane.b32.xlu1 %v3771_v11, %s3585_s8 }
 0x339   : > { %1211 = vrot.lane.b32.xlu0 %v3761_v9, %s3585_s8 }
 0x360   : > { %v1165_v57 = vpop.xlane.xlu0 %1164 }
 0x361   : > { %v1175_v58 = vsub.f32 %v1159_v34, %v1165_v57 }
 0x363   : > { %v1179_v59 = vmul.f32 1.442695, %v1175_v58 }
 0x365   : > { %3533 = vpow2.f32 %v1179_v59 }
 0x36f   : > { %v3534_v60 = vpop.eup %3533 }
 0x370   : > { %v1187_v61 = vsel %vm969_vm3, %v3534_v60, 0.0 }
 0x371   : > { %1188 = vadd.xlane.f32.xlu1 %v1187_v61 }
 0x382   : > { %1217 = vrot.lane.b32.xlu1 %v3775_v12, %s3585_s8 }
 0x3ac   : > { %v1168_v62 = vpop.xlane.xlu1 %1167 }
 0x3ad   : > { %v1176_v63 = vsub.f32 %v1160_v41, %v1168_v62  ;;  %v1604_v62 = vlaneseq }
 0x3af   : > { %v1181_v0 = vmul.f32 1.442695, %v1176_v63  ;;  %v3587_v63 = vmov 1934713408  }
 0x3b0   : > { %v1171_v2 = vpop.xlane.xlu0 %1170 }
 0x3b1   : > { %3535 = vpow2.f32 %v1181_v0  ;;  %v1177_v4 = vsub.f32 %v1161_v48, %v1171_v2  ;;  %v1634_v0 = vunpack.c.l.s4 %v3587_v63 }
 0x3b3   : > { %v1183_v5 = vmul.f32 1.442695, %v1177_v4  ;;  %v1605_v4 = vshrl.u32 %v1604_v62, 7 }
 0x3b4   : > { %v1174_v10 = vpop.xlane.xlu1 %1173 }
 0x3b5   : > { %3537 = vpow2.f32 %v1183_v5  ;;  %v1178_v11 = vsub.f32 %v1162_v55, %v1174_v10 }
 0x3b7   : > { %v1185_v12 = vmul.f32 1.442695, %v1178_v11 }
 0x3b8   : > { %v1214_v14 = vpop.permute.xlu1 %1213 }
 0x3b9   : > { %3539 = vpow2.f32 %v1185_v12 }
 0x3bb   : > { %v3536_v6 = vpop.eup %3535 }
 0x3bc   : > { %v1190_v7 = vsel %vm969_vm3, %v3536_v6, 0.0 }
 0x3bd   : > { %1191 = vadd.xlane.f32.xlu0 %v1190_v7  ;;  %v1635_v7 = vunpack.c.0.s8 %v1634_v0 }
 0x3bf   : > { %v3538_v8 = vpop.eup %3537 }
 0x3c0   : > { %v1193_v9 = vsel %vm969_vm3, %v3538_v8, 0.0 }
 0x3c1   : > { %1194 = vadd.xlane.f32.xlu1 %v1193_v9 }
 0x3c3   : > { %v3540_v15 = vpop.eup %3539 }
 0x3c4   : > { %v1196_v16 = vsel %vm969_vm3, %v3540_v15, 0.0 }
 0x3d3   : > { %1215 = vrot.lane.b32.xlu0 %v3777_v13, %s3585_s8  ;;  %v1212_v13 = vpop.permute.xlu0 %1211  ;;  %s4130_s8 = smov 8  }
 0x3ee   : > { %1239 = vxpose.xlu1.c.b16.start.end [1/1] (short) (narrow) %v1214_v14, 16 }
 0x3f2   : > { %1197 = vadd.xlane.f32.xlu0 %v1196_v16 }
 0x3fe   : > { %v1189_v17 = vpop.xlane.xlu1 %1188 }
 0x3ff   : > { %3541 = vrcp.f32 %v1189_v17 }
 0x402   : > { %v1218_v18 = vpop.permute.xlu1 %1217 }
 0x403   : > { %1271 = vxpose.xlu1.c.b16.start.end [1/1] (short) (narrow) %v1218_v18, 16 }
 0x409   : > { %v3542_v19 = vpop.eup %3541 }
 0x40a   : > { %v1203_v20 = vmul.f32 %v3542_v19, %v3534_v60  ;;  %v3586_v60 = vmov 1983009808  }
 0x40b   : > { %v1602_v61 = vunpack.c.l.s4 %v3586_v60 }
 0x40c   : > { %v1207_v21 = vpack.c.bf16 %v1203_v20, %v1203_v20 }
 0x40d   : > { %v1603_v2 = vunpack.c.0.s8 %v1602_v61 }
 0x40e   : > { %v1291_v22 = vsel %vm969_vm3, %v1207_v21, 0 }
 0x40f   : > { %3373 = vmatpush3.bf16.xpose.msra.mxu0 %v1291_v22 }
 0x410   : > { %3384 = vmatprep.subr.bf16.mxu0 %v3579_v1 }
 0x41f   : > { %1223 = vxpose.xlu0.c.b16.start.end [1/1] (short) (narrow) %v1212_v13, 16 }
 0x44a   : > { %v1192_v23 = vpop.xlane.xlu0 %1191 }
 0x44b   : > { %3543 = vrcp.f32 %v1192_v23  ;;  %v3519_v23 = vld [vmem:[%s4151_s28] sm:$0xff]  }
 0x44e   : > { %v1216_v24 = vpop.permute.xlu0 %1215  ;;  %v1195_v29 = vpop.xlane.xlu1 %1194 }
 0x44f   : > { %1255 = vxpose.xlu0.c.b16.start.end [1/1] (short) (narrow) %v1216_v24, 16  ;;  %3545 = vrcp.f32 %v1195_v29 }
 0x454   : > { %v1247_v30 = vpop.trf.xlu1 }
 0x455   : > { %v3544_v25 = vpop.eup %3543 }
 0x456   : > { %v1204_v26 = vmul.f32 %v3544_v25, %v3536_v6 }
 0x458   : > { %v1208_v27 = vpack.c.bf16 %v1204_v26, %v1204_v26 }
 0x459   : > { %v3546_v31 = vpop.eup %3545 }
 0x45a   : > { %v1337_v28 = vsel %vm969_vm3, %v1208_v27, 0  ;;  %v1205_v32 = vmul.f32 %v3546_v31, %v3538_v8  ;;  %v3846_v8 = vsub.s32 %v1603_v2, %v1605_v4  ;;  %v3521_v2 = vld [vmem:[%s4114_s13] sm:$0xff]  }
 0x45b   : > { %3379 = vmatpush3.bf16.xpose.msra.mxu1 %v1337_v28 }
 0x45c   : > { %3390 = vmatprep.subr.bf16.mxu1 %v3579_v1  ;;  %v1209_v34 = vpack.c.bf16 %v1205_v32, %v1205_v32  ;;  %v3520_v32 = vld [vmem:[%s4151_s28 + $0x8] sm:$0xff]  }
 0x45e   : > { %v1383_v36 = vsel %vm969_vm3, %v1209_v34, 0 }
 0x462   : > { %3381 = vmatmul.mubr.msk.bf16.vlgmr.msra.gmra.mrb[8].mxu1 %vm969_vm3, %v1247_v30 }
 0x463   : > { %3392 = vmatprep.mubr.msk.bf16.mxu1 %vm3580_vm0, %v3579_v1 }
 0x469   : > { %v1279_v41 = vpop.trf.xlu1 }
 0x47f   : > { %v1198_v33 = vpop.xlane.xlu0 %1197 }
 0x480   : > { %3547 = vrcp.f32 %v1198_v33 }
 0x485   : > { %v1231_v35 = vpop.trf.xlu0 }
 0x486   : > { %3375 = vmatmul.mubr.msk.bf16.vlgmr.msra.gmra.mrb[12].mxu0 %vm969_vm3, %v1231_v35 }
 0x487   : > { %3385 = vmatpush3.bf16.xpose.msra.mxu0 %v1383_v36  ;;  %3386 = vmatprep.mubr.msk.bf16.mxu0 %vm3580_vm0, %v3579_v1 }
 0x488   : > { %3396 = vmatprep.subr.bf16.mxu0 %v3579_v1 }
 0x48a   : > { %v3548_v37 = vpop.eup %3547 }
 0x48b   : > { %v1206_v38 = vmul.f32 %v3548_v37, %v3540_v15  ;;  %v3848_v15 = vsub.s32 %v1635_v7, %v1605_v4  ;;  %v3522_v4 = vld [vmem:[%s4114_s13 + $0x8] sm:$0xff]  }
 0x48d   : > { %v1210_v39 = vpack.c.bf16 %v1206_v38, %v1206_v38 }
 0x48f   : > { %v1429_v40 = vsel %vm969_vm3, %v1210_v39, 0 }
 0x490   : > { %3391 = vmatpush3.bf16.xpose.msra.mxu1 %v1429_v40 }
 0x491   : > { %3404 = vmatprep.subr.bf16.mxu1 %v3579_v1 }
 0x497   : > { %3393 = vmatmul.mubr.msk.bf16.vlgmr.msra.gmra.mrb[12].mxu1 %vm969_vm3, %v1279_v41 }
 0x498   : > { %3408 = vmatprep.mubr.msk.bf16.mxu1 %vm3580_vm0, %v3579_v1 }
 0x4b5   : > { %v1263_v42 = vpop.trf.xlu0 }
 0x4b6   : > { %3387 = vmatmul.mubr.msk.bf16.vlgmr.msra.gmra.mrb[16].mxu0 %vm969_vm3, %v1263_v42 }
 0x4b7   : > { %3400 = vmatprep.mubr.msk.bf16.mxu0 %vm3580_vm0, %v3579_v1  ;;  %3397 = vmatpush3.bf16.msra.mxu0 %v3519_v23 }
 0x4b8   : > { %3398 = vmatprep.subr.bf16.mxu0 %v3579_v1 }
 0x4bb   : > { %3399 = vmatpush3.bf16.msra.mxu0 %v3520_v32 }
 0x4bc   : > { %3412 = vmatprep.subr.bf16.mxu0 %v3579_v1 }
 0x535   : > { %v1373_v43 = vpop.f32.mrb[8].mxu1 }
 0x536   : > { %v3382_v44 = vpop.f32.mrb[9].mxu1  ;;  %1503 = vxpose.xlu1.b32.start.end [1/1] (short) (narrow) %v1373_v43, 8 }
 0x537   : > { %v1376_v45 = vpop.f32.mrb[10].mxu1 }
 0x538   : > { %v3383_v46 = vpop.f32.mrb[11].mxu1 }
 0x559   : > { %v1327_v47 = vpop.f32.mrb[12].mxu0 }
 0x55a   : > { %v3376_v48 = vpop.f32.mrb[13].mxu0  ;;  %1471 = vxpose.xlu0.b32.start.end [1/1] (short) (narrow) %v1327_v47, 8 }
 0x55b   : > { %v1330_v49 = vpop.f32.mrb[14].mxu0 }
 0x55c   : > { %v3377_v50 = vpop.f32.mrb[15].mxu0 }
 0x56a   : > { %v1465_v51 = vpop.f32.mrb[12].mxu1 }
 0x56b   : > { %v3394_v52 = vpop.f32.mrb[13].mxu1 }
 0x56c   : > { %v1468_v53 = vpop.f32.mrb[14].mxu1 }
 0x56d   : > { %v3395_v54 = vpop.f32.mrb[15].mxu1 }
 0x589   : > { %v1419_v55 = vpop.f32.mrb[16].mxu0 }
 0x58a   : > { %1535 = vxpose.xlu0.b32.start.end [1/1] (short) (narrow) %v1419_v55, 8  ;;  %v3388_v56 = vpop.f32.mrb[17].mxu0 }
 0x58b   : > { %v1422_v57 = vpop.f32.mrb[18].mxu0  ;;  %v3240_v56 = vld [vmem:[%s4152_s5] ss:$0 sm:$0xff]  ;;  %s4153_s5 = sld [smem:[#allocation3_spill]] }
 0x58c   : > { %v3389_v58 = vpop.f32.mrb[19].mxu0  ;;  %v1819_v57 = vunpack.c.l.bf16 %v3752_v3 }
 0x58e   : > { %1567 = vxpose.xlu0.b32.start.end [1/1] (short) (narrow) %v1465_v51, 8 }
 0x591   : > { %s794_s6 = scalar_lea.vmem %s4153_s5, %s3745_s1 }
 0x592   : > { %v807_v3 = vld [vmem:[%s794_s6] sm:$0xf]  ;;  %s804_s6 = scalar_lea.vmem %s4126_s25, %s3745_s1 }
 0x5b6   : > { %v1519_v6 = vpop.trf.xlu1 }
 0x5da   : > { %v1487_v59 = vpop.trf.xlu0 }
 0x60a   : > { %v1551_v5 = vpop.trf.xlu0 }
 0x60b   : > { %v1599_v9 = vcombine.low %v1487_v59, %v1551_v5  ;;  %v1600_v10 = vcombine.high %v1487_v59, %v1551_v5 }
 0x60d   : > { %v1607_v16 = vrot.slane %v1599_v9, %v3846_v8  ;;  %v1614_v17 = vrot.slane %v1600_v10, %v3846_v8 }
 0x60e   : > { %v1583_v11 = vpop.trf.xlu0 }
 0x60f   : > { %v1615_v12 = vcombine.low %v1519_v6, %v1583_v11  ;;  %v1616_v14 = vcombine.high %v1519_v6, %v1583_v11  ;;  %v3523_v11 = vld [vmem:[%s4112_s11] sm:$0xff]  }
 0x610   : > { %3405 = vmatpush3.bf16.msra.mxu1 %v3523_v11 }
 0x611   : > { %v1623_v18 = vrot.slane %v1615_v12, %v3846_v8  ;;  %v1630_v19 = vrot.slane %v1616_v14, %v3846_v8  ;;  %v3524_v12 = vld [vmem:[%s4112_s11 + $0x8] sm:$0xff]   ;;  %3406 = vmatprep.subr.bf16.mxu1 %v3579_v1  ;;  %v3250_v14 = vld [vmem:[%s4115_s14] ss:$0 sm:$0xff] }
 0x613   : > { %v1631_v20 = vcombine.low %v1607_v16, %v1623_v18  ;;  %v1632_v21 = vcombine.high %v1607_v16, %v1623_v18  ;;  %v1647_v22 = vcombine.low %v1614_v17, %v1630_v19  ;;  %v1648_v13 = vcombine.high %v1614_v17, %v1630_v19 }
 0x614   : > { %3407 = vmatpush3.bf16.msra.mxu1 %v3524_v12 }
 0x615   : > { %v1639_v24 = vrot.slane %v1631_v20, %v3848_v15  ;;  %v1646_v25 = vrot.slane %v1632_v21, %v3848_v15  ;;  %v1655_v26 = vrot.slane %v1647_v22, %v3848_v15  ;;  %v1662_v27 = vrot.slane %v1648_v13, %v3848_v15  ;;  %3420 = vmatprep.subr.bf16.mxu1 %v3579_v1 }
 0x617   : > { %v1667_v28 = vcombine.low %v1639_v24, %v1646_v25  ;;  %v3238_v29 = vcombine.high %v1639_v24, %v1646_v25  ;;  %v1683_v30 = vcombine.low %v1655_v26, %v1662_v27  ;;  %v3239_v31 = vcombine.high %v1655_v26, %v1662_v27  ;;  %v3245_v27 = vld [vmem:[%s4111_s10] ss:$0 sm:$0xff] }
 0x619   : > { %v1674_v33 = vrot.slane %v1667_v28, %v3846_v8  ;;  %v1682_v34 = vrot.slane %v3238_v29, %v3846_v8  ;;  %v1690_v35 = vrot.slane %v1683_v30, %v3846_v8  ;;  %v1698_v36 = vrot.slane %v3239_v31, %v3846_v8 }
 0x61b   : > { %v1700_v37 = vcombine.high %v1674_v33, %v1682_v34  ;;  %v1716_v38 = vcombine.high %v1690_v35, %v1698_v36  ;;  %v1699_v39 = vcombine.low %v1674_v33, %v1682_v34  ;;  %v1715_v40 = vcombine.low %v1690_v35, %v1698_v36  ;;  %v3246_v34 = vld [vmem:[%s4113_s12] ss:$0 sm:$0xff] }
 0x61d   : > { %v1714_v41 = vrot.slane %v1700_v37, %v3848_v15  ;;  %v1730_v42 = vrot.slane %v1716_v38, %v3848_v15  ;;  %v1707_v43 = vrot.slane %v1699_v39, %v3848_v15  ;;  %v1723_v44 = vrot.slane %v1715_v40, %v3848_v15 }
 0x61f   : > { %v1733_v45 = vcombine.low %v1714_v41, %v1730_v42  ;;  %v1732_v46 = vcombine.high %v1707_v43, %v1723_v44  ;;  %v1731_v47 = vcombine.low %v1707_v43, %v1723_v44  ;;  %v1734_v48 = vcombine.high %v1714_v41, %v1730_v42 }
 0x621   : > { %1740 = vrot.lane.b32.xlu0 %v1733_v45, %s4131_s0  ;;  %1736 = vrot.lane.b32.xlu1 %v1732_v46, %s4130_s8  ;;  %s4155_s0 = sld [smem:[#allocation11_spill]] }
 0x625   : > { %1744 = vrot.lane.b32.xlu1 %v1734_v48, %s4129_s27  ;;  %s4158_s27 = smov 16  }
 0x627   : > { %v3244_v25 = vld [vmem:[%s4155_s0] ss:$0 sm:$0xff] }
 0x693   : > { %v1737_v49 = vpop.permute.xlu1 %1736  ;;  %v1741_v50 = vpop.permute.xlu0 %1740 }
 0x694   : > { %v1747_v51 = vsel %vm969_vm3, %v1731_v47, %v1737_v49 }
 0x695   : > { %v1749_v53 = vsel %vm1748_vm4, %v1747_v51, %v1741_v50 }
 0x697   : > { %v1745_v52 = vpop.permute.xlu1 %1744 }
 0x698   : > { %v1751_v54 = vsel %vm1750_vm5, %v1749_v53, %v1745_v52 }
 0x699   : > { %v1752_v55 = vpack.c.bf16 %v1751_v54, %v1751_v54 }
 0x69b   : > { %3401 = vmatmul.mubr.msk.bf16.vlgmr.msra.gmra.mrb[20].mxu0 %vm841_vm1, %v1752_v55 }
 0x69c   : > { %3416 = vmatprep.mubr.msk.bf16.mxu0 %vm3580_vm0, %v3579_v1  ;;  %3413 = vmatpush3.bf16.msra.mxu0 %v3521_v2 }
 0x69d   : > { %3414 = vmatprep.subr.bf16.mxu0 %v3579_v1 }
 0x6a0   : > { %3415 = vmatpush3.bf16.msra.mxu0 %v3522_v4 }
 0x6a1   : > { %3426 = vmatprep.subr.bf16.mxu0 %v3579_v1 }
 0x6a3   : > { %3417 = vmatmul.mubr.msk.bf16.vlgmr.msra.gmra.mrb[24].mxu0 %vm841_vm1, %v807_v3 }
 0x6a4   : > { %3428 = vmatprep.mubr.msk.bf16.mxu0 %vm3580_vm0, %v3579_v1 }
 0x76e   : > { %v1813_v58 = vpop.f32.mrb[20].mxu0 }
 0x76f   : > { %v1814_v59 = vadd.f32 %v3240_v56, %v1813_v58  ;;  %v3402_v60 = vpop.f32.mrb[21].mxu0 }
 0x770   : > { %v1816_v61 = vpop.f32.mrb[22].mxu0 }
 0x771   : > { %v3403_v62 = vpop.f32.mrb[23].mxu0  ;;  %v1820_v63 = vadd.f32 %v1819_v57, %v1814_v59 }
 0x773   : > { %v1823_v0 = vsel %vm841_vm1, %v1820_v63, 0.0 }
 0x774   : > { %1824 = vadd.xlane.f32.xlu1 %v1823_v0 }
 0x776   : > { %v1979_v16 = vpop.f32.mrb[24].mxu0 }
 0x777   : > { %v1980_v17 = vadd.f32 %v3250_v14, %v1979_v16  ;;  %v3418_v18 = vpop.f32.mrb[25].mxu0 }
 0x778   : > { %v1982_v19 = vpop.f32.mrb[26].mxu0 }
 0x779   : > { %v3915_v20 = vpack.c.bf16 %v1980_v17, %v1980_v17  ;;  %v3419_v21 = vpop.f32.mrb[27].mxu0 }
 0x785   : > { %1994 = vrot.lane.b32.xlu1 %v3915_v20, %s3582_s30 }
 0x789   : > { %2000 = vrot.lane.b32.xlu1 %v3915_v20, %s4154_s9 }
 0x801   : > { %v1825_v5 = vpop.xlane.xlu1 %1824 }
 0x802   : > { %v1827_v6 = vmul.f32 0.03125, %v1825_v5 }
 0x804   : > { %v1828_v7 = vsub.f32 %v1820_v63, %v1827_v6 }
 0x805   : > { %v3950_v41 = vpop.permute.xlu1 %1994 }
 0x806   : > { %v1829_v9 = vmul.f32 %v1828_v7, %v1828_v7 }
 0x808   : > { %v1830_v10 = vsel %vm841_vm1, %v1829_v9, 0.0 }
 0x809   : > { %1831 = vadd.xlane.f32.xlu0 %v1830_v10  ;;  %v3953_v42 = vpop.permute.xlu1 %2000 }
 0x81f   : > { %1997 = vrot.lane.b32.xlu0 %v3915_v20, %s3584_s26 }
 0x83d   : > { %2003 = vxpose.xlu0.c.b16.start.end [1/1] (short) (narrow) %v3915_v20, 16 }
 0x896   : > { %v1832_v22 = vpop.xlane.xlu0 %1831 }
 0x897   : > { %v1833_v13 = vmul.f32 0.03125, %v1832_v22 }
 0x899   : > { %v1834_v23 = vadd.f32 1e-05, %v1833_v13 }
 0x89a   : > { %v3937_v31 = vpop.permute.xlu0 %1997 }
 0x89b   : > { %3549 = vrsqrt.f32 %v1834_v23 }
 0x8a3   : > { %v2011_v32 = vpop.trf.xlu0 }
 0x8a4   : > { %v2071_v33 = vsel %vm973_vm2, %v2011_v32, 0 }
 0x8a5   : > { %v3550_v24 = vpop.eup %3549 }
 0x8a6   : > { %v1836_v26 = vmul.f32 %v3550_v24, %v1828_v7 }
 0x8a8   : > { %v1843_v28 = vmul.f32 %v3244_v25, %v1836_v26 }
 0x8aa   : > { %v3930_v29 = vadd.f32 %v3245_v27, %v1843_v28 }
 0x8ac   : > { %v1851_v30 = vpack.c.bf16 %v3930_v29, %v3930_v29 }
 0x8ae   : > { %3409 = vmatmul.mubr.msk.bf16.vlgmr.msra.gmra.mrb[16].mxu1 %vm841_vm1, %v1851_v30 }
 0x8af   : > { %3422 = vmatprep.mubr.msk.bf16.mxu1 %vm3580_vm0, %v3579_v1  ;;  %3421 = vmatpush3.bf16.msra.mxu1 %v2071_v33 }
 0x8b0   : > { %3432 = vmatprep.subr.bf16.mxu1 %v3579_v1 }
 0x981   : > { %v1912_v35 = vpop.f32.mrb[16].mxu1 }
 0x982   : > { %v1913_v36 = vadd.f32 %v3246_v34, %v1912_v35  ;;  %v3410_v37 = vpop.f32.mrb[17].mxu1 }
 0x983   : > { %v1915_v38 = vpop.f32.mrb[18].mxu1 }
 0x984   : > { %v1918_v39 = vpack.c.bf16 %v1913_v36, %v1913_v36  ;;  %v3411_v40 = vpop.f32.mrb[19].mxu1 }
 0x986   : > { %1989 = vrot.lane.b32.xlu0 %v1918_v39, %s3584_s26  ;;  %3423 = vmatmul.mubr.msk.bf16.vlgmr.msra.gmra.mrb[20].mxu1 %vm969_vm3, %v1918_v39 }
 0x987   : > { %1987 = vrot.lane.b32.xlu1 %v1918_v39, %s3582_s30  ;;  %3434 = vmatprep.mubr.msk.bf16.mxu1 %vm3580_vm0, %v3579_v1  ;;  %s4160_s30 = smov 24  }
 0x98b   : > { %1991 = vrot.lane.b32.xlu1 %v1918_v39, %s4154_s9  ;;  %s4156_s9 = sld [smem:[#allocation6_spill]] }
 0x991   : > { %s800_s5 = scalar_lea.vmem %s4156_s9, %s4162_s2  ;;  %s4157_s2 = smov 96  }
 0x992   : > { %v3258_v53 = vld [vmem:[%s800_s5] ss:$0 sm:$0xff] }
 0x9a4   : > { %2035 = vxpose.xlu0.c.b16.start.end [1/1] (short) (narrow) %v3937_v31, 16 }
 0x9a8   : > { %2051 = vxpose.xlu0.c.b16.start.end [1/1] (short) (narrow) %v3953_v42, 16 }
 0x9ae   : > { %2019 = vxpose.xlu1.c.b16.start.end [1/1] (short) (narrow) %v3950_v41, 16 }
 0x9f8   : > { %v1990_v43 = vpop.permute.xlu0 %1989 }
 0x9f9   : > { %v1988_v44 = vpop.permute.xlu1 %1987 }
 0x9fd   : > { %v1992_v47 = vpop.permute.xlu1 %1991 }
 0xa0a   : > { %v2043_v45 = vpop.trf.xlu0 }
 0xa0b   : > { %v2163_v46 = vsel %vm973_vm2, %v2043_v45, 0 }
 0xa0c   : > { %3433 = vmatpush3.bf16.msra.mxu1 %v2163_v46 }
 0xa0d   : > { %3444 = vmatprep.subr.bf16.mxu1 %v3579_v1 }
 0xa0e   : > { %v2059_v49 = vpop.trf.xlu0 }
 0xa0f   : > { %3435 = vmatmul.mubr.msk.bf16.vlgmr.msra.gmra.mrb[24].mxu1 %vm969_vm3, %v1990_v43  ;;  %v2209_v51 = vsel %vm973_vm2, %v2059_v49, 0 }
 0xa10   : > { %3446 = vmatprep.mubr.msk.bf16.mxu1 %vm3580_vm0, %v3579_v1 }
 0xa14   : > { %v2027_v48 = vpop.trf.xlu1 }
 0xa15   : > { %v2117_v50 = vsel %vm973_vm2, %v2027_v48, 0 }
 0xa16   : > { %3427 = vmatpush3.bf16.msra.mxu0 %v2117_v50 }
 0xa17   : > { %3438 = vmatprep.subr.bf16.mxu0 %v3579_v1 }
 0xa19   : > { %3429 = vmatmul.mubr.msk.bf16.vlgmr.msra.gmra.mrb[28].mxu0 %vm969_vm3, %v1988_v44 }
 0xa1a   : > { %3439 = vmatpush3.bf16.msra.mxu0 %v2209_v51  ;;  %3440 = vmatprep.mubr.msk.bf16.mxu0 %vm3580_vm0, %v3579_v1 }
 0xa1b   : > { %3450 = vmatprep.subr.bf16.mxu0 %v3579_v1 }
 0xa21   : > { %3441 = vmatmul.mubr.msk.bf16.vlgmr.msra.gmra.mrb[32].mxu0 %vm969_vm3, %v1992_v47 }
 0xa22   : > { %3452 = vmatprep.mubr.msk.bf16.mxu0 %vm3580_vm0, %v3579_v1 }
 0xa59   : > { %v2107_v52 = vpop.f32.mrb[20].mxu1 }
 0xa5a   : > { %v2251_v54 = vmul.f32 0.35355338, %v2107_v52  ;;  %v3424_v55 = vpop.f32.mrb[21].mxu1 }
 0xa5b   : > { %v2110_v56 = vpop.f32.mrb[22].mxu1 }
 0xa5c   : > { %v3425_v57 = vpop.f32.mrb[23].mxu1  ;;  %v2261_v58 = vadd.f32 %v3258_v53, %v2251_v54 }
 0xa5e   : > { %v2265_v59 = vsel %vm969_vm3, %v2261_v58, -inf }
 0xa5f   : > { %2266 = vmax.xlane.f32.xlu1 %v2265_v59 }
 0xae2   : > { %v2199_v60 = vpop.f32.mrb[24].mxu1 }
 0xae3   : > { %v2253_v61 = vmul.f32 0.35355338, %v2199_v60  ;;  %v3436_v62 = vpop.f32.mrb[25].mxu1 }
 0xae4   : > { %v2202_v63 = vpop.f32.mrb[26].mxu1 }
 0xae5   : > { %v3437_v0 = vpop.f32.mrb[27].mxu1  ;;  %v2263_v2 = vadd.f32 %v3258_v53, %v2253_v61 }
 0xae7   : > { %v2271_v4 = vsel %vm969_vm3, %v2263_v2, -inf }
 0xae8   : > { %2272 = vmax.xlane.f32.xlu1 %v2271_v4 }
 0xaec   : > { %v2153_v3 = vpop.f32.mrb[28].mxu0  ;;  %v2267_v22 = vpop.xlane.xlu1 %2266 }
 0xaed   : > { %v2252_v5 = vmul.f32 0.35355338, %v2153_v3  ;;  %v3430_v6 = vpop.f32.mrb[29].mxu0  ;;  %v2277_v13 = vsub.f32 %v2261_v58, %v2267_v22 }
 0xaee   : > { %v2156_v7 = vpop.f32.mrb[30].mxu0 }
 0xaef   : > { %v3431_v9 = vpop.f32.mrb[31].mxu0  ;;  %v2262_v10 = vadd.f32 %v3258_v53, %v2252_v5  ;;  %v2281_v23 = vmul.f32 1.442695, %v2277_v13 }
 0xaf1   : > { %v2268_v11 = vsel %vm969_vm3, %v2262_v10, -inf  ;;  %3551 = vpow2.f32 %v2281_v23 }
 0xaf2   : > { %2269 = vmax.xlane.f32.xlu0 %v2268_v11 }
 0xaf4   : > { %v2245_v12 = vpop.f32.mrb[32].mxu0 }
 0xaf5   : > { %v2254_v14 = vmul.f32 0.35355338, %v2245_v12  ;;  %v3442_v16 = vpop.f32.mrb[33].mxu0 }
 0xaf6   : > { %v2248_v17 = vpop.f32.mrb[34].mxu0 }
 0xaf7   : > { %v3443_v18 = vpop.f32.mrb[35].mxu0  ;;  %v2264_v19 = vadd.f32 %v3258_v53, %v2254_v14 }
 0xaf9   : > { %2313 = vrot.lane.b32.xlu1 %v3915_v20, %s4157_s2  ;;  %v2274_v21 = vsel %vm969_vm3, %v2264_v19, -inf }
 0xafa   : > { %2275 = vmax.xlane.f32.xlu0 %v2274_v21 }
 0xafb   : > { %v3552_v24 = vpop.eup %3551 }
 0xafc   : > { %v2289_v25 = vsel %vm969_vm3, %v3552_v24, 0.0 }
 0xb10   : > { %2315 = vrot.lane.b32.xlu0 %v3950_v41, %s4157_s2 }
 0xb1d   : > { %2290 = vadd.xlane.f32.xlu1 %v2289_v25 }
 0xb2e   : > { %2317 = vrot.lane.b32.xlu1 %v3937_v31, %s4157_s2 }
 0xb75   : > { %v2273_v26 = vpop.xlane.xlu1 %2272 }
 0xb76   : > { %v2279_v27 = vsub.f32 %v2263_v2, %v2273_v26 }
 0xb78   : > { %v2285_v20 = vmul.f32 1.442695, %v2279_v27 }
 0xb79   : > { %v2314_v37 = vpop.permute.xlu1 %2313 }
 0xb7a   : > { %3553 = vpow2.f32 %v2285_v20 }
 0xb7f   : > { %v2270_v28 = vpop.xlane.xlu0 %2269 }
 0xb80   : > { %v2278_v30 = vsub.f32 %v2262_v10, %v2270_v28 }
 0xb82   : > { %v2283_v32 = vmul.f32 1.442695, %v2278_v30 }
 0xb84   : > { %v3554_v33 = vpop.eup %3553  ;;  %3555 = vpow2.f32 %v2283_v32 }
 0xb85   : > { %v2295_v34 = vsel %vm969_vm3, %v3554_v33, 0.0 }
 0xb86   : > { %2296 = vadd.xlane.f32.xlu1 %v2295_v34 }
 0xb87   : > { %v2276_v38 = vpop.xlane.xlu0 %2275 }
 0xb88   : > { %v2280_v39 = vsub.f32 %v2264_v19, %v2276_v38 }
 0xb8a   : > { %v2287_v40 = vmul.f32 1.442695, %v2280_v39 }
 0xb8b   : > { %v2316_v48 = vpop.permute.xlu0 %2315 }
 0xb8e   : > { %v3556_v35 = vpop.eup %3555 }
 0xb8f   : > { %v2292_v36 = vsel %vm969_vm3, %v3556_v35, 0.0 }
 0xb90   : > { %2293 = vadd.xlane.f32.xlu0 %v2292_v36 }
 0xba6   : > { %2319 = vrot.lane.b32.xlu0 %v3953_v42, %s4157_s2 }
 0xbaa   : > { %v2291_v31 = vpop.xlane.xlu1 %2290 }
 0xbab   : > { %3557 = vrcp.f32 %v2291_v31  ;;  %v3525_v31 = vld [vmem:[%s4116_s15] sm:$0xff]  }
 0xbac   : > { %3559 = vpow2.f32 %v2287_v40 }
 0xbae   : > { %v2318_v43 = vpop.permute.xlu1 %2317 }
 0xbb3   : > { %2325 = vxpose.xlu1.c.b16.start.end [1/1] (short) (narrow) %v2314_v37, 16 }
 0xbb5   : > { %v3558_v41 = vpop.eup %3557 }
 0xbb6   : > { %v2305_v44 = vmul.f32 %v3558_v41, %v3552_v24  ;;  %v3560_v47 = vpop.eup %3559 }
 0xbb7   : > { %2357 = vxpose.xlu1.c.b16.start.end [1/1] (short) (narrow) %v2318_v43, 16  ;;  %v2298_v42 = vsel %vm969_vm3, %v3560_v47, 0.0 }
 0xbb8   : > { %v2309_v45 = vpack.c.bf16 %v2305_v44, %v2305_v44 }
 0xbba   : > { %v2393_v46 = vsel %vm969_vm3, %v2309_v45, 0 }
 0xbbb   : > { %3445 = vmatpush3.bf16.xpose.msra.mxu1 %v2393_v46 }
 0xbbc   : > { %3456 = vmatprep.subr.bf16.mxu1 %v3579_v1 }
 0xbc5   : > { %2299 = vadd.xlane.f32.xlu0 %v2298_v42 }
 0xbf2   : > { %2341 = vxpose.xlu0.c.b16.start.end [1/1] (short) (narrow) %v2316_v48, 16 }
 0xc13   : > { %v2297_v49 = vpop.xlane.xlu1 %2296 }
 0xc14   : > { %3561 = vrcp.f32 %v2297_v49 }
 0xc19   : > { %v2333_v50 = vpop.trf.xlu1 }
 0xc1a   : > { %3447 = vmatmul.mubr.msk.bf16.vlgmr.msra.gmra.mrb[28].mxu1 %vm969_vm3, %v2333_v50 }
 0xc1b   : > { %3458 = vmatprep.mubr.msk.bf16.mxu1 %vm3580_vm0, %v3579_v1 }
 0xc1d   : > { %v2294_v51 = vpop.xlane.xlu0 %2293  ;;  %v2365_v58 = vpop.trf.xlu1 }
 0xc1e   : > { %v3562_v52 = vpop.eup %3561  ;;  %3563 = vrcp.f32 %v2294_v51 }
 0xc1f   : > { %v2307_v53 = vmul.f32 %v3562_v52, %v3554_v33 }
 0xc21   : > { %v2320_v54 = vpop.permute.xlu0 %2319  ;;  %v2311_v55 = vpack.c.bf16 %v2307_v53, %v2307_v53 }
 0xc22   : > { %2373 = vxpose.xlu0.c.b16.start.end [1/1] (short) (narrow) %v2320_v54, 16 }
 0xc23   : > { %v2485_v56 = vsel %vm969_vm3, %v2311_v55, 0 }
 0xc24   : > { %3457 = vmatpush3.bf16.xpose.msra.mxu1 %v2485_v56 }
 0xc25   : > { %3468 = vmatprep.subr.bf16.mxu1 %v3579_v1 }
 0xc28   : > { %v3564_v57 = vpop.eup %3563 }
 0xc29   : > { %v2306_v59 = vmul.f32 %v3564_v57, %v3556_v35 }
 0xc2b   : > { %v2310_v60 = vpack.c.bf16 %v2306_v59, %v2306_v59  ;;  %3459 = vmatmul.mubr.msk.bf16.vlgmr.msra.gmra.mrb[32].mxu1 %vm969_vm3, %v2365_v58 }
 0xc2c   : > { %3472 = vmatprep.mubr.msk.bf16.mxu1 %vm3580_vm0, %v3579_v1  ;;  %3469 = vmatpush3.bf16.msra.mxu1 %v3525_v31 }
 0xc2d   : > { %v2439_v61 = vsel %vm969_vm3, %v2310_v60, 0  ;;  %3470 = vmatprep.subr.bf16.mxu1 %v3579_v1 }
 0xc2e   : > { %3451 = vmatpush3.bf16.xpose.msra.mxu0 %v2439_v61 }
 0xc2f   : > { %3462 = vmatprep.subr.bf16.mxu0 %v3579_v1 }
 0xc52   : > { %v2300_v62 = vpop.xlane.xlu0 %2299 }
 0xc53   : > { %3565 = vrcp.f32 %v2300_v62 }
 0xc58   : > { %v2349_v63 = vpop.trf.xlu0 }
 0xc59   : > { %3453 = vmatmul.mubr.msk.bf16.vlgmr.msra.gmra.mrb[36].mxu0 %vm969_vm3, %v2349_v63 }
 0xc5a   : > { %3464 = vmatprep.mubr.msk.bf16.mxu0 %vm3580_vm0, %v3579_v1 }
 0xc5d   : > { %v3566_v0 = vpop.eup %3565 }
 0xc5e   : > { %v2308_v2 = vmul.f32 %v3566_v0, %v3560_v47  ;;  %v3526_v47 = vld [vmem:[%s4116_s15 + $0x8] sm:$0xff]  }
 0xc5f   : > { %3471 = vmatpush3.bf16.msra.mxu1 %v3526_v47 }
 0xc60   : > { %v2312_v4 = vpack.c.bf16 %v2308_v2, %v2308_v2  ;;  %3484 = vmatprep.subr.bf16.mxu1 %v3579_v1 }
 0xc62   : > { %v2531_v3 = vsel %vm969_vm3, %v2312_v4, 0 }
 0xc63   : > { %3463 = vmatpush3.bf16.xpose.msra.mxu0 %v2531_v3 }
 0xc64   : > { %3476 = vmatprep.subr.bf16.mxu0 %v3579_v1 }
 0xc88   : > { %v2381_v5 = vpop.trf.xlu0 }
 0xc89   : > { %3465 = vmatmul.mubr.msk.bf16.vlgmr.msra.gmra.mrb[40].mxu0 %vm969_vm3, %v2381_v5 }
 0xc8a   : > { %3480 = vmatprep.mubr.msk.bf16.mxu0 %vm3580_vm0, %v3579_v1 }
 0xced   : > { %v2429_v6 = vpop.f32.mrb[28].mxu1 }
 0xcee   : > { %v3448_v7 = vpop.f32.mrb[29].mxu1  ;;  %2573 = vxpose.xlu1.b32.start.end [1/1] (short) (narrow) %v2429_v6, 8 }
 0xcef   : > { %v2432_v9 = vpop.f32.mrb[30].mxu1 }
 0xcf0   : > { %v3449_v10 = vpop.f32.mrb[31].mxu1 }
 0xcf1   : > { %v3265_v10 = vld [vmem:[%s4117_s16] ss:$0 sm:$0xff] }
 0xcfe   : > { %v2521_v11 = vpop.f32.mrb[32].mxu1 }
 0xcff   : > { %v3460_v12 = vpop.f32.mrb[33].mxu1 }
 0xd00   : > { %v2524_v14 = vpop.f32.mrb[34].mxu1 }
 0xd01   : > { %v3461_v16 = vpop.f32.mrb[35].mxu1 }
 0xd2c   : > { %v2475_v17 = vpop.f32.mrb[36].mxu0 }
 0xd2d   : > { %v3454_v18 = vpop.f32.mrb[37].mxu0  ;;  %2605 = vxpose.xlu0.b32.start.end [1/1] (short) (narrow) %v2475_v17, 8 }
 0xd2e   : > { %v2478_v19 = vpop.f32.mrb[38].mxu0 }
 0xd2f   : > { %v3455_v21 = vpop.f32.mrb[39].mxu0 }
 0xd31   : > { %2637 = vxpose.xlu0.b32.start.end [1/1] (short) (narrow) %v2521_v11, 8 }
 0xd5c   : > { %v2567_v22 = vpop.f32.mrb[40].mxu0 }
 0xd5d   : > { %2669 = vxpose.xlu1.b32.start.end [1/1] (short) (narrow) %v2567_v22, 8  ;;  %v3466_v13 = vpop.f32.mrb[41].mxu0 }
 0xd5e   : > { %v2570_v23 = vpop.f32.mrb[42].mxu0 }
 0xd5f   : > { %v3467_v24 = vpop.f32.mrb[43].mxu0 }
 0xd6e   : > { %v2589_v26 = vpop.trf.xlu1 }
 0xdad   : > { %v2621_v25 = vpop.trf.xlu0 }
 0xdb1   : > { %v2653_v27 = vpop.trf.xlu0 }
 0xdb2   : > { %v2701_v20 = vcombine.low %v2589_v26, %v2653_v27  ;;  %v2702_v28 = vcombine.high %v2589_v26, %v2653_v27  ;;  %v3529_v26 = vld [vmem:[%s4122_s21] sm:$0xff]   ;;  %v3530_v27 = vld [vmem:[%s4122_s21 + $0x8] sm:$0xff]  }
 0xdb4   : > { %v2709_v34 = vrot.slane %v2701_v20, %v3846_v8  ;;  %v2716_v35 = vrot.slane %v2702_v28, %v3846_v8 }
 0xddd   : > { %v2685_v30 = vpop.trf.xlu1 }
 0xdde   : > { %v2717_v32 = vcombine.low %v2621_v25, %v2685_v30  ;;  %v2718_v33 = vcombine.high %v2621_v25, %v2685_v30  ;;  %v3527_v25 = vld [vmem:[%s4120_s19] sm:$0xff]  }
 0xddf   : > { %3477 = vmatpush3.bf16.msra.mxu0 %v3527_v25 }
 0xde0   : > { %v2725_v36 = vrot.slane %v2717_v32, %v3846_v8  ;;  %v2732_v37 = vrot.slane %v2718_v33, %v3846_v8  ;;  %3478 = vmatprep.subr.bf16.mxu0 %v3579_v1  ;;  %v3269_v33 = vld [vmem:[%s4118_s17] ss:$0 sm:$0xff] }
 0xde2   : > { %v2733_v38 = vcombine.low %v2709_v34, %v2725_v36  ;;  %v2734_v39 = vcombine.high %v2709_v34, %v2725_v36  ;;  %v2749_v40 = vcombine.low %v2716_v35, %v2732_v37  ;;  %v2750_v41 = vcombine.high %v2716_v35, %v2732_v37  ;;  %v3270_v35 = vld [vmem:[%s4119_s18] ss:$0 sm:$0xff] }
 0xde4   : > { %v2741_v43 = vrot.slane %v2733_v38, %v3848_v15  ;;  %v2748_v44 = vrot.slane %v2734_v39, %v3848_v15  ;;  %v2757_v45 = vrot.slane %v2749_v40, %v3848_v15  ;;  %v2764_v46 = vrot.slane %v2750_v41, %v3848_v15  ;;  %v3531_v38 = vld [vmem:[%s4122_s21 + $0x10] sm:$0xff]   ;;  %v3532_v39 = vld [vmem:[%s4122_s21 + $0x18] sm:$0xff]   ;;  %v3271_v40 = vld [vmem:[%s4121_s20] ss:$0 sm:$0xff] }
 0xde6   : > { %v2769_v42 = vcombine.low %v2741_v43, %v2748_v44  ;;  %v3263_v48 = vcombine.high %v2741_v43, %v2748_v44  ;;  %v2785_v49 = vcombine.low %v2757_v45, %v2764_v46  ;;  %v3264_v50 = vcombine.high %v2757_v45, %v2764_v46 }
 0xde8   : > { %v2776_v51 = vrot.slane %v2769_v42, %v3846_v8  ;;  %v2784_v52 = vrot.slane %v3263_v48, %v3846_v8  ;;  %v2792_v53 = vrot.slane %v2785_v49, %v3846_v8  ;;  %v2800_v54 = vrot.slane %v3264_v50, %v3846_v8 }
 0xdea   : > { %v2802_v55 = vcombine.high %v2776_v51, %v2784_v52  ;;  %v2818_v56 = vcombine.high %v2792_v53, %v2800_v54  ;;  %v2801_v57 = vcombine.low %v2776_v51, %v2784_v52  ;;  %v2817_v58 = vcombine.low %v2792_v53, %v2800_v54 }
 0xdec   : > { %v2816_v59 = vrot.slane %v2802_v55, %v3848_v15  ;;  %v2832_v60 = vrot.slane %v2818_v56, %v3848_v15  ;;  %v2809_v61 = vrot.slane %v2801_v57, %v3848_v15  ;;  %v2825_v62 = vrot.slane %v2817_v58, %v3848_v15 }
 0xdee   : > { %v2835_v63 = vcombine.low %v2816_v59, %v2832_v60  ;;  %v2834_v0 = vcombine.high %v2809_v61, %v2825_v62  ;;  %v2833_v2 = vcombine.low %v2809_v61, %v2825_v62  ;;  %v2836_v8 = vcombine.high %v2816_v59, %v2832_v60 }
 0xdf0   : > { %2842 = vrot.lane.b32.xlu1 %v2835_v63, %s4158_s27  ;;  %2838 = vrot.lane.b32.xlu0 %v2834_v0, %s4159_s4  ;;  %v3281_v0 = vld [vmem:[%s4124_s23] ss:$0 sm:$0xff] }
 0xdf4   : > { %2846 = vrot.lane.b32.xlu1 %v2836_v8, %s4160_s30  ;;  %v3282_v8 = vld [vmem:[%s4125_s24] ss:$0 sm:$0xff] }
 0xe62   : > { %v2843_v4 = vpop.permute.xlu1 %2842  ;;  %v2839_v3 = vpop.permute.xlu0 %2838 }
 0xe63   : > { %v2849_v5 = vsel %vm969_vm3, %v2833_v2, %v2839_v3 }
 0xe64   : > { %v2850_v7 = vsel %vm1748_vm4, %v2849_v5, %v2843_v4 }
 0xe66   : > { %v2847_v6 = vpop.permute.xlu1 %2846 }
 0xe67   : > { %v2851_v9 = vsel %vm1750_vm5, %v2850_v7, %v2847_v6 }
 0xe68   : > { %v2852_v15 = vpack.c.bf16 %v2851_v9, %v2851_v9 }
 0xe6a   : > { %3473 = vmatmul.mubr.msk.bf16.vlgmr.msra.gmra.mrb[36].mxu1 %vm841_vm1, %v2852_v15 }
 0xe6b   : > { %3492 = vmatprep.mubr.msk.bf16.mxu1 %vm3580_vm0, %v3579_v1  ;;  %3485 = vmatpush3.bf16.msra.mxu1 %v3529_v26 }
 0xe6c   : > { %3486 = vmatprep.subr.bf16.mxu1 %v3579_v1 }
 0xe6f   : > { %3487 = vmatpush3.bf16.msra.mxu1 %v3530_v27 }
 0xe70   : > { %3488 = vmatprep.subr.bf16.mxu1 %v3579_v1 }
 0xe73   : > { %3489 = vmatpush3.bf16.msra.mxu1 %v3531_v38 }
 0xe74   : > { %3490 = vmatprep.subr.bf16.mxu1 %v3579_v1  ;;  %v3275_v1 = vld [vmem:[%s4123_s22] ss:$0 sm:$0xff] }
 0xe77   : > { %3491 = vmatpush3.bf16.msra.mxu1 %v3532_v39 }
 0xf3d   : > { %v2913_v11 = vpop.f32.mrb[36].mxu1 }
 0xf3e   : > { %v2914_v12 = vadd.f32 %v3265_v10, %v2913_v11  ;;  %v3474_v14 = vpop.f32.mrb[37].mxu1 }
 0xf3f   : > { %v2916_v16 = vpop.f32.mrb[38].mxu1 }
 0xf40   : > { %v3475_v17 = vpop.f32.mrb[39].mxu1  ;;  %v2919_v18 = vadd.f32 %v2914_v12, %v3930_v29  ;;  %v3528_v29 = vld [vmem:[%s4120_s19 + $0x8] sm:$0xff]  }
 0xf41   : > { %3479 = vmatpush3.bf16.msra.mxu0 %v3528_v29 }
 0xf42   : > { %v2922_v19 = vsel %vm841_vm1, %v2919_v18, 0.0 }
 0xf43   : > { %2923 = vadd.xlane.f32.xlu1 %v2922_v19 }
 0xfd0   : > { %v2924_v21 = vpop.xlane.xlu1 %2923 }
 0xfd1   : > { %v2925_v22 = vmul.f32 0.03125, %v2924_v21 }
 0xfd3   : > { %v2926_v13 = vsub.f32 %v2919_v18, %v2925_v22 }
 0xfd5   : > { %v2927_v23 = vmul.f32 %v2926_v13, %v2926_v13 }
 0xfd7   : > { %v2928_v24 = vsel %vm841_vm1, %v2927_v23, 0.0 }
 0xfd8   : > { %2929 = vadd.xlane.f32.xlu0 %v2928_v24 }
0x1065   : > { %v2930_v20 = vpop.xlane.xlu0 %2929 }
0x1066   : > { %v2931_v28 = vmul.f32 0.03125, %v2930_v20 }
0x1068   : > { %v2932_v30 = vadd.f32 1e-05, %v2931_v28 }
0x106a   : > { %3567 = vrsqrt.f32 %v2932_v30 }
0x1074   : > { %v3568_v32 = vpop.eup %3567 }
0x1075   : > { %v2934_v34 = vmul.f32 %v3568_v32, %v2926_v13 }
0x1077   : > { %v2941_v36 = vmul.f32 %v3269_v33, %v2934_v34 }
0x1079   : > { %v2948_v37 = vadd.f32 %v3270_v35, %v2941_v36 }
0x107b   : > { %v2949_v31 = vpack.c.bf16 %v2948_v37, %v2948_v37 }
0x107d   : > { %3481 = vmatmul.mubr.msk.bf16.vlgmr.msra.gmra.mrb[44].mxu0 %vm841_vm1, %v2949_v31 }
0x1150   : > { %v3010_v41 = vpop.f32.mrb[44].mxu0 }
0x1151   : > { %v3011_v43 = vadd.f32 %v3271_v40, %v3010_v41  ;;  %v3482_v44 = vpop.f32.mrb[45].mxu0 }
0x1152   : > { %v3013_v45 = vpop.f32.mrb[46].mxu0 }
0x1153   : > { %v3016_v46 = vmax.f32 %v3011_v43, 0.0  ;;  %v3483_v47 = vpop.f32.mrb[47].mxu0 }
0x1155   : > { %v3017_v42 = vpack.c.bf16 %v3016_v46, %v3016_v46 }
0x1157   : > { %3493 = vmatmul.mubr.msk.bf16.vlgmr.msra.gmra.mrb[40].mxu1 %vm3057_vm6, %v3017_v42 }
0x122a   : > { %v3095_v48 = vpop.f32.mrb[40].mxu1 }
0x122b   : > { %v3096_v49 = vadd.f32 %v3275_v1, %v3095_v48  ;;  %v3494_v50 = vpop.f32.mrb[41].mxu1 }
0x122c   : > { %v3098_v51 = vpop.f32.mrb[42].mxu1 }
0x122d   : > { %v3495_v52 = vpop.f32.mrb[43].mxu1  ;;  %v3101_v53 = vadd.f32 %v3096_v49, %v2948_v37 }
0x122f   : > { %v3104_v54 = vsel %vm841_vm1, %v3101_v53, 0.0 }
0x1230   : > { %3105 = vadd.xlane.f32.xlu0 %v3104_v54 }
0x12bd   : > { %v3106_v55 = vpop.xlane.xlu0 %3105 }
0x12be   : > { %v3107_v56 = vmul.f32 0.03125, %v3106_v55 }
0x12c0   : > { %v3108_v57 = vsub.f32 %v3101_v53, %v3107_v56 }
0x12c2   : > { %v3109_v58 = vmul.f32 %v3108_v57, %v3108_v57 }
0x12c4   : > { %v3110_v59 = vsel %vm841_vm1, %v3109_v58, 0.0 }
0x12c5   : > { %3111 = vadd.xlane.f32.xlu1 %v3110_v59 }
0x1352   : > { %v3112_v60 = vpop.xlane.xlu1 %3111 }
0x1353   : > { %v3113_v61 = vmul.f32 0.03125, %v3112_v60 }
0x1355   : > { %v3114_v62 = vadd.f32 1e-05, %v3113_v61 }
0x1357   : > { %3569 = vrsqrt.f32 %v3114_v62 }
0x1361   : > { %v3570_v63 = vpop.eup %3569 }
0x1362   : > { %v3116_v2 = vmul.f32 %v3570_v63, %v3108_v57 }
0x1364   : > { %v3123_v4 = vmul.f32 %v3281_v0, %v3116_v2 }
0x1366   : > { %v3130_v3 = vadd.f32 %v3282_v8, %v3123_v4 }
0x1368   : > { %v3131_v5 = vpack.c.bf16 %v3130_v3, %v3130_v3 }
0x136a   : > { %3133 = vst.msk [vmem:[%s804_s6] sm:$0xf] %vm3132_vm7, %v3131_v5 }
0x136b PF: > { %s35_s29 = sadd.s32 1, %s3577_s29  }
0x136c   : > { %p32_p4 = scmp.ge.s32.totalorder %s35_s29, 4  }
0x136e   :  { %34 = sbr.rel (!%p32_p4) target bundleno = 11 (0xb), region = 159 }

</bundles_post_ra>
